<compile_context>
chip_gen: v5e
topology: v5e:2x2
jax: 0.10.0
libtpu: 0.0.40
codegen_flags: <defaults>
</compile_context>

<pallas_src>
import math

import jax
import jax.numpy as jnp
from jax.experimental import pallas as pl
from jax.experimental.pallas import tpu as pltpu

# ---- hyperparameters (CropTransformer defaults) ----
D_MODEL = 52
NHEAD = 4
HEAD_DIM = D_MODEL // NHEAD
DIM_FF = 256
HIDDEN = 128
HIDDEN2 = HIDDEN // 2
NUM_LAYERS = 2
OUTPUT = 4
SEQ_LEN = 12
EPS = 1e-5

LANE = 256            # lane width of the encoder-layer slabs
CLANE = 128           # lane width of the classifier slabs (padded logits width)
MAX_BATCH_TILE = 64   # 64 sequences * 12 tokens = 768 rows per MXU pass


def _align8(n):
    return (n + 7) // 8 * 8


# row offsets inside the per-layer weight slab (sublane-aligned starts)
R_QKV = 0
R_WO = _align8(D_MODEL)              # 56
R_W1 = R_WO + _align8(D_MODEL)       # 112
R_W2 = R_W1 + _align8(D_MODEL)       # 168
W_ROWS = R_W2 + DIM_FF               # 424

# row offsets inside the classifier weight slab
RC_1 = 0
RC_2 = _align8(D_MODEL)              # 56
RC_3 = RC_2 + HIDDEN                 # 184
WC_ROWS = RC_3 + HIDDEN2             # 248


def _layer_norm(x, w, b):
    mu = jnp.mean(x, axis=-1, keepdims=True)
    var = jnp.mean(jnp.square(x - mu), axis=-1, keepdims=True)
    return (x - mu) * jax.lax.rsqrt(var + EPS) * w + b


# --------------------------------------------------------------------------
# kernel
# --------------------------------------------------------------------------
def _encoder_layer(x2, tb, w_ref, v_ref, ctx_ref):
    """One post-norm TransformerEncoderLayer on x2: (tb*SEQ_LEN, D_MODEL) f32."""
    n = tb * SEQ_LEN
    scale = 1.0 / math.sqrt(HEAD_DIM)
    xb = x2.astype(jnp.bfloat16)

    # fused Q/K/V projection: one (n,52)@(52,256) bf16 matmul (cols 156:256 zero)
    qkv = jnp.dot(xb, w_ref[R_QKV:R_QKV + D_MODEL, :],
                  preferred_element_type=jnp.float32) + v_ref[0:1, :]

    # per-head attention core (tiny: S=12, head_dim=13); context heads are
    # written into a VMEM scratch slab so the output projection is one matmul.
    for h in range(NHEAD):
        q = qkv[:, h * HEAD_DIM:(h + 1) * HEAD_DIM]
        k = qkv[:, D_MODEL + h * HEAD_DIM:D_MODEL + (h + 1) * HEAD_DIM]
        v = qkv[:, 2 * D_MODEL + h * HEAD_DIM:2 * D_MODEL + (h + 1) * HEAD_DIM]
        q = q.reshape(tb, SEQ_LEN, HEAD_DIM).astype(jnp.bfloat16)
        k = k.reshape(tb, SEQ_LEN, HEAD_DIM).astype(jnp.bfloat16)
        v = v.reshape(tb, SEQ_LEN, HEAD_DIM).astype(jnp.bfloat16)
        s = jnp.einsum('bqd,bkd->bqk', q, k,
                       preferred_element_type=jnp.float32) * scale
        s = s - jnp.max(s, axis=-1, keepdims=True)
        e = jnp.exp(s)
        p = e * pl.reciprocal(jnp.sum(e, axis=-1, keepdims=True), approx=True)
        ctx = jnp.einsum('bqk,bkd->bqd', p.astype(jnp.bfloat16), v,
                         preferred_element_type=jnp.float32)
        ctx_ref[:, h * HEAD_DIM:(h + 1) * HEAD_DIM] = ctx.reshape(n, HEAD_DIM)

    # fused output projection: one (n,52)@(52,52->256) matmul
    attn = jnp.dot(ctx_ref[...].astype(jnp.bfloat16),
                   w_ref[R_WO:R_WO + D_MODEL, :],
                   preferred_element_type=jnp.float32)[:, :D_MODEL]
    attn = attn + v_ref[1:2, :D_MODEL]
    x2 = _layer_norm(x2 + attn, v_ref[2:3, :D_MODEL], v_ref[3:4, :D_MODEL])

    # feed-forward 52 -> 256 -> 52
    hff = jnp.dot(x2.astype(jnp.bfloat16), w_ref[R_W1:R_W1 + D_MODEL, :],
                  preferred_element_type=jnp.float32) + v_ref[4:5, :]
    hff = jnp.maximum(hff, 0.0)
    ff = jnp.dot(hff.astype(jnp.bfloat16), w_ref[R_W2:R_W2 + DIM_FF, :],
                 preferred_element_type=jnp.float32)[:, :D_MODEL]
    ff = ff + v_ref[5:6, :D_MODEL]
    return _layer_norm(x2 + ff, v_ref[6:7, :D_MODEL], v_ref[7:8, :D_MODEL])


def crop_transformer_kernel(x_ref, w0_ref, v0_ref, w1_ref, v1_ref,
                            wc_ref, vc_ref, out_ref, ctx_ref):
    tb = x_ref.shape[0]
    x2 = x_ref[...].reshape(tb * SEQ_LEN, D_MODEL)

    x2 = _encoder_layer(x2, tb, w0_ref, v0_ref, ctx_ref)
    x2 = _encoder_layer(x2, tb, w1_ref, v1_ref, ctx_ref)

    # last sequence position of each sequence
    last = x2.reshape(tb, SEQ_LEN, D_MODEL)[:, SEQ_LEN - 1:SEQ_LEN, :]
    last = last.reshape(tb, D_MODEL)

    # classifier: 52 -> 128 -> 64 -> 4 (logits kept lane-dense at width 128)
    h1 = jnp.dot(last.astype(jnp.bfloat16), wc_ref[RC_1:RC_1 + D_MODEL, :],
                 preferred_element_type=jnp.float32) + vc_ref[0:1, :]
    h1 = jnp.maximum(_layer_norm(h1, vc_ref[1:2, :], vc_ref[2:3, :]), 0.0)

    h2 = jnp.dot(h1.astype(jnp.bfloat16), wc_ref[RC_2:RC_2 + HIDDEN, :],
                 preferred_element_type=jnp.float32)[:, :HIDDEN2]
    h2 = h2 + vc_ref[3:4, :HIDDEN2]
    h2 = jnp.maximum(_layer_norm(h2, vc_ref[4:5, :HIDDEN2], vc_ref[5:6, :HIDDEN2]), 0.0)

    out = jnp.dot(h2.astype(jnp.bfloat16), wc_ref[RC_3:RC_3 + HIDDEN2, :],
                  preferred_element_type=jnp.float32) + vc_ref[6:7, :]
    out_ref[...] = out


# --------------------------------------------------------------------------
# wrapper
# --------------------------------------------------------------------------
def crop_transformer_forward(x, slabs):
    """x: (B, SEQ_LEN, D_MODEL) f32 -> logits (B, OUTPUT) f32."""
    B = x.shape[0]
    tb = B if B <= MAX_BATCH_TILE else MAX_BATCH_TILE
    nb = pl.cdiv(B, tb)
    w0, v0, w1, v1, wc, vc = slabs

    def const2(b):
        return (0, 0)

    out_padded = pl.pallas_call(
        crop_transformer_kernel,
        out_shape=jax.ShapeDtypeStruct((B, CLANE), jnp.float32),
        grid_spec=pltpu.PrefetchScalarGridSpec(
            num_scalar_prefetch=0,
            grid=(nb,),
            in_specs=[
                pl.BlockSpec((tb, SEQ_LEN, D_MODEL), lambda b: (b, 0, 0)),
                pl.BlockSpec(w0.shape, const2),
                pl.BlockSpec(v0.shape, const2),
                pl.BlockSpec(w1.shape, const2),
                pl.BlockSpec(v1.shape, const2),
                pl.BlockSpec(wc.shape, const2),
                pl.BlockSpec(vc.shape, const2),
            ],
            out_specs=pl.BlockSpec((tb, CLANE), lambda b: (b, 0)),
            scratch_shapes=[pltpu.VMEM((tb * SEQ_LEN, D_MODEL), jnp.float32)],
        ),
        compiler_params=pltpu.CompilerParams(
            dimension_semantics=("parallel",)),
    )(x, w0, v0, w1, v1, wc, vc)
    return out_padded[:, :OUTPUT]


# --------------------------------------------------------------------------
# parameter init (packed slabs for the kernel + raw tensors for the reference)
# --------------------------------------------------------------------------
def init_params(key):
    keys = iter(jax.random.split(key, 64))

    def rnd(shape, scale=0.05):
        return jax.random.normal(next(keys), shape, jnp.float32) * scale

    def rndw(shape, scale=0.05):  # matmul weight: bf16-representable f32 values
        return rnd(shape, scale).astype(jnp.bfloat16).astype(jnp.float32)

    def pad_block(a, rows, lanes):
        return jnp.pad(a, ((0, rows - a.shape[0]), (0, lanes - a.shape[1])))

    def vec_row(v, lanes):
        v = v.reshape(1, -1)
        return jnp.pad(v, ((0, 0), (0, lanes - v.shape[1])))

    slabs = []
    raw_layers = []
    for _ in range(NUM_LAYERS):
        ipw = rndw((3 * D_MODEL, D_MODEL))          # torch in_proj_weight (3D, D)
        ipb = rnd((3 * D_MODEL,), 0.02)             # torch in_proj_bias
        wo = rndw((D_MODEL, D_MODEL))               # out_proj.weight (out, in)
        bo = rnd((D_MODEL,), 0.02)
        ln1w = jnp.ones((D_MODEL,), jnp.float32)
        ln1b = jnp.zeros((D_MODEL,), jnp.float32)
        w1 = rndw((DIM_FF, D_MODEL))                # linear1.weight
        b1 = rnd((DIM_FF,), 0.02)
        w2 = rndw((D_MODEL, DIM_FF))                # linear2.weight
        b2 = rnd((D_MODEL,), 0.02)
        ln2w = jnp.ones((D_MODEL,), jnp.float32)
        ln2b = jnp.zeros((D_MODEL,), jnp.float32)
        raw_layers.append((ipw, ipb, wo, bo, ln1w, ln1b, w1, b1, w2, b2, ln2w, ln2b))

        # kernel computes y = x @ W.T, so store transposed weights, lane-padded.
        w_slab = jnp.concatenate([
            pad_block(ipw.T, R_WO - R_QKV, LANE),   # rows   0: 56  [Wq|Wk|Wv]^T
            pad_block(wo.T, R_W1 - R_WO, LANE),     # rows  56:112  out_proj
            pad_block(w1.T, R_W2 - R_W1, LANE),     # rows 112:168  linear1
            pad_block(w2.T, DIM_FF, LANE),          # rows 168:424  linear2
        ], axis=0).astype(jnp.bfloat16)
        assert w_slab.shape == (W_ROWS, LANE)
        v_slab = jnp.concatenate([
            vec_row(ipb, LANE), vec_row(bo, LANE),
            vec_row(ln1w, LANE), vec_row(ln1b, LANE),
            vec_row(b1, LANE), vec_row(b2, LANE),
            vec_row(ln2w, LANE), vec_row(ln2b, LANE)], axis=0)    # (8,256) f32
        slabs += [w_slab, v_slab]

    wc1 = rndw((HIDDEN, D_MODEL)); bc1 = rnd((HIDDEN,), 0.02)
    lnc1w = jnp.ones((HIDDEN,), jnp.float32); lnc1b = jnp.zeros((HIDDEN,), jnp.float32)
    wc2 = rndw((HIDDEN2, HIDDEN)); bc2 = rnd((HIDDEN2,), 0.02)
    lnc2w = jnp.ones((HIDDEN2,), jnp.float32); lnc2b = jnp.zeros((HIDDEN2,), jnp.float32)
    wc3 = rndw((OUTPUT, HIDDEN2)); bc3 = rnd((OUTPUT,), 0.02)
    raw_cls = (wc1, bc1, lnc1w, lnc1b, wc2, bc2, lnc2w, lnc2b, wc3, bc3)

    wc_slab = jnp.concatenate([
        pad_block(wc1.T, RC_2 - RC_1, CLANE),       # rows   0: 56
        pad_block(wc2.T, HIDDEN, CLANE),            # rows  56:184
        pad_block(wc3.T, HIDDEN2, CLANE),           # rows 184:248 (logits 4 -> 128)
    ], axis=0).astype(jnp.bfloat16)
    assert wc_slab.shape == (WC_ROWS, CLANE)
    vc_slab = jnp.concatenate([
        vec_row(bc1, CLANE), vec_row(lnc1w, CLANE), vec_row(lnc1b, CLANE),
        vec_row(bc2, CLANE), vec_row(lnc2w, CLANE), vec_row(lnc2b, CLANE),
        vec_row(bc3, CLANE), jnp.zeros((1, CLANE), jnp.float32)], axis=0)
    slabs += [wc_slab, vc_slab]
    return tuple(slabs), (tuple(raw_layers), raw_cls)


# --------------------------------------------------------------------------
# pure-JAX f32 reference of the same module forward (eval mode)
# --------------------------------------------------------------------------
def reference_forward(x, raw):
    raw_layers, raw_cls = raw
    B, S, D = x.shape
    x2 = x.reshape(B * S, D).astype(jnp.float32)
    scale = 1.0 / math.sqrt(HEAD_DIM)
    for (ipw, ipb, wo, bo, ln1w, ln1b, w1, b1, w2, b2, ln2w, ln2b) in raw_layers:
        qkv = x2 @ ipw.T + ipb
        q, k, v = qkv[:, :D], qkv[:, D:2 * D], qkv[:, 2 * D:]

        def heads(t):
            return t.reshape(B, S, NHEAD, HEAD_DIM).transpose(0, 2, 1, 3)

        qh, kh, vh = heads(q), heads(k), heads(v)
        s = jnp.einsum('bhqd,bhkd->bhqk', qh, kh) * scale
        p = jax.nn.softmax(s, axis=-1)
        ctx = jnp.einsum('bhqk,bhkd->bhqd', p, vh)
        ctx = ctx.transpose(0, 2, 1, 3).reshape(B * S, D)
        attn = ctx @ wo.T + bo
        x2 = _layer_norm(x2 + attn, ln1w, ln1b)
        ff = jnp.maximum(x2 @ w1.T + b1, 0.0) @ w2.T + b2
        x2 = _layer_norm(x2 + ff, ln2w, ln2b)

    last = x2.reshape(B, S, D)[:, -1, :]
    (wc1, bc1, lnc1w, lnc1b, wc2, bc2, lnc2w, lnc2b, wc3, bc3) = raw_cls
    h1 = jnp.maximum(_layer_norm(last @ wc1.T + bc1, lnc1w, lnc1b), 0.0)
    h2 = jnp.maximum(_layer_norm(h1 @ wc2.T + bc2, lnc2w, lnc2b), 0.0)
    return h2 @ wc3.T + bc3


if __name__ == "__main__":
    key = jax.random.PRNGKey(0)
    k_x, k_p = jax.random.split(key)
    batch = 2
    x = jax.random.normal(k_x, (batch, SEQ_LEN, D_MODEL), jnp.float32)
    slabs, raw = init_params(k_p)

    fwd = jax.jit(crop_transformer_forward)
    out = jax.block_until_ready(fwd(x, slabs))

    ref = reference_forward(x, raw)
    assert out.shape == (batch, OUTPUT), out.shape
    assert bool(jnp.all(jnp.isfinite(out)))
    max_diff = float(jnp.max(jnp.abs(out - ref)))
    assert jnp.allclose(out, ref, atol=2e-2, rtol=2e-2), f"max abs diff = {max_diff}"
    print("KERNEL_OK")
</pallas_src>

<mosaic_0001>
module attributes {stable_mosaic.version = 11 : i64} {
  func.func @crop_transformer_kernel(%arg0: i32, %arg1: memref<2x12x52xf32, #tpu.memory_space<vmem>>, %arg2: memref<424x256xbf16, #tpu.memory_space<vmem>>, %arg3: memref<8x256xf32, #tpu.memory_space<vmem>>, %arg4: memref<424x256xbf16, #tpu.memory_space<vmem>>, %arg5: memref<8x256xf32, #tpu.memory_space<vmem>>, %arg6: memref<248x128xbf16, #tpu.memory_space<vmem>>, %arg7: memref<8x128xf32, #tpu.memory_space<vmem>>, %arg8: memref<2x128xf32, #tpu.memory_space<vmem>>, %arg9: memref<24x52xf32, #tpu.memory_space<vmem>>) attributes {dimension_semantics = [#tpu.dimension_semantics<parallel>], iteration_bounds = array<i64: 1>, scalar_prefetch = 0 : i64, scratch_operands = 1 : i64, tpu.core_type = #tpu.core_type<tc>, window_params = [{transform_indices = @transform_0, window_bounds = array<i64: 2, 12, 52>}, {pipeline_mode = #tpu.pipeline_mode<synchronous>, transform_indices = @transform_1, window_bounds = array<i64: 424, 256>}, {pipeline_mode = #tpu.pipeline_mode<synchronous>, transform_indices = @transform_2, window_bounds = array<i64: 8, 256>}, {pipeline_mode = #tpu.pipeline_mode<synchronous>, transform_indices = @transform_3, window_bounds = array<i64: 424, 256>}, {pipeline_mode = #tpu.pipeline_mode<synchronous>, transform_indices = @transform_4, window_bounds = array<i64: 8, 256>}, {pipeline_mode = #tpu.pipeline_mode<synchronous>, transform_indices = @transform_5, window_bounds = array<i64: 248, 128>}, {pipeline_mode = #tpu.pipeline_mode<synchronous>, transform_indices = @transform_6, window_bounds = array<i64: 8, 128>}, {transform_indices = @transform_7, window_bounds = array<i64: 2, 128>}]} {
    %c0 = arith.constant 0 : index
    %c0_0 = arith.constant 0 : index
    %c0_1 = arith.constant 0 : index
    %0 = vector.load %arg1[%c0, %c0_0, %c0_1] : memref<2x12x52xf32, #tpu.memory_space<vmem>>, vector<2x12x52xf32>
    %1 = vector.shape_cast %0 : vector<2x12x52xf32> to vector<24x52xf32>
    %2 = arith.truncf %1 : vector<24x52xf32> to vector<24x52xbf16>
    %c0_2 = arith.constant 0 : index
    %c0_3 = arith.constant 0 : index
    %3 = vector.load %arg2[%c0_2, %c0_3] : memref<424x256xbf16, #tpu.memory_space<vmem>>, vector<52x256xbf16>
    %cst = arith.constant dense<0.000000e+00> : vector<24x256xf32>
    %4 = tpu.matmul %2, %3, %cst {dimension_numbers = #tpu.dot_dimension_numbers<[1], [0], [0], [1], [0, 0, 1, 1], [], []>} : vector<24x52xbf16>, vector<52x256xbf16>, vector<24x256xf32> -> vector<24x256xf32>
    %c0_4 = arith.constant 0 : index
    %c0_5 = arith.constant 0 : index
    %5 = vector.load %arg3[%c0_4, %c0_5] : memref<8x256xf32, #tpu.memory_space<vmem>>, vector<1x256xf32>
    %6 = vector.broadcast %5 : vector<1x256xf32> to vector<24x256xf32>
    %7 = arith.addf %4, %6 : vector<24x256xf32>
    %8 = vector.extract_strided_slice %7 {offsets = [0, 0], sizes = [24, 13], strides = [1, 1]} : vector<24x256xf32> to vector<24x13xf32>
    %9 = vector.extract_strided_slice %7 {offsets = [0, 52], sizes = [24, 13], strides = [1, 1]} : vector<24x256xf32> to vector<24x13xf32>
    %10 = vector.extract_strided_slice %7 {offsets = [0, 104], sizes = [24, 13], strides = [1, 1]} : vector<24x256xf32> to vector<24x13xf32>
    %11 = vector.shape_cast %8 : vector<24x13xf32> to vector<2x12x13xf32>
    %12 = arith.truncf %11 : vector<2x12x13xf32> to vector<2x12x13xbf16>
    %13 = vector.shape_cast %9 : vector<24x13xf32> to vector<2x12x13xf32>
    %14 = arith.truncf %13 : vector<2x12x13xf32> to vector<2x12x13xbf16>
    %15 = vector.shape_cast %10 : vector<24x13xf32> to vector<2x12x13xf32>
    %16 = arith.truncf %15 : vector<2x12x13xf32> to vector<2x12x13xbf16>
    "tpu.trace_start"() <{level = 10 : i32, message = "bqd,bkd->bqk"}> : () -> ()
    %cst_6 = arith.constant dense<0.000000e+00> : vector<2x12x12xf32>
    %17 = tpu.matmul %12, %14, %cst_6 {dimension_numbers = #tpu.dot_dimension_numbers<[2], [2], [1], [1], [0, 0, 0, 1, 1, 1], [0], [0]>} : vector<2x12x13xbf16>, vector<2x12x13xbf16>, vector<2x12x12xf32> -> vector<2x12x12xf32>
    "tpu.trace_stop"() : () -> ()
    %cst_7 = arith.constant 0.277350098 : f32
    %18 = vector.broadcast %cst_7 : f32 to vector<2x12x12xf32>
    %19 = arith.mulf %17, %18 : vector<2x12x12xf32>
    %cst_8 = arith.constant dense<0xFF800000> : vector<2x12xf32>
    %20 = vector.multi_reduction <maximumf>, %19, %cst_8 [2] : vector<2x12x12xf32> to vector<2x12xf32>
    %21 = vector.shape_cast %20 : vector<2x12xf32> to vector<2x12x1xf32>
    %22 = vector.broadcast %21 : vector<2x12x1xf32> to vector<2x12x12xf32>
    %23 = arith.subf %19, %22 : vector<2x12x12xf32>
    %24 = math.exp %23 : vector<2x12x12xf32>
    %cst_9 = arith.constant dense<0.000000e+00> : vector<2x12xf32>
    %25 = vector.multi_reduction <add>, %24, %cst_9 [2] : vector<2x12x12xf32> to vector<2x12xf32>
    %26 = vector.shape_cast %25 : vector<2x12xf32> to vector<2x12x1xf32>
    %27 = tpu.reciprocal %26 {approx = true} : vector<2x12x1xf32> -> vector<2x12x1xf32>
    %28 = vector.broadcast %27 : vector<2x12x1xf32> to vector<2x12x12xf32>
    %29 = arith.mulf %24, %28 : vector<2x12x12xf32>
    %30 = arith.truncf %29 : vector<2x12x12xf32> to vector<2x12x12xbf16>
    "tpu.trace_start"() <{level = 10 : i32, message = "bqk,bkd->bqd"}> : () -> ()
    %cst_10 = arith.constant dense<0.000000e+00> : vector<2x12x13xf32>
    %31 = tpu.matmul %30, %16, %cst_10 {dimension_numbers = #tpu.dot_dimension_numbers<[2], [1], [1], [2], [0, 0, 0, 1, 1, 2], [0], [0]>} : vector<2x12x12xbf16>, vector<2x12x13xbf16>, vector<2x12x13xf32> -> vector<2x12x13xf32>
    "tpu.trace_stop"() : () -> ()
    %32 = vector.shape_cast %31 : vector<2x12x13xf32> to vector<24x13xf32>
    %c0_11 = arith.constant 0 : index
    %c0_12 = arith.constant 0 : index
    %33 = vector.load %arg9[%c0_11, %c0_12] : memref<24x52xf32, #tpu.memory_space<vmem>>, vector<24x13xf32>
    tpu.vector_store %arg9[%c0_11, %c0_12], %32 {strides = array<i32>} : memref<24x52xf32, #tpu.memory_space<vmem>>, vector<24x13xf32>,
    %34 = vector.extract_strided_slice %7 {offsets = [0, 13], sizes = [24, 13], strides = [1, 1]} : vector<24x256xf32> to vector<24x13xf32>
    %35 = vector.extract_strided_slice %7 {offsets = [0, 65], sizes = [24, 13], strides = [1, 1]} : vector<24x256xf32> to vector<24x13xf32>
    %36 = vector.extract_strided_slice %7 {offsets = [0, 117], sizes = [24, 13], strides = [1, 1]} : vector<24x256xf32> to vector<24x13xf32>
    %37 = vector.shape_cast %34 : vector<24x13xf32> to vector<2x12x13xf32>
    %38 = arith.truncf %37 : vector<2x12x13xf32> to vector<2x12x13xbf16>
    %39 = vector.shape_cast %35 : vector<24x13xf32> to vector<2x12x13xf32>
    %40 = arith.truncf %39 : vector<2x12x13xf32> to vector<2x12x13xbf16>
    %41 = vector.shape_cast %36 : vector<24x13xf32> to vector<2x12x13xf32>
    %42 = arith.truncf %41 : vector<2x12x13xf32> to vector<2x12x13xbf16>
    "tpu.trace_start"() <{level = 10 : i32, message = "bqd,bkd->bqk"}> : () -> ()
    %cst_13 = arith.constant dense<0.000000e+00> : vector<2x12x12xf32>
    %43 = tpu.matmul %38, %40, %cst_13 {dimension_numbers = #tpu.dot_dimension_numbers<[2], [2], [1], [1], [0, 0, 0, 1, 1, 1], [0], [0]>} : vector<2x12x13xbf16>, vector<2x12x13xbf16>, vector<2x12x12xf32> -> vector<2x12x12xf32>
    "tpu.trace_stop"() : () -> ()
    %cst_14 = arith.constant 0.277350098 : f32
    %44 = vector.broadcast %cst_14 : f32 to vector<2x12x12xf32>
    %45 = arith.mulf %43, %44 : vector<2x12x12xf32>
    %cst_15 = arith.constant dense<0xFF800000> : vector<2x12xf32>
    %46 = vector.multi_reduction <maximumf>, %45, %cst_15 [2] : vector<2x12x12xf32> to vector<2x12xf32>
    %47 = vector.shape_cast %46 : vector<2x12xf32> to vector<2x12x1xf32>
    %48 = vector.broadcast %47 : vector<2x12x1xf32> to vector<2x12x12xf32>
    %49 = arith.subf %45, %48 : vector<2x12x12xf32>
    %50 = math.exp %49 : vector<2x12x12xf32>
    %cst_16 = arith.constant dense<0.000000e+00> : vector<2x12xf32>
    %51 = vector.multi_reduction <add>, %50, %cst_16 [2] : vector<2x12x12xf32> to vector<2x12xf32>
    %52 = vector.shape_cast %51 : vector<2x12xf32> to vector<2x12x1xf32>
    %53 = tpu.reciprocal %52 {approx = true} : vector<2x12x1xf32> -> vector<2x12x1xf32>
    %54 = vector.broadcast %53 : vector<2x12x1xf32> to vector<2x12x12xf32>
    %55 = arith.mulf %50, %54 : vector<2x12x12xf32>
    %56 = arith.truncf %55 : vector<2x12x12xf32> to vector<2x12x12xbf16>
    "tpu.trace_start"() <{level = 10 : i32, message = "bqk,bkd->bqd"}> : () -> ()
    %cst_17 = arith.constant dense<0.000000e+00> : vector<2x12x13xf32>
    %57 = tpu.matmul %56, %42, %cst_17 {dimension_numbers = #tpu.dot_dimension_numbers<[2], [1], [1], [2], [0, 0, 0, 1, 1, 2], [0], [0]>} : vector<2x12x12xbf16>, vector<2x12x13xbf16>, vector<2x12x13xf32> -> vector<2x12x13xf32>
    "tpu.trace_stop"() : () -> ()
    %58 = vector.shape_cast %57 : vector<2x12x13xf32> to vector<24x13xf32>
    %c0_18 = arith.constant 0 : index
    %c13 = arith.constant 13 : index
    %59 = vector.load %arg9[%c0_18, %c13] : memref<24x52xf32, #tpu.memory_space<vmem>>, vector<24x13xf32>
    tpu.vector_store %arg9[%c0_18, %c13], %58 {strides = array<i32>} : memref<24x52xf32, #tpu.memory_space<vmem>>, vector<24x13xf32>,
    %60 = vector.extract_strided_slice %7 {offsets = [0, 26], sizes = [24, 13], strides = [1, 1]} : vector<24x256xf32> to vector<24x13xf32>
    %61 = vector.extract_strided_slice %7 {offsets = [0, 78], sizes = [24, 13], strides = [1, 1]} : vector<24x256xf32> to vector<24x13xf32>
    %62 = vector.extract_strided_slice %7 {offsets = [0, 130], sizes = [24, 13], strides = [1, 1]} : vector<24x256xf32> to vector<24x13xf32>
    %63 = vector.shape_cast %60 : vector<24x13xf32> to vector<2x12x13xf32>
    %64 = arith.truncf %63 : vector<2x12x13xf32> to vector<2x12x13xbf16>
    %65 = vector.shape_cast %61 : vector<24x13xf32> to vector<2x12x13xf32>
    %66 = arith.truncf %65 : vector<2x12x13xf32> to vector<2x12x13xbf16>
    %67 = vector.shape_cast %62 : vector<24x13xf32> to vector<2x12x13xf32>
    %68 = arith.truncf %67 : vector<2x12x13xf32> to vector<2x12x13xbf16>
    "tpu.trace_start"() <{level = 10 : i32, message = "bqd,bkd->bqk"}> : () -> ()
    %cst_19 = arith.constant dense<0.000000e+00> : vector<2x12x12xf32>
    %69 = tpu.matmul %64, %66, %cst_19 {dimension_numbers = #tpu.dot_dimension_numbers<[2], [2], [1], [1], [0, 0, 0, 1, 1, 1], [0], [0]>} : vector<2x12x13xbf16>, vector<2x12x13xbf16>, vector<2x12x12xf32> -> vector<2x12x12xf32>
    "tpu.trace_stop"() : () -> ()
    %cst_20 = arith.constant 0.277350098 : f32
    %70 = vector.broadcast %cst_20 : f32 to vector<2x12x12xf32>
    %71 = arith.mulf %69, %70 : vector<2x12x12xf32>
    %cst_21 = arith.constant dense<0xFF800000> : vector<2x12xf32>
    %72 = vector.multi_reduction <maximumf>, %71, %cst_21 [2] : vector<2x12x12xf32> to vector<2x12xf32>
    %73 = vector.shape_cast %72 : vector<2x12xf32> to vector<2x12x1xf32>
    %74 = vector.broadcast %73 : vector<2x12x1xf32> to vector<2x12x12xf32>
    %75 = arith.subf %71, %74 : vector<2x12x12xf32>
    %76 = math.exp %75 : vector<2x12x12xf32>
    %cst_22 = arith.constant dense<0.000000e+00> : vector<2x12xf32>
    %77 = vector.multi_reduction <add>, %76, %cst_22 [2] : vector<2x12x12xf32> to vector<2x12xf32>
    %78 = vector.shape_cast %77 : vector<2x12xf32> to vector<2x12x1xf32>
    %79 = tpu.reciprocal %78 {approx = true} : vector<2x12x1xf32> -> vector<2x12x1xf32>
    %80 = vector.broadcast %79 : vector<2x12x1xf32> to vector<2x12x12xf32>
    %81 = arith.mulf %76, %80 : vector<2x12x12xf32>
    %82 = arith.truncf %81 : vector<2x12x12xf32> to vector<2x12x12xbf16>
    "tpu.trace_start"() <{level = 10 : i32, message = "bqk,bkd->bqd"}> : () -> ()
    %cst_23 = arith.constant dense<0.000000e+00> : vector<2x12x13xf32>
    %83 = tpu.matmul %82, %68, %cst_23 {dimension_numbers = #tpu.dot_dimension_numbers<[2], [1], [1], [2], [0, 0, 0, 1, 1, 2], [0], [0]>} : vector<2x12x12xbf16>, vector<2x12x13xbf16>, vector<2x12x13xf32> -> vector<2x12x13xf32>
    "tpu.trace_stop"() : () -> ()
    %84 = vector.shape_cast %83 : vector<2x12x13xf32> to vector<24x13xf32>
    %c0_24 = arith.constant 0 : index
    %c26 = arith.constant 26 : index
    %85 = vector.load %arg9[%c0_24, %c26] : memref<24x52xf32, #tpu.memory_space<vmem>>, vector<24x13xf32>
    tpu.vector_store %arg9[%c0_24, %c26], %84 {strides = array<i32>} : memref<24x52xf32, #tpu.memory_space<vmem>>, vector<24x13xf32>,
    %86 = vector.extract_strided_slice %7 {offsets = [0, 39], sizes = [24, 13], strides = [1, 1]} : vector<24x256xf32> to vector<24x13xf32>
    %87 = vector.extract_strided_slice %7 {offsets = [0, 91], sizes = [24, 13], strides = [1, 1]} : vector<24x256xf32> to vector<24x13xf32>
    %88 = vector.extract_strided_slice %7 {offsets = [0, 143], sizes = [24, 13], strides = [1, 1]} : vector<24x256xf32> to vector<24x13xf32>
    %89 = vector.shape_cast %86 : vector<24x13xf32> to vector<2x12x13xf32>
    %90 = arith.truncf %89 : vector<2x12x13xf32> to vector<2x12x13xbf16>
    %91 = vector.shape_cast %87 : vector<24x13xf32> to vector<2x12x13xf32>
    %92 = arith.truncf %91 : vector<2x12x13xf32> to vector<2x12x13xbf16>
    %93 = vector.shape_cast %88 : vector<24x13xf32> to vector<2x12x13xf32>
    %94 = arith.truncf %93 : vector<2x12x13xf32> to vector<2x12x13xbf16>
    "tpu.trace_start"() <{level = 10 : i32, message = "bqd,bkd->bqk"}> : () -> ()
    %cst_25 = arith.constant dense<0.000000e+00> : vector<2x12x12xf32>
    %95 = tpu.matmul %90, %92, %cst_25 {dimension_numbers = #tpu.dot_dimension_numbers<[2], [2], [1], [1], [0, 0, 0, 1, 1, 1], [0], [0]>} : vector<2x12x13xbf16>, vector<2x12x13xbf16>, vector<2x12x12xf32> -> vector<2x12x12xf32>
    "tpu.trace_stop"() : () -> ()
    %cst_26 = arith.constant 0.277350098 : f32
    %96 = vector.broadcast %cst_26 : f32 to vector<2x12x12xf32>
    %97 = arith.mulf %95, %96 : vector<2x12x12xf32>
    %cst_27 = arith.constant dense<0xFF800000> : vector<2x12xf32>
    %98 = vector.multi_reduction <maximumf>, %97, %cst_27 [2] : vector<2x12x12xf32> to vector<2x12xf32>
    %99 = vector.shape_cast %98 : vector<2x12xf32> to vector<2x12x1xf32>
    %100 = vector.broadcast %99 : vector<2x12x1xf32> to vector<2x12x12xf32>
    %101 = arith.subf %97, %100 : vector<2x12x12xf32>
    %102 = math.exp %101 : vector<2x12x12xf32>
    %cst_28 = arith.constant dense<0.000000e+00> : vector<2x12xf32>
    %103 = vector.multi_reduction <add>, %102, %cst_28 [2] : vector<2x12x12xf32> to vector<2x12xf32>
    %104 = vector.shape_cast %103 : vector<2x12xf32> to vector<2x12x1xf32>
    %105 = tpu.reciprocal %104 {approx = true} : vector<2x12x1xf32> -> vector<2x12x1xf32>
    %106 = vector.broadcast %105 : vector<2x12x1xf32> to vector<2x12x12xf32>
    %107 = arith.mulf %102, %106 : vector<2x12x12xf32>
    %108 = arith.truncf %107 : vector<2x12x12xf32> to vector<2x12x12xbf16>
    "tpu.trace_start"() <{level = 10 : i32, message = "bqk,bkd->bqd"}> : () -> ()
    %cst_29 = arith.constant dense<0.000000e+00> : vector<2x12x13xf32>
    %109 = tpu.matmul %108, %94, %cst_29 {dimension_numbers = #tpu.dot_dimension_numbers<[2], [1], [1], [2], [0, 0, 0, 1, 1, 2], [0], [0]>} : vector<2x12x12xbf16>, vector<2x12x13xbf16>, vector<2x12x13xf32> -> vector<2x12x13xf32>
    "tpu.trace_stop"() : () -> ()
    %110 = vector.shape_cast %109 : vector<2x12x13xf32> to vector<24x13xf32>
    %c0_30 = arith.constant 0 : index
    %c39 = arith.constant 39 : index
    %111 = vector.load %arg9[%c0_30, %c39] : memref<24x52xf32, #tpu.memory_space<vmem>>, vector<24x13xf32>
    tpu.vector_store %arg9[%c0_30, %c39], %110 {strides = array<i32>} : memref<24x52xf32, #tpu.memory_space<vmem>>, vector<24x13xf32>,
    %c0_31 = arith.constant 0 : index
    %c0_32 = arith.constant 0 : index
    %112 = vector.load %arg9[%c0_31, %c0_32] : memref<24x52xf32, #tpu.memory_space<vmem>>, vector<24x52xf32>
    %113 = arith.truncf %112 : vector<24x52xf32> to vector<24x52xbf16>
    %c56 = arith.constant 56 : index
    %c0_33 = arith.constant 0 : index
    %114 = vector.load %arg2[%c56, %c0_33] : memref<424x256xbf16, #tpu.memory_space<vmem>>, vector<52x256xbf16>
    %cst_34 = arith.constant dense<0.000000e+00> : vector<24x256xf32>
    %115 = tpu.matmul %113, %114, %cst_34 {dimension_numbers = #tpu.dot_dimension_numbers<[1], [0], [0], [1], [0, 0, 1, 1], [], []>} : vector<24x52xbf16>, vector<52x256xbf16>, vector<24x256xf32> -> vector<24x256xf32>
    %116 = vector.extract_strided_slice %115 {offsets = [0, 0], sizes = [24, 52], strides = [1, 1]} : vector<24x256xf32> to vector<24x52xf32>
    %c1 = arith.constant 1 : index
    %c0_35 = arith.constant 0 : index
    %117 = vector.load %arg3[%c1, %c0_35] : memref<8x256xf32, #tpu.memory_space<vmem>>, vector<1x52xf32>
    %118 = vector.broadcast %117 : vector<1x52xf32> to vector<24x52xf32>
    %119 = arith.addf %116, %118 : vector<24x52xf32>
    %120 = arith.addf %1, %119 : vector<24x52xf32>
    %c2 = arith.constant 2 : index
    %c0_36 = arith.constant 0 : index
    %121 = vector.load %arg3[%c2, %c0_36] : memref<8x256xf32, #tpu.memory_space<vmem>>, vector<1x52xf32>
    %c3 = arith.constant 3 : index
    %c0_37 = arith.constant 0 : index
    %122 = vector.load %arg3[%c3, %c0_37] : memref<8x256xf32, #tpu.memory_space<vmem>>, vector<1x52xf32>
    %cst_38 = arith.constant dense<0.000000e+00> : vector<24xf32>
    %123 = vector.multi_reduction <add>, %120, %cst_38 [1] : vector<24x52xf32> to vector<24xf32>
    %124 = vector.shape_cast %123 : vector<24xf32> to vector<24x1xf32>
    %cst_39 = arith.constant 5.200000e+01 : f32
    %125 = vector.broadcast %cst_39 : f32 to vector<24x1xf32>
    %126 = arith.divf %124, %125 : vector<24x1xf32>
    %127 = vector.broadcast %126 : vector<24x1xf32> to vector<24x52xf32>
    %128 = arith.subf %120, %127 : vector<24x52xf32>
    %129 = arith.mulf %128, %128 : vector<24x52xf32>
    %cst_40 = arith.constant dense<0.000000e+00> : vector<24xf32>
    %130 = vector.multi_reduction <add>, %129, %cst_40 [1] : vector<24x52xf32> to vector<24xf32>
    %131 = vector.shape_cast %130 : vector<24xf32> to vector<24x1xf32>
    %cst_41 = arith.constant 5.200000e+01 : f32
    %132 = vector.broadcast %cst_41 : f32 to vector<24x1xf32>
    %133 = arith.divf %131, %132 : vector<24x1xf32>
    %134 = vector.broadcast %126 : vector<24x1xf32> to vector<24x52xf32>
    %135 = arith.subf %120, %134 : vector<24x52xf32>
    %cst_42 = arith.constant 9.99999974E-6 : f32
    %136 = vector.broadcast %cst_42 : f32 to vector<24x1xf32>
    %137 = arith.addf %133, %136 : vector<24x1xf32>
    %138 = math.rsqrt %137 : vector<24x1xf32>
    %139 = vector.broadcast %138 : vector<24x1xf32> to vector<24x52xf32>
    %140 = arith.mulf %135, %139 : vector<24x52xf32>
    %141 = vector.broadcast %121 : vector<1x52xf32> to vector<24x52xf32>
    %142 = arith.mulf %140, %141 : vector<24x52xf32>
    %143 = vector.broadcast %122 : vector<1x52xf32> to vector<24x52xf32>
    %144 = arith.addf %142, %143 : vector<24x52xf32>
    %145 = arith.truncf %144 : vector<24x52xf32> to vector<24x52xbf16>
    %c112 = arith.constant 112 : index
    %c0_43 = arith.constant 0 : index
    %146 = vector.load %arg2[%c112, %c0_43] : memref<424x256xbf16, #tpu.memory_space<vmem>>, vector<52x256xbf16>
    %cst_44 = arith.constant dense<0.000000e+00> : vector<24x256xf32>
    %147 = tpu.matmul %145, %146, %cst_44 {dimension_numbers = #tpu.dot_dimension_numbers<[1], [0], [0], [1], [0, 0, 1, 1], [], []>} : vector<24x52xbf16>, vector<52x256xbf16>, vector<24x256xf32> -> vector<24x256xf32>
    %c4 = arith.constant 4 : index
    %c0_45 = arith.constant 0 : index
    %148 = vector.load %arg3[%c4, %c0_45] : memref<8x256xf32, #tpu.memory_space<vmem>>, vector<1x256xf32>
    %149 = vector.broadcast %148 : vector<1x256xf32> to vector<24x256xf32>
    %150 = arith.addf %147, %149 : vector<24x256xf32>
    %cst_46 = arith.constant 0.000000e+00 : f32
    %151 = vector.broadcast %cst_46 : f32 to vector<24x256xf32>
    %152 = arith.maximumf %150, %151 : vector<24x256xf32>
    %153 = arith.truncf %152 : vector<24x256xf32> to vector<24x256xbf16>
    %c168 = arith.constant 168 : index
    %c0_47 = arith.constant 0 : index
    %154 = vector.load %arg2[%c168, %c0_47] : memref<424x256xbf16, #tpu.memory_space<vmem>>, vector<256x256xbf16>
    %cst_48 = arith.constant dense<0.000000e+00> : vector<24x256xf32>
    %155 = tpu.matmul %153, %154, %cst_48 {dimension_numbers = #tpu.dot_dimension_numbers<[1], [0], [0], [1], [0, 0, 1, 1], [], []>} : vector<24x256xbf16>, vector<256x256xbf16>, vector<24x256xf32> -> vector<24x256xf32>
    %156 = vector.extract_strided_slice %155 {offsets = [0, 0], sizes = [24, 52], strides = [1, 1]} : vector<24x256xf32> to vector<24x52xf32>
    %c5 = arith.constant 5 : index
    %c0_49 = arith.constant 0 : index
    %157 = vector.load %arg3[%c5, %c0_49] : memref<8x256xf32, #tpu.memory_space<vmem>>, vector<1x52xf32>
    %158 = vector.broadcast %157 : vector<1x52xf32> to vector<24x52xf32>
    %159 = arith.addf %156, %158 : vector<24x52xf32>
    %160 = arith.addf %144, %159 : vector<24x52xf32>
    %c6 = arith.constant 6 : index
    %c0_50 = arith.constant 0 : index
    %161 = vector.load %arg3[%c6, %c0_50] : memref<8x256xf32, #tpu.memory_space<vmem>>, vector<1x52xf32>
    %c7 = arith.constant 7 : index
    %c0_51 = arith.constant 0 : index
    %162 = vector.load %arg3[%c7, %c0_51] : memref<8x256xf32, #tpu.memory_space<vmem>>, vector<1x52xf32>
    %cst_52 = arith.constant dense<0.000000e+00> : vector<24xf32>
    %163 = vector.multi_reduction <add>, %160, %cst_52 [1] : vector<24x52xf32> to vector<24xf32>
    %164 = vector.shape_cast %163 : vector<24xf32> to vector<24x1xf32>
    %cst_53 = arith.constant 5.200000e+01 : f32
    %165 = vector.broadcast %cst_53 : f32 to vector<24x1xf32>
    %166 = arith.divf %164, %165 : vector<24x1xf32>
    %167 = vector.broadcast %166 : vector<24x1xf32> to vector<24x52xf32>
    %168 = arith.subf %160, %167 : vector<24x52xf32>
    %169 = arith.mulf %168, %168 : vector<24x52xf32>
    %cst_54 = arith.constant dense<0.000000e+00> : vector<24xf32>
    %170 = vector.multi_reduction <add>, %169, %cst_54 [1] : vector<24x52xf32> to vector<24xf32>
    %171 = vector.shape_cast %170 : vector<24xf32> to vector<24x1xf32>
    %cst_55 = arith.constant 5.200000e+01 : f32
    %172 = vector.broadcast %cst_55 : f32 to vector<24x1xf32>
    %173 = arith.divf %171, %172 : vector<24x1xf32>
    %174 = vector.broadcast %166 : vector<24x1xf32> to vector<24x52xf32>
    %175 = arith.subf %160, %174 : vector<24x52xf32>
    %cst_56 = arith.constant 9.99999974E-6 : f32
    %176 = vector.broadcast %cst_56 : f32 to vector<24x1xf32>
    %177 = arith.addf %173, %176 : vector<24x1xf32>
    %178 = math.rsqrt %177 : vector<24x1xf32>
    %179 = vector.broadcast %178 : vector<24x1xf32> to vector<24x52xf32>
    %180 = arith.mulf %175, %179 : vector<24x52xf32>
    %181 = vector.broadcast %161 : vector<1x52xf32> to vector<24x52xf32>
    %182 = arith.mulf %180, %181 : vector<24x52xf32>
    %183 = vector.broadcast %162 : vector<1x52xf32> to vector<24x52xf32>
    %184 = arith.addf %182, %183 : vector<24x52xf32>
    %185 = arith.truncf %184 : vector<24x52xf32> to vector<24x52xbf16>
    %c0_57 = arith.constant 0 : index
    %c0_58 = arith.constant 0 : index
    %186 = vector.load %arg4[%c0_57, %c0_58] : memref<424x256xbf16, #tpu.memory_space<vmem>>, vector<52x256xbf16>
    %cst_59 = arith.constant dense<0.000000e+00> : vector<24x256xf32>
    %187 = tpu.matmul %185, %186, %cst_59 {dimension_numbers = #tpu.dot_dimension_numbers<[1], [0], [0], [1], [0, 0, 1, 1], [], []>} : vector<24x52xbf16>, vector<52x256xbf16>, vector<24x256xf32> -> vector<24x256xf32>
    %c0_60 = arith.constant 0 : index
    %c0_61 = arith.constant 0 : index
    %188 = vector.load %arg5[%c0_60, %c0_61] : memref<8x256xf32, #tpu.memory_space<vmem>>, vector<1x256xf32>
    %189 = vector.broadcast %188 : vector<1x256xf32> to vector<24x256xf32>
    %190 = arith.addf %187, %189 : vector<24x256xf32>
    %191 = vector.extract_strided_slice %190 {offsets = [0, 0], sizes = [24, 13], strides = [1, 1]} : vector<24x256xf32> to vector<24x13xf32>
    %192 = vector.extract_strided_slice %190 {offsets = [0, 52], sizes = [24, 13], strides = [1, 1]} : vector<24x256xf32> to vector<24x13xf32>
    %193 = vector.extract_strided_slice %190 {offsets = [0, 104], sizes = [24, 13], strides = [1, 1]} : vector<24x256xf32> to vector<24x13xf32>
    %194 = vector.shape_cast %191 : vector<24x13xf32> to vector<2x12x13xf32>
    %195 = arith.truncf %194 : vector<2x12x13xf32> to vector<2x12x13xbf16>
    %196 = vector.shape_cast %192 : vector<24x13xf32> to vector<2x12x13xf32>
    %197 = arith.truncf %196 : vector<2x12x13xf32> to vector<2x12x13xbf16>
    %198 = vector.shape_cast %193 : vector<24x13xf32> to vector<2x12x13xf32>
    %199 = arith.truncf %198 : vector<2x12x13xf32> to vector<2x12x13xbf16>
    "tpu.trace_start"() <{level = 10 : i32, message = "bqd,bkd->bqk"}> : () -> ()
    %cst_62 = arith.constant dense<0.000000e+00> : vector<2x12x12xf32>
    %200 = tpu.matmul %195, %197, %cst_62 {dimension_numbers = #tpu.dot_dimension_numbers<[2], [2], [1], [1], [0, 0, 0, 1, 1, 1], [0], [0]>} : vector<2x12x13xbf16>, vector<2x12x13xbf16>, vector<2x12x12xf32> -> vector<2x12x12xf32>
    "tpu.trace_stop"() : () -> ()
    %cst_63 = arith.constant 0.277350098 : f32
    %201 = vector.broadcast %cst_63 : f32 to vector<2x12x12xf32>
    %202 = arith.mulf %200, %201 : vector<2x12x12xf32>
    %cst_64 = arith.constant dense<0xFF800000> : vector<2x12xf32>
    %203 = vector.multi_reduction <maximumf>, %202, %cst_64 [2] : vector<2x12x12xf32> to vector<2x12xf32>
    %204 = vector.shape_cast %203 : vector<2x12xf32> to vector<2x12x1xf32>
    %205 = vector.broadcast %204 : vector<2x12x1xf32> to vector<2x12x12xf32>
    %206 = arith.subf %202, %205 : vector<2x12x12xf32>
    %207 = math.exp %206 : vector<2x12x12xf32>
    %cst_65 = arith.constant dense<0.000000e+00> : vector<2x12xf32>
    %208 = vector.multi_reduction <add>, %207, %cst_65 [2] : vector<2x12x12xf32> to vector<2x12xf32>
    %209 = vector.shape_cast %208 : vector<2x12xf32> to vector<2x12x1xf32>
    %210 = tpu.reciprocal %209 {approx = true} : vector<2x12x1xf32> -> vector<2x12x1xf32>
    %211 = vector.broadcast %210 : vector<2x12x1xf32> to vector<2x12x12xf32>
    %212 = arith.mulf %207, %211 : vector<2x12x12xf32>
    %213 = arith.truncf %212 : vector<2x12x12xf32> to vector<2x12x12xbf16>
    "tpu.trace_start"() <{level = 10 : i32, message = "bqk,bkd->bqd"}> : () -> ()
    %cst_66 = arith.constant dense<0.000000e+00> : vector<2x12x13xf32>
    %214 = tpu.matmul %213, %199, %cst_66 {dimension_numbers = #tpu.dot_dimension_numbers<[2], [1], [1], [2], [0, 0, 0, 1, 1, 2], [0], [0]>} : vector<2x12x12xbf16>, vector<2x12x13xbf16>, vector<2x12x13xf32> -> vector<2x12x13xf32>
    "tpu.trace_stop"() : () -> ()
    %215 = vector.shape_cast %214 : vector<2x12x13xf32> to vector<24x13xf32>
    %c0_67 = arith.constant 0 : index
    %c0_68 = arith.constant 0 : index
    %216 = vector.load %arg9[%c0_67, %c0_68] : memref<24x52xf32, #tpu.memory_space<vmem>>, vector<24x13xf32>
    tpu.vector_store %arg9[%c0_67, %c0_68], %215 {strides = array<i32>} : memref<24x52xf32, #tpu.memory_space<vmem>>, vector<24x13xf32>,
    %217 = vector.extract_strided_slice %190 {offsets = [0, 13], sizes = [24, 13], strides = [1, 1]} : vector<24x256xf32> to vector<24x13xf32>
    %218 = vector.extract_strided_slice %190 {offsets = [0, 65], sizes = [24, 13], strides = [1, 1]} : vector<24x256xf32> to vector<24x13xf32>
    %219 = vector.extract_strided_slice %190 {offsets = [0, 117], sizes = [24, 13], strides = [1, 1]} : vector<24x256xf32> to vector<24x13xf32>
    %220 = vector.shape_cast %217 : vector<24x13xf32> to vector<2x12x13xf32>
    %221 = arith.truncf %220 : vector<2x12x13xf32> to vector<2x12x13xbf16>
    %222 = vector.shape_cast %218 : vector<24x13xf32> to vector<2x12x13xf32>
    %223 = arith.truncf %222 : vector<2x12x13xf32> to vector<2x12x13xbf16>
    %224 = vector.shape_cast %219 : vector<24x13xf32> to vector<2x12x13xf32>
    %225 = arith.truncf %224 : vector<2x12x13xf32> to vector<2x12x13xbf16>
    "tpu.trace_start"() <{level = 10 : i32, message = "bqd,bkd->bqk"}> : () -> ()
    %cst_69 = arith.constant dense<0.000000e+00> : vector<2x12x12xf32>
    %226 = tpu.matmul %221, %223, %cst_69 {dimension_numbers = #tpu.dot_dimension_numbers<[2], [2], [1], [1], [0, 0, 0, 1, 1, 1], [0], [0]>} : vector<2x12x13xbf16>, vector<2x12x13xbf16>, vector<2x12x12xf32> -> vector<2x12x12xf32>
    "tpu.trace_stop"() : () -> ()
    %cst_70 = arith.constant 0.277350098 : f32
    %227 = vector.broadcast %cst_70 : f32 to vector<2x12x12xf32>
    %228 = arith.mulf %226, %227 : vector<2x12x12xf32>
    %cst_71 = arith.constant dense<0xFF800000> : vector<2x12xf32>
    %229 = vector.multi_reduction <maximumf>, %228, %cst_71 [2] : vector<2x12x12xf32> to vector<2x12xf32>
    %230 = vector.shape_cast %229 : vector<2x12xf32> to vector<2x12x1xf32>
    %231 = vector.broadcast %230 : vector<2x12x1xf32> to vector<2x12x12xf32>
    %232 = arith.subf %228, %231 : vector<2x12x12xf32>
    %233 = math.exp %232 : vector<2x12x12xf32>
    %cst_72 = arith.constant dense<0.000000e+00> : vector<2x12xf32>
    %234 = vector.multi_reduction <add>, %233, %cst_72 [2] : vector<2x12x12xf32> to vector<2x12xf32>
    %235 = vector.shape_cast %234 : vector<2x12xf32> to vector<2x12x1xf32>
    %236 = tpu.reciprocal %235 {approx = true} : vector<2x12x1xf32> -> vector<2x12x1xf32>
    %237 = vector.broadcast %236 : vector<2x12x1xf32> to vector<2x12x12xf32>
    %238 = arith.mulf %233, %237 : vector<2x12x12xf32>
    %239 = arith.truncf %238 : vector<2x12x12xf32> to vector<2x12x12xbf16>
    "tpu.trace_start"() <{level = 10 : i32, message = "bqk,bkd->bqd"}> : () -> ()
    %cst_73 = arith.constant dense<0.000000e+00> : vector<2x12x13xf32>
    %240 = tpu.matmul %239, %225, %cst_73 {dimension_numbers = #tpu.dot_dimension_numbers<[2], [1], [1], [2], [0, 0, 0, 1, 1, 2], [0], [0]>} : vector<2x12x12xbf16>, vector<2x12x13xbf16>, vector<2x12x13xf32> -> vector<2x12x13xf32>
    "tpu.trace_stop"() : () -> ()
    %241 = vector.shape_cast %240 : vector<2x12x13xf32> to vector<24x13xf32>
    %c0_74 = arith.constant 0 : index
    %c13_75 = arith.constant 13 : index
    %242 = vector.load %arg9[%c0_74, %c13_75] : memref<24x52xf32, #tpu.memory_space<vmem>>, vector<24x13xf32>
    tpu.vector_store %arg9[%c0_74, %c13_75], %241 {strides = array<i32>} : memref<24x52xf32, #tpu.memory_space<vmem>>, vector<24x13xf32>,
    %243 = vector.extract_strided_slice %190 {offsets = [0, 26], sizes = [24, 13], strides = [1, 1]} : vector<24x256xf32> to vector<24x13xf32>
    %244 = vector.extract_strided_slice %190 {offsets = [0, 78], sizes = [24, 13], strides = [1, 1]} : vector<24x256xf32> to vector<24x13xf32>
    %245 = vector.extract_strided_slice %190 {offsets = [0, 130], sizes = [24, 13], strides = [1, 1]} : vector<24x256xf32> to vector<24x13xf32>
    %246 = vector.shape_cast %243 : vector<24x13xf32> to vector<2x12x13xf32>
    %247 = arith.truncf %246 : vector<2x12x13xf32> to vector<2x12x13xbf16>
    %248 = vector.shape_cast %244 : vector<24x13xf32> to vector<2x12x13xf32>
    %249 = arith.truncf %248 : vector<2x12x13xf32> to vector<2x12x13xbf16>
    %250 = vector.shape_cast %245 : vector<24x13xf32> to vector<2x12x13xf32>
    %251 = arith.truncf %250 : vector<2x12x13xf32> to vector<2x12x13xbf16>
    "tpu.trace_start"() <{level = 10 : i32, message = "bqd,bkd->bqk"}> : () -> ()
    %cst_76 = arith.constant dense<0.000000e+00> : vector<2x12x12xf32>
    %252 = tpu.matmul %247, %249, %cst_76 {dimension_numbers = #tpu.dot_dimension_numbers<[2], [2], [1], [1], [0, 0, 0, 1, 1, 1], [0], [0]>} : vector<2x12x13xbf16>, vector<2x12x13xbf16>, vector<2x12x12xf32> -> vector<2x12x12xf32>
    "tpu.trace_stop"() : () -> ()
    %cst_77 = arith.constant 0.277350098 : f32
    %253 = vector.broadcast %cst_77 : f32 to vector<2x12x12xf32>
    %254 = arith.mulf %252, %253 : vector<2x12x12xf32>
    %cst_78 = arith.constant dense<0xFF800000> : vector<2x12xf32>
    %255 = vector.multi_reduction <maximumf>, %254, %cst_78 [2] : vector<2x12x12xf32> to vector<2x12xf32>
    %256 = vector.shape_cast %255 : vector<2x12xf32> to vector<2x12x1xf32>
    %257 = vector.broadcast %256 : vector<2x12x1xf32> to vector<2x12x12xf32>
    %258 = arith.subf %254, %257 : vector<2x12x12xf32>
    %259 = math.exp %258 : vector<2x12x12xf32>
    %cst_79 = arith.constant dense<0.000000e+00> : vector<2x12xf32>
    %260 = vector.multi_reduction <add>, %259, %cst_79 [2] : vector<2x12x12xf32> to vector<2x12xf32>
    %261 = vector.shape_cast %260 : vector<2x12xf32> to vector<2x12x1xf32>
    %262 = tpu.reciprocal %261 {approx = true} : vector<2x12x1xf32> -> vector<2x12x1xf32>
    %263 = vector.broadcast %262 : vector<2x12x1xf32> to vector<2x12x12xf32>
    %264 = arith.mulf %259, %263 : vector<2x12x12xf32>
    %265 = arith.truncf %264 : vector<2x12x12xf32> to vector<2x12x12xbf16>
    "tpu.trace_start"() <{level = 10 : i32, message = "bqk,bkd->bqd"}> : () -> ()
    %cst_80 = arith.constant dense<0.000000e+00> : vector<2x12x13xf32>
    %266 = tpu.matmul %265, %251, %cst_80 {dimension_numbers = #tpu.dot_dimension_numbers<[2], [1], [1], [2], [0, 0, 0, 1, 1, 2], [0], [0]>} : vector<2x12x12xbf16>, vector<2x12x13xbf16>, vector<2x12x13xf32> -> vector<2x12x13xf32>
    "tpu.trace_stop"() : () -> ()
    %267 = vector.shape_cast %266 : vector<2x12x13xf32> to vector<24x13xf32>
    %c0_81 = arith.constant 0 : index
    %c26_82 = arith.constant 26 : index
    %268 = vector.load %arg9[%c0_81, %c26_82] : memref<24x52xf32, #tpu.memory_space<vmem>>, vector<24x13xf32>
    tpu.vector_store %arg9[%c0_81, %c26_82], %267 {strides = array<i32>} : memref<24x52xf32, #tpu.memory_space<vmem>>, vector<24x13xf32>,
    %269 = vector.extract_strided_slice %190 {offsets = [0, 39], sizes = [24, 13], strides = [1, 1]} : vector<24x256xf32> to vector<24x13xf32>
    %270 = vector.extract_strided_slice %190 {offsets = [0, 91], sizes = [24, 13], strides = [1, 1]} : vector<24x256xf32> to vector<24x13xf32>
    %271 = vector.extract_strided_slice %190 {offsets = [0, 143], sizes = [24, 13], strides = [1, 1]} : vector<24x256xf32> to vector<24x13xf32>
    %272 = vector.shape_cast %269 : vector<24x13xf32> to vector<2x12x13xf32>
    %273 = arith.truncf %272 : vector<2x12x13xf32> to vector<2x12x13xbf16>
    %274 = vector.shape_cast %270 : vector<24x13xf32> to vector<2x12x13xf32>
    %275 = arith.truncf %274 : vector<2x12x13xf32> to vector<2x12x13xbf16>
    %276 = vector.shape_cast %271 : vector<24x13xf32> to vector<2x12x13xf32>
    %277 = arith.truncf %276 : vector<2x12x13xf32> to vector<2x12x13xbf16>
    "tpu.trace_start"() <{level = 10 : i32, message = "bqd,bkd->bqk"}> : () -> ()
    %cst_83 = arith.constant dense<0.000000e+00> : vector<2x12x12xf32>
    %278 = tpu.matmul %273, %275, %cst_83 {dimension_numbers = #tpu.dot_dimension_numbers<[2], [2], [1], [1], [0, 0, 0, 1, 1, 1], [0], [0]>} : vector<2x12x13xbf16>, vector<2x12x13xbf16>, vector<2x12x12xf32> -> vector<2x12x12xf32>
    "tpu.trace_stop"() : () -> ()
    %cst_84 = arith.constant 0.277350098 : f32
    %279 = vector.broadcast %cst_84 : f32 to vector<2x12x12xf32>
    %280 = arith.mulf %278, %279 : vector<2x12x12xf32>
    %cst_85 = arith.constant dense<0xFF800000> : vector<2x12xf32>
    %281 = vector.multi_reduction <maximumf>, %280, %cst_85 [2] : vector<2x12x12xf32> to vector<2x12xf32>
    %282 = vector.shape_cast %281 : vector<2x12xf32> to vector<2x12x1xf32>
    %283 = vector.broadcast %282 : vector<2x12x1xf32> to vector<2x12x12xf32>
    %284 = arith.subf %280, %283 : vector<2x12x12xf32>
    %285 = math.exp %284 : vector<2x12x12xf32>
    %cst_86 = arith.constant dense<0.000000e+00> : vector<2x12xf32>
    %286 = vector.multi_reduction <add>, %285, %cst_86 [2] : vector<2x12x12xf32> to vector<2x12xf32>
    %287 = vector.shape_cast %286 : vector<2x12xf32> to vector<2x12x1xf32>
    %288 = tpu.reciprocal %287 {approx = true} : vector<2x12x1xf32> -> vector<2x12x1xf32>
    %289 = vector.broadcast %288 : vector<2x12x1xf32> to vector<2x12x12xf32>
    %290 = arith.mulf %285, %289 : vector<2x12x12xf32>
    %291 = arith.truncf %290 : vector<2x12x12xf32> to vector<2x12x12xbf16>
    "tpu.trace_start"() <{level = 10 : i32, message = "bqk,bkd->bqd"}> : () -> ()
    %cst_87 = arith.constant dense<0.000000e+00> : vector<2x12x13xf32>
    %292 = tpu.matmul %291, %277, %cst_87 {dimension_numbers = #tpu.dot_dimension_numbers<[2], [1], [1], [2], [0, 0, 0, 1, 1, 2], [0], [0]>} : vector<2x12x12xbf16>, vector<2x12x13xbf16>, vector<2x12x13xf32> -> vector<2x12x13xf32>
    "tpu.trace_stop"() : () -> ()
    %293 = vector.shape_cast %292 : vector<2x12x13xf32> to vector<24x13xf32>
    %c0_88 = arith.constant 0 : index
    %c39_89 = arith.constant 39 : index
    %294 = vector.load %arg9[%c0_88, %c39_89] : memref<24x52xf32, #tpu.memory_space<vmem>>, vector<24x13xf32>
    tpu.vector_store %arg9[%c0_88, %c39_89], %293 {strides = array<i32>} : memref<24x52xf32, #tpu.memory_space<vmem>>, vector<24x13xf32>,
    %c0_90 = arith.constant 0 : index
    %c0_91 = arith.constant 0 : index
    %295 = vector.load %arg9[%c0_90, %c0_91] : memref<24x52xf32, #tpu.memory_space<vmem>>, vector<24x52xf32>
    %296 = arith.truncf %295 : vector<24x52xf32> to vector<24x52xbf16>
    %c56_92 = arith.constant 56 : index
    %c0_93 = arith.constant 0 : index
    %297 = vector.load %arg4[%c56_92, %c0_93] : memref<424x256xbf16, #tpu.memory_space<vmem>>, vector<52x256xbf16>
    %cst_94 = arith.constant dense<0.000000e+00> : vector<24x256xf32>
    %298 = tpu.matmul %296, %297, %cst_94 {dimension_numbers = #tpu.dot_dimension_numbers<[1], [0], [0], [1], [0, 0, 1, 1], [], []>} : vector<24x52xbf16>, vector<52x256xbf16>, vector<24x256xf32> -> vector<24x256xf32>
    %299 = vector.extract_strided_slice %298 {offsets = [0, 0], sizes = [24, 52], strides = [1, 1]} : vector<24x256xf32> to vector<24x52xf32>
    %c1_95 = arith.constant 1 : index
    %c0_96 = arith.constant 0 : index
    %300 = vector.load %arg5[%c1_95, %c0_96] : memref<8x256xf32, #tpu.memory_space<vmem>>, vector<1x52xf32>
    %301 = vector.broadcast %300 : vector<1x52xf32> to vector<24x52xf32>
    %302 = arith.addf %299, %301 : vector<24x52xf32>
    %303 = arith.addf %184, %302 : vector<24x52xf32>
    %c2_97 = arith.constant 2 : index
    %c0_98 = arith.constant 0 : index
    %304 = vector.load %arg5[%c2_97, %c0_98] : memref<8x256xf32, #tpu.memory_space<vmem>>, vector<1x52xf32>
    %c3_99 = arith.constant 3 : index
    %c0_100 = arith.constant 0 : index
    %305 = vector.load %arg5[%c3_99, %c0_100] : memref<8x256xf32, #tpu.memory_space<vmem>>, vector<1x52xf32>
    %cst_101 = arith.constant dense<0.000000e+00> : vector<24xf32>
    %306 = vector.multi_reduction <add>, %303, %cst_101 [1] : vector<24x52xf32> to vector<24xf32>
    %307 = vector.shape_cast %306 : vector<24xf32> to vector<24x1xf32>
    %cst_102 = arith.constant 5.200000e+01 : f32
    %308 = vector.broadcast %cst_102 : f32 to vector<24x1xf32>
    %309 = arith.divf %307, %308 : vector<24x1xf32>
    %310 = vector.broadcast %309 : vector<24x1xf32> to vector<24x52xf32>
    %311 = arith.subf %303, %310 : vector<24x52xf32>
    %312 = arith.mulf %311, %311 : vector<24x52xf32>
    %cst_103 = arith.constant dense<0.000000e+00> : vector<24xf32>
    %313 = vector.multi_reduction <add>, %312, %cst_103 [1] : vector<24x52xf32> to vector<24xf32>
    %314 = vector.shape_cast %313 : vector<24xf32> to vector<24x1xf32>
    %cst_104 = arith.constant 5.200000e+01 : f32
    %315 = vector.broadcast %cst_104 : f32 to vector<24x1xf32>
    %316 = arith.divf %314, %315 : vector<24x1xf32>
    %317 = vector.broadcast %309 : vector<24x1xf32> to vector<24x52xf32>
    %318 = arith.subf %303, %317 : vector<24x52xf32>
    %cst_105 = arith.constant 9.99999974E-6 : f32
    %319 = vector.broadcast %cst_105 : f32 to vector<24x1xf32>
    %320 = arith.addf %316, %319 : vector<24x1xf32>
    %321 = math.rsqrt %320 : vector<24x1xf32>
    %322 = vector.broadcast %321 : vector<24x1xf32> to vector<24x52xf32>
    %323 = arith.mulf %318, %322 : vector<24x52xf32>
    %324 = vector.broadcast %304 : vector<1x52xf32> to vector<24x52xf32>
    %325 = arith.mulf %323, %324 : vector<24x52xf32>
    %326 = vector.broadcast %305 : vector<1x52xf32> to vector<24x52xf32>
    %327 = arith.addf %325, %326 : vector<24x52xf32>
    %328 = arith.truncf %327 : vector<24x52xf32> to vector<24x52xbf16>
    %c112_106 = arith.constant 112 : index
    %c0_107 = arith.constant 0 : index
    %329 = vector.load %arg4[%c112_106, %c0_107] : memref<424x256xbf16, #tpu.memory_space<vmem>>, vector<52x256xbf16>
    %cst_108 = arith.constant dense<0.000000e+00> : vector<24x256xf32>
    %330 = tpu.matmul %328, %329, %cst_108 {dimension_numbers = #tpu.dot_dimension_numbers<[1], [0], [0], [1], [0, 0, 1, 1], [], []>} : vector<24x52xbf16>, vector<52x256xbf16>, vector<24x256xf32> -> vector<24x256xf32>
    %c4_109 = arith.constant 4 : index
    %c0_110 = arith.constant 0 : index
    %331 = vector.load %arg5[%c4_109, %c0_110] : memref<8x256xf32, #tpu.memory_space<vmem>>, vector<1x256xf32>
    %332 = vector.broadcast %331 : vector<1x256xf32> to vector<24x256xf32>
    %333 = arith.addf %330, %332 : vector<24x256xf32>
    %cst_111 = arith.constant 0.000000e+00 : f32
    %334 = vector.broadcast %cst_111 : f32 to vector<24x256xf32>
    %335 = arith.maximumf %333, %334 : vector<24x256xf32>
    %336 = arith.truncf %335 : vector<24x256xf32> to vector<24x256xbf16>
    %c168_112 = arith.constant 168 : index
    %c0_113 = arith.constant 0 : index
    %337 = vector.load %arg4[%c168_112, %c0_113] : memref<424x256xbf16, #tpu.memory_space<vmem>>, vector<256x256xbf16>
    %cst_114 = arith.constant dense<0.000000e+00> : vector<24x256xf32>
    %338 = tpu.matmul %336, %337, %cst_114 {dimension_numbers = #tpu.dot_dimension_numbers<[1], [0], [0], [1], [0, 0, 1, 1], [], []>} : vector<24x256xbf16>, vector<256x256xbf16>, vector<24x256xf32> -> vector<24x256xf32>
    %339 = vector.extract_strided_slice %338 {offsets = [0, 0], sizes = [24, 52], strides = [1, 1]} : vector<24x256xf32> to vector<24x52xf32>
    %c5_115 = arith.constant 5 : index
    %c0_116 = arith.constant 0 : index
    %340 = vector.load %arg5[%c5_115, %c0_116] : memref<8x256xf32, #tpu.memory_space<vmem>>, vector<1x52xf32>
    %341 = vector.broadcast %340 : vector<1x52xf32> to vector<24x52xf32>
    %342 = arith.addf %339, %341 : vector<24x52xf32>
    %343 = arith.addf %327, %342 : vector<24x52xf32>
    %c6_117 = arith.constant 6 : index
    %c0_118 = arith.constant 0 : index
    %344 = vector.load %arg5[%c6_117, %c0_118] : memref<8x256xf32, #tpu.memory_space<vmem>>, vector<1x52xf32>
    %c7_119 = arith.constant 7 : index
    %c0_120 = arith.constant 0 : index
    %345 = vector.load %arg5[%c7_119, %c0_120] : memref<8x256xf32, #tpu.memory_space<vmem>>, vector<1x52xf32>
    %cst_121 = arith.constant dense<0.000000e+00> : vector<24xf32>
    %346 = vector.multi_reduction <add>, %343, %cst_121 [1] : vector<24x52xf32> to vector<24xf32>
    %347 = vector.shape_cast %346 : vector<24xf32> to vector<24x1xf32>
    %cst_122 = arith.constant 5.200000e+01 : f32
    %348 = vector.broadcast %cst_122 : f32 to vector<24x1xf32>
    %349 = arith.divf %347, %348 : vector<24x1xf32>
    %350 = vector.broadcast %349 : vector<24x1xf32> to vector<24x52xf32>
    %351 = arith.subf %343, %350 : vector<24x52xf32>
    %352 = arith.mulf %351, %351 : vector<24x52xf32>
    %cst_123 = arith.constant dense<0.000000e+00> : vector<24xf32>
    %353 = vector.multi_reduction <add>, %352, %cst_123 [1] : vector<24x52xf32> to vector<24xf32>
    %354 = vector.shape_cast %353 : vector<24xf32> to vector<24x1xf32>
    %cst_124 = arith.constant 5.200000e+01 : f32
    %355 = vector.broadcast %cst_124 : f32 to vector<24x1xf32>
    %356 = arith.divf %354, %355 : vector<24x1xf32>
    %357 = vector.broadcast %349 : vector<24x1xf32> to vector<24x52xf32>
    %358 = arith.subf %343, %357 : vector<24x52xf32>
    %cst_125 = arith.constant 9.99999974E-6 : f32
    %359 = vector.broadcast %cst_125 : f32 to vector<24x1xf32>
    %360 = arith.addf %356, %359 : vector<24x1xf32>
    %361 = math.rsqrt %360 : vector<24x1xf32>
    %362 = vector.broadcast %361 : vector<24x1xf32> to vector<24x52xf32>
    %363 = arith.mulf %358, %362 : vector<24x52xf32>
    %364 = vector.broadcast %344 : vector<1x52xf32> to vector<24x52xf32>
    %365 = arith.mulf %363, %364 : vector<24x52xf32>
    %366 = vector.broadcast %345 : vector<1x52xf32> to vector<24x52xf32>
    %367 = arith.addf %365, %366 : vector<24x52xf32>
    %368 = vector.shape_cast %367 : vector<24x52xf32> to vector<2x12x52xf32>
    %369 = vector.extract_strided_slice %368 {offsets = [0, 11, 0], sizes = [2, 1, 52], strides = [1, 1, 1]} : vector<2x12x52xf32> to vector<2x1x52xf32>
    %370 = vector.shape_cast %369 : vector<2x1x52xf32> to vector<2x52xf32>
    %371 = arith.truncf %370 : vector<2x52xf32> to vector<2x52xbf16>
    %c0_126 = arith.constant 0 : index
    %c0_127 = arith.constant 0 : index
    %372 = vector.load %arg6[%c0_126, %c0_127] : memref<248x128xbf16, #tpu.memory_space<vmem>>, vector<52x128xbf16>
    %cst_128 = arith.constant dense<0.000000e+00> : vector<2x128xf32>
    %373 = tpu.matmul %371, %372, %cst_128 {dimension_numbers = #tpu.dot_dimension_numbers<[1], [0], [0], [1], [0, 0, 1, 1], [], []>} : vector<2x52xbf16>, vector<52x128xbf16>, vector<2x128xf32> -> vector<2x128xf32>
    %c0_129 = arith.constant 0 : index
    %c0_130 = arith.constant 0 : index
    %374 = vector.load %arg7[%c0_129, %c0_130] : memref<8x128xf32, #tpu.memory_space<vmem>>, vector<1x128xf32>
    %375 = vector.broadcast %374 : vector<1x128xf32> to vector<2x128xf32>
    %376 = arith.addf %373, %375 : vector<2x128xf32>
    %c1_131 = arith.constant 1 : index
    %c0_132 = arith.constant 0 : index
    %377 = vector.load %arg7[%c1_131, %c0_132] : memref<8x128xf32, #tpu.memory_space<vmem>>, vector<1x128xf32>
    %c2_133 = arith.constant 2 : index
    %c0_134 = arith.constant 0 : index
    %378 = vector.load %arg7[%c2_133, %c0_134] : memref<8x128xf32, #tpu.memory_space<vmem>>, vector<1x128xf32>
    %cst_135 = arith.constant dense<0.000000e+00> : vector<2xf32>
    %379 = vector.multi_reduction <add>, %376, %cst_135 [1] : vector<2x128xf32> to vector<2xf32>
    %380 = vector.shape_cast %379 : vector<2xf32> to vector<2x1xf32>
    %cst_136 = arith.constant 1.280000e+02 : f32
    %381 = vector.broadcast %cst_136 : f32 to vector<2x1xf32>
    %382 = arith.divf %380, %381 : vector<2x1xf32>
    %383 = vector.broadcast %382 : vector<2x1xf32> to vector<2x128xf32>
    %384 = arith.subf %376, %383 : vector<2x128xf32>
    %385 = arith.mulf %384, %384 : vector<2x128xf32>
    %cst_137 = arith.constant dense<0.000000e+00> : vector<2xf32>
    %386 = vector.multi_reduction <add>, %385, %cst_137 [1] : vector<2x128xf32> to vector<2xf32>
    %387 = vector.shape_cast %386 : vector<2xf32> to vector<2x1xf32>
    %cst_138 = arith.constant 1.280000e+02 : f32
    %388 = vector.broadcast %cst_138 : f32 to vector<2x1xf32>
    %389 = arith.divf %387, %388 : vector<2x1xf32>
    %390 = vector.broadcast %382 : vector<2x1xf32> to vector<2x128xf32>
    %391 = arith.subf %376, %390 : vector<2x128xf32>
    %cst_139 = arith.constant 9.99999974E-6 : f32
    %392 = vector.broadcast %cst_139 : f32 to vector<2x1xf32>
    %393 = arith.addf %389, %392 : vector<2x1xf32>
    %394 = math.rsqrt %393 : vector<2x1xf32>
    %395 = vector.broadcast %394 : vector<2x1xf32> to vector<2x128xf32>
    %396 = arith.mulf %391, %395 : vector<2x128xf32>
    %397 = vector.broadcast %377 : vector<1x128xf32> to vector<2x128xf32>
    %398 = arith.mulf %396, %397 : vector<2x128xf32>
    %399 = vector.broadcast %378 : vector<1x128xf32> to vector<2x128xf32>
    %400 = arith.addf %398, %399 : vector<2x128xf32>
    %cst_140 = arith.constant 0.000000e+00 : f32
    %401 = vector.broadcast %cst_140 : f32 to vector<2x128xf32>
    %402 = arith.maximumf %400, %401 : vector<2x128xf32>
    %403 = arith.truncf %402 : vector<2x128xf32> to vector<2x128xbf16>
    %c56_141 = arith.constant 56 : index
    %c0_142 = arith.constant 0 : index
    %404 = vector.load %arg6[%c56_141, %c0_142] : memref<248x128xbf16, #tpu.memory_space<vmem>>, vector<128x128xbf16>
    %cst_143 = arith.constant dense<0.000000e+00> : vector<2x128xf32>
    %405 = tpu.matmul %403, %404, %cst_143 {dimension_numbers = #tpu.dot_dimension_numbers<[1], [0], [0], [1], [0, 0, 1, 1], [], []>} : vector<2x128xbf16>, vector<128x128xbf16>, vector<2x128xf32> -> vector<2x128xf32>
    %406 = vector.extract_strided_slice %405 {offsets = [0, 0], sizes = [2, 64], strides = [1, 1]} : vector<2x128xf32> to vector<2x64xf32>
    %c3_144 = arith.constant 3 : index
    %c0_145 = arith.constant 0 : index
    %407 = vector.load %arg7[%c3_144, %c0_145] : memref<8x128xf32, #tpu.memory_space<vmem>>, vector<1x64xf32>
    %408 = vector.broadcast %407 : vector<1x64xf32> to vector<2x64xf32>
    %409 = arith.addf %406, %408 : vector<2x64xf32>
    %c4_146 = arith.constant 4 : index
    %c0_147 = arith.constant 0 : index
    %410 = vector.load %arg7[%c4_146, %c0_147] : memref<8x128xf32, #tpu.memory_space<vmem>>, vector<1x64xf32>
    %c5_148 = arith.constant 5 : index
    %c0_149 = arith.constant 0 : index
    %411 = vector.load %arg7[%c5_148, %c0_149] : memref<8x128xf32, #tpu.memory_space<vmem>>, vector<1x64xf32>
    %cst_150 = arith.constant dense<0.000000e+00> : vector<2xf32>
    %412 = vector.multi_reduction <add>, %409, %cst_150 [1] : vector<2x64xf32> to vector<2xf32>
    %413 = vector.shape_cast %412 : vector<2xf32> to vector<2x1xf32>
    %cst_151 = arith.constant 6.400000e+01 : f32
    %414 = vector.broadcast %cst_151 : f32 to vector<2x1xf32>
    %415 = arith.divf %413, %414 : vector<2x1xf32>
    %416 = vector.broadcast %415 : vector<2x1xf32> to vector<2x64xf32>
    %417 = arith.subf %409, %416 : vector<2x64xf32>
    %418 = arith.mulf %417, %417 : vector<2x64xf32>
    %cst_152 = arith.constant dense<0.000000e+00> : vector<2xf32>
    %419 = vector.multi_reduction <add>, %418, %cst_152 [1] : vector<2x64xf32> to vector<2xf32>
    %420 = vector.shape_cast %419 : vector<2xf32> to vector<2x1xf32>
    %cst_153 = arith.constant 6.400000e+01 : f32
    %421 = vector.broadcast %cst_153 : f32 to vector<2x1xf32>
    %422 = arith.divf %420, %421 : vector<2x1xf32>
    %423 = vector.broadcast %415 : vector<2x1xf32> to vector<2x64xf32>
    %424 = arith.subf %409, %423 : vector<2x64xf32>
    %cst_154 = arith.constant 9.99999974E-6 : f32
    %425 = vector.broadcast %cst_154 : f32 to vector<2x1xf32>
    %426 = arith.addf %422, %425 : vector<2x1xf32>
    %427 = math.rsqrt %426 : vector<2x1xf32>
    %428 = vector.broadcast %427 : vector<2x1xf32> to vector<2x64xf32>
    %429 = arith.mulf %424, %428 : vector<2x64xf32>
    %430 = vector.broadcast %410 : vector<1x64xf32> to vector<2x64xf32>
    %431 = arith.mulf %429, %430 : vector<2x64xf32>
    %432 = vector.broadcast %411 : vector<1x64xf32> to vector<2x64xf32>
    %433 = arith.addf %431, %432 : vector<2x64xf32>
    %cst_155 = arith.constant 0.000000e+00 : f32
    %434 = vector.broadcast %cst_155 : f32 to vector<2x64xf32>
    %435 = arith.maximumf %433, %434 : vector<2x64xf32>
    %436 = arith.truncf %435 : vector<2x64xf32> to vector<2x64xbf16>
    %c184 = arith.constant 184 : index
    %c0_156 = arith.constant 0 : index
    %437 = vector.load %arg6[%c184, %c0_156] : memref<248x128xbf16, #tpu.memory_space<vmem>>, vector<64x128xbf16>
    %cst_157 = arith.constant dense<0.000000e+00> : vector<2x128xf32>
    %438 = tpu.matmul %436, %437, %cst_157 {dimension_numbers = #tpu.dot_dimension_numbers<[1], [0], [0], [1], [0, 0, 1, 1], [], []>} : vector<2x64xbf16>, vector<64x128xbf16>, vector<2x128xf32> -> vector<2x128xf32>
    %c6_158 = arith.constant 6 : index
    %c0_159 = arith.constant 0 : index
    %439 = vector.load %arg7[%c6_158, %c0_159] : memref<8x128xf32, #tpu.memory_space<vmem>>, vector<1x128xf32>
    %440 = vector.broadcast %439 : vector<1x128xf32> to vector<2x128xf32>
    %441 = arith.addf %438, %440 : vector<2x128xf32>
    %c0_160 = arith.constant 0 : index
    %c0_161 = arith.constant 0 : index
    %442 = vector.load %arg8[%c0_160, %c0_161] : memref<2x128xf32, #tpu.memory_space<vmem>>, vector<2x128xf32>
    tpu.vector_store %arg8[%c0_160, %c0_161], %441 {strides = array<i32>} : memref<2x128xf32, #tpu.memory_space<vmem>>, vector<2x128xf32>,
    return
  }
  func.func @transform_0(%arg0: i32) -> (i32, i32, i32) {
    %c0_i32 = arith.constant 0 : i32
    %c0_i32_0 = arith.constant 0 : i32
    %c0_i32_1 = arith.constant 0 : i32
    return %arg0, %c0_i32, %c0_i32_0 : i32, i32, i32
  }
  func.func @transform_1(%arg0: i32) -> (i32, i32) {
    %c0_i32 = arith.constant 0 : i32
    %c0_i32_0 = arith.constant 0 : i32
    %c0_i32_1 = arith.constant 0 : i32
    return %c0_i32, %c0_i32_0 : i32, i32
  }
  func.func @transform_2(%arg0: i32) -> (i32, i32) {
    %c0_i32 = arith.constant 0 : i32
    %c0_i32_0 = arith.constant 0 : i32
    %c0_i32_1 = arith.constant 0 : i32
    return %c0_i32, %c0_i32_0 : i32, i32
  }
  func.func @transform_3(%arg0: i32) -> (i32, i32) {
    %c0_i32 = arith.constant 0 : i32
    %c0_i32_0 = arith.constant 0 : i32
    %c0_i32_1 = arith.constant 0 : i32
    return %c0_i32, %c0_i32_0 : i32, i32
  }
  func.func @transform_4(%arg0: i32) -> (i32, i32) {
    %c0_i32 = arith.constant 0 : i32
    %c0_i32_0 = arith.constant 0 : i32
    %c0_i32_1 = arith.constant 0 : i32
    return %c0_i32, %c0_i32_0 : i32, i32
  }
  func.func @transform_5(%arg0: i32) -> (i32, i32) {
    %c0_i32 = arith.constant 0 : i32
    %c0_i32_0 = arith.constant 0 : i32
    %c0_i32_1 = arith.constant 0 : i32
    return %c0_i32, %c0_i32_0 : i32, i32
  }
  func.func @transform_6(%arg0: i32) -> (i32, i32) {
    %c0_i32 = arith.constant 0 : i32
    %c0_i32_0 = arith.constant 0 : i32
    %c0_i32_1 = arith.constant 0 : i32
    return %c0_i32, %c0_i32_0 : i32, i32
  }
  func.func @transform_7(%arg0: i32) -> (i32, i32) {
    %c0_i32 = arith.constant 0 : i32
    %c0_i32_0 = arith.constant 0 : i32
    return %arg0, %c0_i32 : i32, i32
  }
}

</mosaic_0001>

<bundles_post_ra>
// kernel: crop_transformer_forward.1
= control target key start
LH: loop header
LB: loop body
LE: loop exit
PB: predicated region body
PF: predicated region fallthrough
CT: control target
= control target key end

     0   :  { %12 = vsyncpa [#allocation4], 0  ;;  %s6372_s0 = inlined_call_operand.vmem [shape: f32[2,12,52], index: 0, kind: input, shape index: {}]   ;;  %s6373_s1 = inlined_call_operand.hbm [shape: bf16[424,256], index: 1, kind: input, shape index: {}]   ;;  %s6374_s2 = inlined_call_operand.vmem [shape: f32[8,256], index: 2, kind: input, shape index: {}]   ;;  %s6375_s3 = inlined_call_operand.hbm [shape: bf16[424,256], index: 3, kind: input, shape index: {}]   ;;  %s6376_s4 = inlined_call_operand.vmem [shape: f32[8,256], index: 4, kind: input, shape index: {}]   ;;  %s6377_s5 = inlined_call_operand.hbm [shape: bf16[248,128], index: 5, kind: input, shape index: {}]   ;;  %s6378_s6 = inlined_call_operand.vmem [shape: f32[8,128], index: 6, kind: input, shape index: {}]   ;;  %s6379_s7 = inlined_call_operand.hbm [shape: f32[2,128], index: 7, kind: output, shape index: {}]  }
   0x1   :  { %13 = vsyncpa [#allocation7], 0 }
   0x2   :  { %14 = vsyncpa [#allocation5], 0  ;;  %s36_s26 = sshll.u32 %s6375_s3, 4  ;;  %s5271_s27 = smov [#allocation6]   ;;  %s37_s26 = int_to_ptr.hbm [resolvable:$true] %s36_s26 }
   0x3   :  { %s38_s28 = sshll.u32 %s5271_s27, 4  ;;  %s21_s8 = sshll.u32 %s6373_s1, 4  ;;  %s39_s28 = int_to_ptr.vmem [resolvable:$true] %s38_s28  ;;  %s22_s8 = int_to_ptr.hbm [resolvable:$true] %s21_s8 }
   0x4   :  { %s5272_s9 = smov 128   ;;  %s5273_s10 = smov 8  }
   0x5   :  { %44 = dma.hbm_to_vmem [thread:$0]  %s37_s26, 6784, %s39_s28, [#allocation7], %s5272_s9, %s5272_s9, %s5273_s10  }
   0x6   :  { %s5274_s11 = smov [#allocation3]   ;;  %s51_s15 = sshll.u32 %s6377_s5, 4  ;;  %s52_s15 = int_to_ptr.hbm [resolvable:$true] %s51_s15 }
   0x7   :  { %s23_s12 = sshll.u32 %s5274_s11, 4  ;;  %s5275_s3 = smov [#allocation8]   ;;  %s24_s12 = int_to_ptr.vmem [resolvable:$true] %s23_s12 }
   0x8   :  { %29 = dma.hbm_to_vmem [thread:$0]  %s22_s8, 6784, %s24_s12, [#allocation4], %s5272_s9, %s5272_s9, %s5273_s10  }
   0x9   :  { %s53_s16 = sshll.u32 %s5275_s3, 4  ;;  %s5276_s17 = smov 64   ;;  %s54_s16 = int_to_ptr.vmem [resolvable:$true] %s53_s16 }
   0xa   :  { %s5277_s18 = smov 4  }
   0xb   :  { %59 = dma.hbm_to_vmem [thread:$0]  %s52_s15, 1984, %s54_s16, [#allocation7], %s5276_s17, %s5276_s17, %s5277_s18  }
   0xc   :  { %5265 = dma.done.wait [#allocation4], 6784  }
   0xd   :  { %5266 = vsyncadd [#allocation4], 4294960512 }
   0xe   :  { %5267 = dma.done.wait [#allocation7], 8768  }
   0xf   :  { %5268 = vsyncadd [#allocation7], 4294958528  ;;  %v112_v0 = vld [vmem:[#allocation3 + $0x30] sm:$0x33]  ;;  %vm161_vm0 = vcmask 1041408   ;;  %v5350_v9 = vld [vmem:[%s6372_s0] sm:$0xff] }
  0x10   :  { %v138_v1 = vunpack.c.l.b16 %v112_v0  ;;  %v139_v2 = vunpack.c.h.b16 %v112_v0  ;;  %v4552_v3 = vld [vmem:[#allocation3 + $0x20] sm:$0xf]  ;;  %v4903_v6 = vld [vmem:[#allocation3 + $0x24] sm:$0xf0]  ;;  %v4902_v7 = vld [vmem:[#allocation3 + $0x24] sm:$0xf] }
  0x11   :  { %v4554_v8 = vld [vmem:[#allocation3 + $0x28] sm:$0xf0]  ;;  %v4544_v12 = vld [vmem:[#allocation3 + $0x10] sm:$0xf]  ;;  %v4901_v13 = vld [vmem:[#allocation3 + $0x14] sm:$0xf0]  ;;  %v4553_v18 = vor.u32 %v4903_v6, %v4552_v3 }
  0x12   :  { %v146_v4 = vpack.c.b16 %v138_v1, %v138_v1  ;;  %v147_v5 = vpack.c.b16 %v139_v2, %v139_v2  ;;  %v4900_v14 = vld [vmem:[#allocation3 + $0x14] sm:$0xf]  ;;  %v5357_v15 = vld [vmem:[%s6372_s0 + $0x8] sm:$0xf]  ;;  %v83_v17 = vrot.slane %v5350_v9, 4  ;;  %v4557_v19 = vor.u32 %v4902_v7, %v4554_v8  ;;  %s5278_s26 = smov 76  }
  0x13   :  { %v5362_v16 = vld [vmem:[%s6372_s0 + $0x10] sm:$0xff]  ;;  %v4546_v20 = vld [vmem:[#allocation3 + $0x18] sm:$0xf0]  ;;  %87 = vst [vmem:[#allocation1] ss:$2 sm:$0xff] %v5350_v9  ;;  %v4545_v25 = vor.u32 %v4901_v13, %v4544_v12  ;;  %vm154_vm1 = vcmask 424960  }
  0x14   :  { %v163_v10 = vsel %vm161_vm0, %v146_v4, 0  ;;  %v166_v11 = vsel %vm161_vm0, %v147_v5, 0  ;;  %v84_v21 = vrot.slane %v5362_v16, 4  ;;  %v5370_v22 = vld [vmem:[%s6372_s0 + $0x18] sm:$0xf]  ;;  %v4549_v26 = vor.u32 %v4900_v14, %v4546_v20  ;;  %s5279_s27 = smov 24  }
  0x15   :  { %172 = vmatpush.bf16.msra.mxu0 %v163_v10  ;;  %190 = vmatpush.bf16.msra.mxu1 %v166_v11  ;;  %89 = vst [vmem:[#allocation1 + $0x1] ss:$2 sm:$0xff] %v83_v17  ;;  %v4536_v23 = vld [vmem:[#allocation3] sm:$0xf]  ;;  %v4899_v24 = vld [vmem:[#allocation3 + $0x4] sm:$0xf0] }
  0x16   :  { %91 = vst [vmem:[#allocation1 + $0x10] ss:$2 sm:$0xff] %v5357_v15  ;;  %v4898_v27 = vld [vmem:[#allocation3 + $0x4] sm:$0xf]  ;;  %v4538_v28 = vld [vmem:[#allocation3 + $0x8] sm:$0xf0]  ;;  %v4537_v29 = vor.u32 %v4899_v24, %v4536_v23 }
  0x17   :  { %93 = vst [vmem:[#allocation1 + $0x11] ss:$2 sm:$0xff] %v5362_v16  ;;  %v4541_v30 = vor.u32 %v4898_v27, %v4538_v28  ;;  %v113_v36 = vld [vmem:[%s6374_s2] ss:$8 sm:$0x3]  ;;  %vm541_vm2 = vcmask 1043456  }
  0x18   :  { %95 = vst [vmem:[#allocation1 + $0x20] ss:$2 sm:$0xff] %v84_v21  ;;  %v115_v37 = vperm.slane %v113_v36, 0  ;;  %v5386_v38 = vperm.slane %v113_v36, 1  ;;  %vm291_vm3 = vcmask 105472   ;;  %vm348_vm4 = vcmask 97280  }
  0x19   :  { %173 = vmatpush.bf16.msra.mxu0 %v4553_v18  ;;  %191 = vmatpush.bf16.msra.mxu1 %v4557_v19  ;;  %97 = vst [vmem:[#allocation1 + $0x21] ss:$2 sm:$0xff] %v5370_v22  ;;  %vm352_vm5 = vcmask 93184   ;;  %vm413_vm6 = vcmask 1045504   ;;  %s5280_s28 = smov 63   ;;  %s5281_s29 = smov 115  }
  0x1a   :  { %s5282_s30 = smov 11   ;;  %vm719_vm7 = vcmask 89088   ;;  %s5283_s8 = smov 102   ;;  %vm808_vm8 = vcmask 212072   ;;  %vm1094_vm9 = vcmask 318672   ;;  %vm1380_vm10 = vcmask 425272  }
  0x1b   :  { %s5284_s9 = smov 50   ;;  %s5285_s10 = smov 126  }
  0x1c   :  { %v98_v31 = vld.sshfl [vmem:[#allocation1] sm:$0xff pattern:$0x75316420]  ;;  %s5286_s11 = smov 89   ;;  %s5287_s12 = smov 37  }
  0x1d   :  { %174 = vmatpush.bf16.msra.mxu0 %v4545_v25  ;;  %192 = vmatpush.bf16.msra.mxu1 %v4549_v26  ;;  %s5288_s13 = smov 113   ;;  %s5289_s14 = smov 26  }
  0x1e   :  { %v99_v32 = vld.sshfl [vmem:[#allocation1 + $0x10] sm:$0xff pattern:$0x75316420]  ;;  %s5290_s15 = smov 13   ;;  %s5291_s3 = smov 39  }
  0x1f   :  { %v104_v33 = vpack.c.bf16 %v99_v32, %v98_v31  ;;  %s5297_s17 = smov [#allocation9]  }
  0x20   :  { %v100_v34 = vld.sshfl [vmem:[#allocation1 + $0x20] sm:$0xff pattern:$0x75316420] }
  0x21   :  { %175 = vmatpush.bf16.msra.mxu0 %v4537_v29  ;;  %193 = vmatpush.bf16.msra.mxu1 %v4541_v30  ;;  %v105_v35 = vpack.c.bf16 %v100_v34, %v100_v34 }
  0x24   :  { %4558 = vmatmul.msk.bf16.vlgmr.msra.gmra.mxu0 %vm154_vm1, %v104_v33  ;;  %4560 = vmatmul.msk.bf16.vlgmr.msra.gmra.mxu1 %vm154_vm1, %v104_v33 }
  0x34   :  { %4559 = vmatmul.msk.bf16.gmra.mxu0 %vm154_vm1, %v105_v35  ;;  %4561 = vmatmul.msk.bf16.gmra.mxu1 %vm154_vm1, %v105_v35 }
  0xa1   :  { %v177_v39 = vpop.f32.mrf.mxu0  ;;  %v195_v40 = vpop.f32.mrf.mxu1 }
  0xa2   :  { %v5388_v41 = vadd.f32 %v177_v39, %v115_v37  ;;  %v5391_v42 = vadd.f32 %v195_v40, %v5386_v38 }
  0xa4   :  { %v5394_v43 = vrot.slane %v5388_v41, 4  ;;  %210 = vst [vmem:[#allocation1] ss:$2 sm:$0xff] %v5388_v41 }
  0xa6   :  { %212 = vst [vmem:[#allocation1 + $0x1] ss:$2 sm:$0xff] %v5394_v43 }
  0xa9   :  { %v179_v44 = vpop.f32.mrf.mxu0  ;;  %v5398_v45 = vpop.f32.mrf.mxu1 }
  0xaa   :  { %v5400_v46 = vadd.f32 %v179_v44, %v115_v37 }
  0xac   :  { %v5403_v47 = vrot.slane %v5400_v46, 4  ;;  %214 = vst [vmem:[#allocation1 + $0x10] ss:$2 sm:$0xff] %v5400_v46 }
  0xad   :  { %v5406_v48 = vld.sshfl [vmem:[#allocation1] sm:$0xff pattern:$0x75316420] }
  0xae   :  { %233 = vst [vmem:[#allocation1] ss:$2 sm:$0xff] %v5388_v41  ;;  %v229_v31 = vpack.c.bf16 %v5406_v48, %v5406_v48 }
  0xaf   :  { %235 = vst [vmem:[#allocation1 + $0x1] ss:$2 sm:$0xff] %v5394_v43 }
  0xb0   :  { %218 = vst [vmem:[#allocation1 + $0x20] ss:$2 sm:$0xff] %v5403_v47  ;;  %v281_v33 = vunpack.c.l.b16 %v229_v31 }
  0xb1   :  { %v182_v49 = vpop.f32.mrf.mxu0  ;;  %v200_v50 = vpop.f32.mrf.mxu1 }
  0xb2   :  { %v5411_v51 = vadd.f32 %v182_v49, %v115_v37  ;;  %v5430_v10 = vadd.f32 %v200_v50, %v5386_v38 }
  0xb3   :  { %v5413_v52 = vld.sshfl [vmem:[#allocation1 + $0x10] sm:$0xff pattern:$0x75316420] }
  0xb4   :  { %237 = vst [vmem:[#allocation1 + $0x10] ss:$2 sm:$0xff] %v5400_v46  ;;  %v209_v53 = vrot.slane %v5411_v51, 4  ;;  %v5435_v12 = vrot.slane %v5430_v10, 4  ;;  %v230_v28 = vpack.c.bf16 %v5413_v52, %v5413_v52 }
  0xb5   :  { %220 = vst [vmem:[#allocation1 + $0x21] ss:$2 sm:$0xff] %v5411_v51 }
  0xb6   :  { %v238_v54 = vld.sshfl [vmem:[#allocation1] sm:$0xff pattern:$0x75316420]  ;;  %222 = vst [vmem:[#allocation1 + $0x30] ss:$2 sm:$0xff] %v209_v53  ;;  %v549_v13 = vsel %vm541_vm2, %v5435_v12, %v5411_v51  ;;  %v282_v32 = vunpack.c.l.b16 %v230_v28 }
  0xb7   :  { %256 = vst [vmem:[#allocation1] ss:$2 sm:$0xff] %v5388_v41  ;;  %v252_v57 = vpack.c.bf16 %v238_v54, %v238_v54  ;;  %v550_v14 = vrot.slane %v549_v13, 4 }
  0xb8   :  { %258 = vst [vmem:[#allocation1 + $0x1] ss:$2 sm:$0xff] %v5394_v43  ;;  %v283_v34 = vpack.c.b16 %v282_v32, %v281_v33 }
  0xb9   :  { %v184_v55 = vpop.f32.mrf.mxu0  ;;  %v202_v56 = vpop.f32.mrf.mxu1  ;;  %v286_v62 = vunpack.c.l.b16 %v252_v57 }
  0xbb   :  { %v239_v58 = vld.sshfl [vmem:[#allocation1 + $0x10] sm:$0xff pattern:$0x75316420] }
  0xbc   :  { %260 = vst [vmem:[#allocation1 + $0x10] ss:$2 sm:$0xff] %v5400_v46  ;;  %v223_v59 = vld.sshfl [vmem:[#allocation1 + $0x20] sm:$0xff pattern:$0x75316420]  ;;  %v253_v60 = vpack.c.bf16 %v239_v58, %v239_v58 }
  0xbd   :  { %241 = vst [vmem:[#allocation1 + $0x20] ss:$2 sm:$0xff] %v5403_v47  ;;  %v224_v61 = vld.sshfl [vmem:[#allocation1 + $0x30] sm:$0xff pattern:$0x75316420]  ;;  %v231_v39 = vpack.c.bf16 %v223_v59, %v223_v59 }
  0xbe   :  { %243 = vst [vmem:[#allocation1 + $0x21] ss:$2 sm:$0xff] %v5411_v51  ;;  %v287_v63 = vunpack.c.l.b16 %v253_v60  ;;  %v232_v35 = vpack.c.bf16 %v224_v61, %v224_v61 }
  0xbf   :  { %245 = vst [vmem:[#allocation1 + $0x30] ss:$2 sm:$0xff] %v209_v53  ;;  %v314_v44 = vunpack.c.l.b16 %v231_v39 }
  0xc0   :  { %v288_v0 = vpack.c.b16 %v287_v63, %v286_v62  ;;  %v315_v40 = vunpack.c.l.b16 %v232_v35 }
  0xc2   :  { %289 = vrot.lane.b32.xlu0 %v288_v0, %s5278_s26  ;;  %v316_v49 = vpack.c.b16 %v315_v40, %v314_v44 }
  0xc5   :  { %v246_v1 = vld.sshfl [vmem:[#allocation1 + $0x20] sm:$0xff pattern:$0x75316420] }
  0xc6   :  { %264 = vst [vmem:[#allocation1 + $0x20] ss:$2 sm:$0xff] %v5403_v47  ;;  %v247_v2 = vld.sshfl [vmem:[#allocation1 + $0x30] sm:$0xff pattern:$0x75316420]  ;;  %v254_v3 = vpack.c.bf16 %v246_v1, %v246_v1 }
  0xc7   :  { %266 = vst [vmem:[#allocation1 + $0x21] ss:$2 sm:$0xff] %v5411_v51  ;;  %v255_v4 = vpack.c.bf16 %v247_v2, %v247_v2 }
  0xc8   :  { %268 = vst [vmem:[#allocation1 + $0x30] ss:$2 sm:$0xff] %v209_v53  ;;  %v319_v5 = vunpack.c.l.b16 %v254_v3 }
  0xc9   :  { %v320_v6 = vunpack.c.l.b16 %v255_v4 }
  0xcb   :  { %v321_v7 = vpack.c.b16 %v320_v6, %v319_v5 }
  0xcd   :  { %322 = vrot.lane.b32.xlu0 %v321_v7, %s5278_s26 }
  0xcf   :  { %v5427_v8 = vld.sshfl [vmem:[#allocation1 + $0x30] sm:$0xff pattern:$0x75316420] }
  0xd0   :  { %501 = vst [vmem:[#allocation1 + $0x30] ss:$2 sm:$0xff] %v209_v53 }
  0xd7   :  { %v5432_v11 = vld.sshfl [vmem:[#allocation1 + $0x30] sm:$0xff pattern:$0x75316420] }
  0xd8   :  { %524 = vst [vmem:[#allocation1 + $0x30] ss:$2 sm:$0xff] %v209_v53 }
  0xdf   :  { %v5440_v18 = vld.sshfl [vmem:[#allocation1 + $0x30] sm:$0xff pattern:$0x75316420] }
  0xe0   :  { %565 = vst [vmem:[#allocation1 + $0x30] ss:$2 sm:$0xff] %v550_v14 }
  0xe7   :  { %v5442_v19 = vld.sshfl [vmem:[#allocation1 + $0x30] sm:$0xff pattern:$0x75316420]  ;;  %v5444_v20 = vld.sshfl [vmem:[#allocation1 + $0x38] sm:$0xff pattern:$0x75316420] }
  0xe8   :  { %824 = vst [vmem:[#allocation1 + $0x30] ss:$2 sm:$0xff] %v209_v53 }
  0xef   :  { %v5446_v23 = vld.sshfl [vmem:[#allocation1 + $0x30] sm:$0xff pattern:$0x75316420] }
  0xf0   :  { %847 = vst [vmem:[#allocation1 + $0x30] ss:$2 sm:$0xff] %v209_v53 }
  0xf7   :  { %v5448_v24 = vld.sshfl [vmem:[#allocation1 + $0x30] sm:$0xff pattern:$0x75316420] }
  0xf8   :  { %870 = vst [vmem:[#allocation1 + $0x30] ss:$2 sm:$0xff] %v5435_v12 }
  0xff   :  { %v5451_v25 = vld.sshfl [vmem:[#allocation1 + $0x30] sm:$0xff pattern:$0x75316420] }
 0x100   :  { %1110 = vst [vmem:[#allocation1 + $0x30] ss:$2 sm:$0xff] %v209_v53 }
 0x107   :  { %v5453_v26 = vld.sshfl [vmem:[#allocation1 + $0x30] sm:$0xff pattern:$0x75316420] }
 0x108   :  { %1133 = vst [vmem:[#allocation1 + $0x30] ss:$2 sm:$0xff] %v209_v53 }
 0x10f   :  { %v5455_v27 = vld.sshfl [vmem:[#allocation1 + $0x30] sm:$0xff pattern:$0x75316420] }
 0x110   :  { %1156 = vst [vmem:[#allocation1 + $0x30] ss:$2 sm:$0xff] %v5435_v12 }
 0x134   :  { %v290_v29 = vpop.permute.xlu0 %289 }
 0x135   :  { %v296_v30 = vsel %vm291_vm3, %v290_v29, 0 }
 0x136   :  { %305 = vmatpush.bf16.xpose.msra.mxu2 %v296_v30 }
 0x13d   :  { %4562 = vmatmul.msk.bf16.vlgmr.msra.gmra.mxu2 %vm291_vm3, %v283_v34 }
 0x13f   :  { %v323_v36 = vpop.permute.xlu0 %322 }
 0x140   :  { %v328_v37 = vsel %vm291_vm3, %v323_v36, 0  ;;  %v262_v36 = vld.sshfl [vmem:[#allocation1 + $0x10] sm:$0xff pattern:$0x75316420] }
 0x141   :  { %337 = vmatpush.bf16.xpose.msra.mxu3 %v328_v37  ;;  %v261_v37 = vld.sshfl [vmem:[#allocation1] sm:$0xff pattern:$0x75316420]  ;;  %v276_v39 = vpack.c.bf16 %v262_v36, %v262_v36 }
 0x142   :  { %v275_v40 = vpack.c.bf16 %v261_v37, %v261_v37 }
 0x143   :  { %v406_v44 = vunpack.c.l.b16 %v276_v39 }
 0x148   :  { %4563 = vmatmul.msk.bf16.vlgmr.msra.gmra.mxu3 %vm291_vm3, %v316_v49  ;;  %v405_v49 = vunpack.c.l.b16 %v275_v40 }
 0x1c0   :  { %v307_v50 = vpop.f32.mrf.mxu2 }
 0x1c1   :  { %v344_v48 = vmul.f32 0.2773501, %v307_v50  ;;  %v269_v50 = vld.sshfl [vmem:[#allocation1 + $0x20] sm:$0xff pattern:$0x75316420] }
 0x1c3   :  { %v349_v52 = vsel %vm348_vm4, %v344_v48, -inf }
 0x1c4   :  { %350 = vmax.xlane.f32.xlu1 %v349_v52  ;;  %v278_v52 = vpack.c.bf16 %v5427_v8, %v5427_v8 }
 0x1c8   :  { %v309_v53 = vpop.f32.mrf.mxu2 }
 0x1c9   :  { %v345_v54 = vmul.f32 0.2773501, %v309_v53  ;;  %v277_v53 = vpack.c.bf16 %v269_v50, %v269_v50 }
 0x1cb   :  { %v339_v55 = vpop.f32.mrf.mxu3  ;;  %v353_v56 = vsel %vm352_vm5, %v345_v54, -inf }
 0x1cc   :  { %v346_v57 = vmul.f32 0.2773501, %v339_v55  ;;  %354 = vmax.xlane.f32.xlu1 %v353_v56  ;;  %v438_v55 = vunpack.c.l.b16 %v277_v53 }
 0x1ce   :  { %v356_v58 = vsel %vm348_vm4, %v346_v57, -inf }
 0x1cf   :  { %357 = vmax.xlane.f32.xlu2 %v356_v58 }
 0x1d3   :  { %v341_v59 = vpop.f32.mrf.mxu3 }
 0x1d4   :  { %v347_v60 = vmul.f32 0.2773501, %v341_v59 }
 0x1d6   :  { %v359_v61 = vsel %vm352_vm5, %v347_v60, -inf }
 0x1d7   :  { %360 = vmax.xlane.f32.xlu2 %v359_v61 }
 0x237   :  { %v351_v62 = vpop.xlane.xlu1 %350 }
 0x238   :  { %v362_v63 = vsub.f32 %v344_v48, %v351_v62  ;;  %v407_v48 = vpack.c.b16 %v406_v44, %v405_v49 }
 0x23a   :  { %v366_v0 = vmul.f32 1.442695, %v362_v63 }
 0x23c   :  { %5009 = vpow2.f32 %v366_v0 }
 0x23f   :  { %v355_v1 = vpop.xlane.xlu1 %354 }
 0x240   :  { %v363_v2 = vsub.f32 %v345_v54, %v355_v1  ;;  %v439_v54 = vunpack.c.l.b16 %v278_v52 }
 0x242   :  { %v5010_v3 = vpop.eup %5009  ;;  %v368_v4 = vmul.f32 1.442695, %v363_v2  ;;  %v358_v5 = vpop.xlane.xlu2 %357  ;;  %v440_v56 = vpack.c.b16 %v439_v54, %v438_v55 }
 0x243   :  { %v364_v6 = vsub.f32 %v346_v57, %v358_v5  ;;  %v374_v7 = vsel %vm348_vm4, %v5010_v3, 0.0 }
 0x244   :  { %5011 = vpow2.f32 %v368_v4  ;;  %375 = vadd.xlane.f32.xlu0 %v374_v7 }
 0x245   :  { %v370_v13 = vmul.f32 1.442695, %v364_v6 }
 0x247   :  { %5013 = vpow2.f32 %v370_v13 }
 0x24a   :  { %v5012_v14 = vpop.eup %5011  ;;  %v361_v28 = vpop.xlane.xlu2 %360 }
 0x24b   :  { %v365_v29 = vsub.f32 %v347_v60, %v361_v28  ;;  %v377_v30 = vsel %vm352_vm5, %v5012_v14, 0.0 }
 0x24c   :  { %378 = vadd.xlane.f32.xlu1 %v377_v30 }
 0x24d   :  { %v5014_v31 = vpop.eup %5013  ;;  %v372_v32 = vmul.f32 1.442695, %v365_v29 }
 0x24e   :  { %v380_v33 = vsel %vm348_vm4, %v5014_v31, 0.0 }
 0x24f   :  { %5015 = vpow2.f32 %v372_v32  ;;  %381 = vadd.xlane.f32.xlu2 %v380_v33 }
 0x255   :  { %v5016_v34 = vpop.eup %5015 }
 0x256   :  { %v383_v35 = vsel %vm352_vm5, %v5016_v34, 0.0 }
 0x257   :  { %384 = vadd.xlane.f32.xlu1 %v383_v35 }
 0x267   :  { %408 = vrot.lane.b32.xlu2 %v407_v48, %s5279_s27 }
 0x270   :  { %441 = vrot.lane.b32.xlu1 %v440_v56, %s5279_s27 }
 0x2b7   :  { %v376_v57 = vpop.xlane.xlu0 %375 }
 0x2b8   :  { %5017 = vrcp.f32 %v376_v57 }
 0x2be   :  { %v5018_v59 = vpop.eup %5017 }
 0x2bf   :  { %v379_v58 = vpop.xlane.xlu1 %378  ;;  %v390_v61 = vmul.f32 %v5018_v59, %v5010_v3 }
 0x2c0   :  { %5019 = vrcp.f32 %v379_v58  ;;  %v5500_v58 = vadd.f32 %v5398_v45, %v5386_v38 }
 0x2c1   :  { %v394_v63 = vpack.c.bf16 %v390_v61, %v390_v61 }
 0x2c2   :  { %v382_v60 = vpop.xlane.xlu2 %381  ;;  %v5505_v61 = vrot.slane %v5500_v58, 4 }
 0x2c3   :  { %v400_v2 = vunpack.c.l.b16 %v394_v63 }
 0x2c4   :  { %v545_v63 = vsel %vm541_vm2, %v5400_v46, %v5505_v61 }
 0x2c6   :  { %v5020_v62 = vpop.eup %5019 }
 0x2c7   :  { %v391_v0 = vmul.f32 %v5020_v62, %v5012_v14 }
 0x2c9   :  { %v395_v8 = vpack.c.bf16 %v391_v0, %v391_v0  ;;  %v511_v0 = vpack.c.bf16 %v5432_v11, %v5432_v11 }
 0x2ca   :  { %v409_v1 = vpop.permute.xlu2 %408  ;;  %v385_v6 = vpop.xlane.xlu1 %384 }
 0x2cb   :  { %v401_v4 = vunpack.c.l.b16 %v395_v8  ;;  %v415_v5 = vsel %vm413_vm6, %v409_v1, 0  ;;  %5021 = vrcp.f32 %v385_v6 }
 0x2cc   :  { %424 = vmatpush.bf16.msrb.mxu2 %v415_v5  ;;  %5023 = vrcp.f32 %v382_v60 }
 0x2cd   :  { %v402_v7 = vpack.c.b16 %v401_v4, %v400_v2 }
 0x2cf   :  { %4564 = vmatmul.msk.bf16.vlgmr.msrb.gmra.mxu2 %vm348_vm4, %v402_v7 }
 0x2d1   :  { %v5022_v13 = vpop.eup %5021 }
 0x2d2   :  { %v5024_v28 = vpop.eup %5023  ;;  %v393_v3 = vmul.f32 %v5022_v13, %v5016_v34  ;;  %v5487_v34 = vrot.slane %v5391_v42, 4 }
 0x2d3   :  { %v392_v29 = vmul.f32 %v5024_v28, %v5014_v31 }
 0x2d4   :  { %v397_v30 = vpack.c.bf16 %v393_v3, %v393_v3  ;;  %v543_v48 = vsel %vm541_vm2, %v5487_v34, %v5388_v41  ;;  %v542_v53 = vsel %vm541_vm2, %v5388_v41, %v5487_v34  ;;  %v619_v3 = vunpack.c.l.b16 %v511_v0 }
 0x2d5   :  { %v396_v14 = vpack.c.bf16 %v392_v29, %v392_v29  ;;  %v544_v54 = vrot.slane %v543_v48, 4  ;;  %v546_v29 = vsel %vm541_vm2, %v5505_v61, %v5400_v46 }
 0x2d6   :  { %v434_v32 = vunpack.c.l.b16 %v397_v30 }
 0x2d7   :  { %v433_v36 = vunpack.c.l.b16 %v396_v14 }
 0x2d9   :  { %v435_v37 = vpack.c.b16 %v434_v32, %v433_v36 }
 0x2e2   :  { %v442_v33 = vpop.permute.xlu1 %441 }
 0x2e3   :  { %v447_v35 = vsel %vm413_vm6, %v442_v33, 0 }
 0x2e4   :  { %456 = vmatpush.bf16.msrb.mxu3 %v447_v35 }
 0x2e7   :  { %4565 = vmatmul.msk.bf16.vlgmr.msrb.gmra.mxu3 %vm348_vm4, %v435_v37  ;;  %v547_v37 = vrot.slane %v546_v29, 4 }
 0x352   :  { %v426_v39 = vpop.f32.mrf.mxu2 }
 0x353   :  { %v467_v40 = vrot.slane %v426_v39, 4  ;;  %469 = vst [vmem:[#allocation1] ss:$2 sm:$0xff] %v426_v39 }
 0x355   :  { %471 = vst [vmem:[#allocation1 + $0x1] ss:$2 sm:$0xff] %v467_v40  ;;  %v534_v40 = vpack.c.bf16 %v5440_v18, %v5440_v18 }
 0x35a   :  { %v428_v44 = vpop.f32.mrf.mxu2 }
 0x35b   :  { %473 = vst [vmem:[#allocation1 + $0x10] ss:$2 sm:$0xff] %v428_v44 }
 0x35c   :  { %v480_v49 = vld.sshfl [vmem:[#allocation1] sm:$0xff pattern:$0x75316420] }
 0x35d   :  { %489 = vst [vmem:[#allocation1] ss:$2 sm:$0xff] %v5388_v41 }
 0x35e   :  { %491 = vst [vmem:[#allocation1 + $0x1] ss:$2 sm:$0xff] %v5394_v43 }
 0x35f   :  { %486 = vst.msk [vmem:[#allocation2] sm:$0xff] %vm291_vm3, %v480_v49 }
 0x365   :  { %v494_v31 = vld.sshfl [vmem:[#allocation1] sm:$0xff pattern:$0x75316420] }
 0x366   :  { %512 = vst [vmem:[#allocation1] ss:$2 sm:$0xff] %v5388_v41  ;;  %v508_v11 = vpack.c.bf16 %v494_v31, %v494_v31  ;;  %v548_v31 = vsel %vm541_vm2, %v5411_v51, %v5435_v12 }
 0x367   :  { %514 = vst [vmem:[#allocation1 + $0x1] ss:$2 sm:$0xff] %v5394_v43 }
 0x368   :  { %v584_v39 = vunpack.c.l.b16 %v508_v11 }
 0x36a   :  { %v458_v50 = vpop.f32.mrf.mxu3 }
 0x36b   :  { %v468_v52 = vrot.slane %v458_v50, 4  ;;  %475 = vst [vmem:[#allocation1 + $0x11] ss:$2 sm:$0xff] %v458_v50 }
 0x36d   :  { %477 = vst [vmem:[#allocation1 + $0x20] ss:$2 sm:$0xff] %v468_v52 }
 0x36e   :  { %v517_v55 = vld.sshfl [vmem:[#allocation1] sm:$0xff pattern:$0x75316420] }
 0x36f   :  { %551 = vst [vmem:[#allocation1] ss:$2 sm:$0xff] %v542_v53  ;;  %v531_v62 = vpack.c.bf16 %v517_v55, %v517_v55  ;;  %v626_v55 = vunpack.c.l.b16 %v534_v40 }
 0x370   :  { %553 = vst [vmem:[#allocation1 + $0x1] ss:$2 sm:$0xff] %v544_v54 }
 0x371   :  { %v591_v2 = vunpack.c.l.b16 %v531_v62 }
 0x372   :  { %v481_v56 = vld.sshfl [vmem:[#allocation1 + $0x10] sm:$0xff pattern:$0x75316420]  ;;  %v460_v57 = vpop.f32.mrf.mxu3 }
 0x373   :  { %493 = vst [vmem:[#allocation1 + $0x10] ss:$2 sm:$0xff] %v5400_v46 }
 0x374   :  { %487 = vst.msk [vmem:[#allocation2 + $0x8] sm:$0xff] %vm291_vm3, %v481_v56 }
 0x375   :  { %479 = vst [vmem:[#allocation1 + $0x21] ss:$2 sm:$0xff] %v460_v57 }
 0x377   :  { %v556_v8 = vld.sshfl [vmem:[#allocation1] sm:$0xff pattern:$0x75316420]  ;;  %v557_v5 = vld.sshfl [vmem:[#allocation1 + $0x8] sm:$0xff pattern:$0x75316420] }
 0x378   :  { %v578_v30 = vpack.c.bf16 %v557_v5, %v556_v8 }
 0x37a   :  { %v495_v59 = vld.sshfl [vmem:[#allocation1 + $0x10] sm:$0xff pattern:$0x75316420]  ;;  %v710_v44 = vunpack.c.h.b16 %v578_v30 }
 0x37b   :  { %516 = vst [vmem:[#allocation1 + $0x10] ss:$2 sm:$0xff] %v5400_v46  ;;  %v509_v13 = vpack.c.bf16 %v495_v59, %v495_v59 }
 0x37c   :  { %v482_v60 = vld.sshfl [vmem:[#allocation1 + $0x20] sm:$0xff pattern:$0x75316420] }
 0x37d   :  { %497 = vst [vmem:[#allocation1 + $0x20] ss:$2 sm:$0xff] %v5403_v47  ;;  %v585_v35 = vunpack.c.l.b16 %v509_v13 }
 0x37e   :  { %499 = vst [vmem:[#allocation1 + $0x21] ss:$2 sm:$0xff] %v5411_v51 }
 0x37f   :  { %488 = vst.msk [vmem:[#allocation2 + $0x10] sm:$0xff] %vm291_vm3, %v482_v60  ;;  %v586_v48 = vpack.c.b16 %v585_v35, %v584_v39 }
 0x382   :  { %v518_v38 = vld.sshfl [vmem:[#allocation1 + $0x10] sm:$0xff pattern:$0x75316420] }
 0x383   :  { %555 = vst [vmem:[#allocation1 + $0x10] ss:$2 sm:$0xff] %v545_v63  ;;  %v532_v45 = vpack.c.bf16 %v518_v38, %v518_v38 }
 0x385   :  { %v502_v1 = vld.sshfl [vmem:[#allocation1 + $0x20] sm:$0xff pattern:$0x75316420]  ;;  %v592_v4 = vunpack.c.l.b16 %v532_v45 }
 0x386   :  { %520 = vst [vmem:[#allocation1 + $0x20] ss:$2 sm:$0xff] %v5403_v47  ;;  %v510_v6 = vpack.c.bf16 %v502_v1, %v502_v1 }
 0x387   :  { %522 = vst [vmem:[#allocation1 + $0x21] ss:$2 sm:$0xff] %v5411_v51  ;;  %v593_v7 = vpack.c.b16 %v592_v4, %v591_v2 }
 0x388   :  { %v618_v28 = vunpack.c.l.b16 %v510_v6 }
 0x389   :  { %594 = vrot.lane.b32.xlu2 %v593_v7, %s5280_s28 }
 0x38a   :  { %v558_v14 = vld.sshfl [vmem:[#allocation1 + $0x10] sm:$0xff pattern:$0x75316420]  ;;  %v559_v32 = vld.sshfl [vmem:[#allocation1 + $0x18] sm:$0xff pattern:$0x75316420]  ;;  %v620_v33 = vpack.c.b16 %v619_v3, %v618_v28  ;;  %v709_v3 = vunpack.c.l.b16 %v578_v30 }
 0x38b   :  { %v579_v36 = vpack.c.bf16 %v559_v32, %v558_v14 }
 0x38c   :  { %621 = vrot.lane.b32.xlu0 %v620_v33, %s5281_s29 }
 0x38d   :  { %v712_v49 = vunpack.c.h.b16 %v579_v36  ;;  %v711_v28 = vunpack.c.l.b16 %v579_v36 }
 0x38e   :  { %v525_v50 = vld.sshfl [vmem:[#allocation1 + $0x20] sm:$0xff pattern:$0x75316420] }
 0x38f   :  { %561 = vst [vmem:[#allocation1 + $0x20] ss:$2 sm:$0xff] %v547_v37  ;;  %v533_v52 = vpack.c.bf16 %v525_v50, %v525_v50  ;;  %v5526_v53 = vpack.c.b16 %v712_v49, %v710_v44  ;;  %v713_v29 = vpack.c.b16 %v711_v28, %v709_v3 }
 0x390   :  { %563 = vst [vmem:[#allocation1 + $0x21] ss:$2 sm:$0xff] %v548_v31 }
 0x391   :  { %587 = vrot.lane.b32.xlu2 %v586_v48, %s5281_s29  ;;  %v625_v54 = vunpack.c.l.b16 %v533_v52  ;;  %v581_v52 = vpack.c.bf16 %v5444_v20, %v5442_v19 }
 0x393   :  { %v627_v56 = vpack.c.b16 %v626_v55, %v625_v54  ;;  %v750_v20 = vunpack.c.l.b16 %v581_v52 }
 0x395   :  { %628 = vrot.lane.b32.xlu1 %v627_v56, %s5280_s28  ;;  %v751_v56 = vunpack.c.h.b16 %v581_v52 }
 0x397   :  { %v566_v30 = vld.sshfl [vmem:[#allocation1 + $0x20] sm:$0xff pattern:$0x75316420]  ;;  %v567_v49 = vld.sshfl [vmem:[#allocation1 + $0x28] sm:$0xff pattern:$0x75316420] }
 0x398   :  { %v580_v50 = vpack.c.bf16 %v567_v49, %v566_v30 }
 0x39a   :  { %v749_v55 = vunpack.c.h.b16 %v580_v50  ;;  %v748_v19 = vunpack.c.l.b16 %v580_v50 }
 0x3e3   :  { %v595_v18 = vpop.permute.xlu2 %594 }
 0x3e4   :  { %v600_v57 = vsel %vm291_vm3, %v595_v18, 0  ;;  %v753_v18 = vpack.c.b16 %v751_v56, %v749_v55 }
 0x3e5   :  { %609 = vmatpush.bf16.xpose.msra.mxu2 %v600_v57 }
 0x3eb   :  { %v588_v59 = vpop.permute.xlu2 %587 }
 0x3ec   :  { %4566 = vmatmul.msk.bf16.vlgmr.msra.gmra.mxu2 %vm291_vm3, %v588_v59 }
 0x3fe   :  { %v622_v62 = vpop.permute.xlu0 %621 }
 0x407   :  { %v629_v12 = vpop.permute.xlu1 %628 }
 0x408   :  { %v634_v60 = vsel %vm291_vm3, %v629_v12, 0 }
 0x409   :  { %643 = vmatpush.bf16.xpose.msra.mxu3 %v634_v60 }
 0x410   :  { %4567 = vmatmul.msk.bf16.vlgmr.msra.gmra.mxu3 %vm291_vm3, %v622_v62 }
 0x46f   :  { %v611_v63 = vpop.f32.mrf.mxu2 }
 0x470   :  { %v650_v38 = vmul.f32 0.2773501, %v611_v63 }
 0x472   :  { %v654_v45 = vsel %vm348_vm4, %v650_v38, -inf }
 0x473   :  { %655 = vmax.xlane.f32.xlu2 %v654_v45  ;;  %v752_v45 = vpack.c.b16 %v750_v20, %v748_v19 }
 0x477   :  { %v613_v0 = vpop.f32.mrf.mxu2 }
 0x478   :  { %v651_v8 = vmul.f32 0.2773501, %v613_v0 }
 0x47a   :  { %v657_v1 = vsel %vm352_vm5, %v651_v8, -inf }
 0x47b   :  { %658 = vmax.xlane.f32.xlu1 %v657_v1 }
 0x493   :  { %v645_v2 = vpop.f32.mrf.mxu3 }
 0x494   :  { %v652_v4 = vmul.f32 0.2773501, %v645_v2 }
 0x496   :  { %v660_v5 = vsel %vm348_vm4, %v652_v4, -inf }
 0x497   :  { %661 = vmax.xlane.f32.xlu0 %v660_v5 }
 0x49b   :  { %v647_v6 = vpop.f32.mrf.mxu3 }
 0x49c   :  { %v653_v7 = vmul.f32 0.2773501, %v647_v6 }
 0x49e   :  { %v663_v13 = vsel %vm352_vm5, %v653_v7, -inf }
 0x49f   :  { %664 = vmax.xlane.f32.xlu2 %v663_v13 }
 0x4b7   :  { %715 = vrot.lane.b32.xlu2 %v713_v29, %s5282_s30 }
 0x4e6   :  { %v656_v11 = vpop.xlane.xlu2 %655 }
 0x4e7   :  { %v666_v14 = vsub.f32 %v650_v38, %v656_v11 }
 0x4e9   :  { %v670_v32 = vmul.f32 1.442695, %v666_v14 }
 0x4eb   :  { %5025 = vpow2.f32 %v670_v32 }
 0x4ee   :  { %v659_v33 = vpop.xlane.xlu1 %658 }
 0x4ef   :  { %v667_v35 = vsub.f32 %v651_v8, %v659_v33 }
 0x4f1   :  { %v5026_v37 = vpop.eup %5025  ;;  %v672_v39 = vmul.f32 1.442695, %v667_v35 }
 0x4f2   :  { %v678_v40 = vsel %vm348_vm4, %v5026_v37, 0.0 }
 0x4f3   :  { %5027 = vpow2.f32 %v672_v39  ;;  %679 = vadd.xlane.f32.xlu1 %v678_v40 }
 0x4f9   :  { %v5028_v44 = vpop.eup %5027 }
 0x4fa   :  { %v681_v36 = vsel %vm352_vm5, %v5028_v44, 0.0 }
 0x4fb   :  { %682 = vadd.xlane.f32.xlu2 %v681_v36 }
 0x50a   :  { %v662_v31 = vpop.xlane.xlu0 %661 }
 0x50b   :  { %v668_v48 = vsub.f32 %v652_v4, %v662_v31 }
 0x50d   :  { %v674_v54 = vmul.f32 1.442695, %v668_v48 }
 0x50f   :  { %5029 = vpow2.f32 %v674_v54 }
 0x512   :  { %v665_v57 = vpop.xlane.xlu2 %664 }
 0x513   :  { %v669_v59 = vsub.f32 %v653_v7, %v665_v57  ;;  %756 = vrot.lane.b32.xlu2 %v753_v18, %s5282_s30 }
 0x515   :  { %v5030_v12 = vpop.eup %5029  ;;  %v676_v60 = vmul.f32 1.442695, %v669_v59 }
 0x516   :  { %v684_v62 = vsel %vm348_vm4, %v5030_v12, 0.0 }
 0x517   :  { %5031 = vpow2.f32 %v676_v60  ;;  %685 = vadd.xlane.f32.xlu1 %v684_v62 }
 0x51a   :  { %v716_v0 = vpop.permute.xlu2 %715 }
 0x51d   :  { %v5032_v63 = vpop.eup %5031 }
 0x51e   :  { %v687_v38 = vsel %vm352_vm5, %v5032_v63, 0.0 }
 0x51f   :  { %688 = vadd.xlane.f32.xlu0 %v687_v38 }
 0x530   :  { %717 = vrot.lane.b32.xlu1 %v5526_v53, %s5282_s30 }
 0x533   :  { %754 = vrot.lane.b32.xlu0 %v752_v45, %s5282_s30 }
 0x566   :  { %v680_v8 = vpop.xlane.xlu1 %679 }
 0x56e   :  { %v683_v1 = vpop.xlane.xlu2 %682 }
 0x56f   :  { %5033 = vrcp.f32 %v683_v1 }
 0x570   :  { %5035 = vrcp.f32 %v680_v8 }
 0x575   :  { %v5034_v5 = vpop.eup %5033 }
 0x576   :  { %v5036_v6 = vpop.eup %5035  ;;  %v695_v13 = vmul.f32 %v5034_v5, %v5028_v44  ;;  %v757_v49 = vpop.permute.xlu2 %756 }
 0x577   :  { %v694_v3 = vmul.f32 %v5036_v6, %v5026_v37 }
 0x578   :  { %v699_v53 = vpack.c.bf16 %v695_v13, %v695_v13 }
 0x579   :  { %v698_v14 = vpack.c.bf16 %v694_v3, %v694_v3 }
 0x57a   :  { %v705_v33 = vunpack.c.l.b16 %v699_v53  ;;  %v857_v53 = vpack.c.bf16 %v5448_v24, %v5448_v24 }
 0x57b   :  { %v704_v36 = vunpack.c.l.b16 %v698_v14  ;;  %v834_v14 = vpack.c.bf16 %v5446_v23, %v5446_v23 }
 0x57d   :  { %v706_v44 = vpack.c.b16 %v705_v33, %v704_v36 }
 0x58a   :  { %v686_v4 = vpop.xlane.xlu1 %685 }
 0x592   :  { %v689_v2 = vpop.xlane.xlu0 %688 }
 0x593   :  { %5037 = vrcp.f32 %v689_v2 }
 0x594   :  { %5039 = vrcp.f32 %v686_v4 }
 0x599   :  { %v5038_v7 = vpop.eup %5037 }
 0x59a   :  { %v5040_v28 = vpop.eup %5039  ;;  %v697_v29 = vmul.f32 %v5038_v7, %v5032_v63 }
 0x59b   :  { %v696_v11 = vmul.f32 %v5040_v28, %v5030_v12 }
 0x59c   :  { %v701_v32 = vpack.c.bf16 %v697_v29, %v697_v29 }
 0x59d   :  { %v700_v39 = vpack.c.bf16 %v696_v11, %v696_v11 }
 0x59e   :  { %v744_v50 = vunpack.c.l.b16 %v701_v32 }
 0x59f   :  { %v743_v48 = vunpack.c.l.b16 %v700_v39  ;;  %v925_v39 = vunpack.c.l.b16 %v857_v53 }
 0x5a1   :  { %v745_v54 = vpack.c.b16 %v744_v50, %v743_v48 }
 0x5a2   :  { %v718_v35 = vpop.permute.xlu1 %717 }
 0x5a3   :  { %v720_v40 = vsel %vm719_vm7, %v716_v0, %v718_v35 }
 0x5a4   :  { %v725_v30 = vsel %vm413_vm6, %v720_v40, 0  ;;  %v918_v40 = vunpack.c.l.b16 %v834_v14 }
 0x5a5   :  { %v755_v31 = vpop.permute.xlu0 %754  ;;  %734 = vmatpush.bf16.msrb.mxu0 %v725_v30 }
 0x5a6   :  { %v758_v37 = vsel %vm719_vm7, %v755_v31, %v757_v49 }
 0x5a7   :  { %v763_v52 = vsel %vm413_vm6, %v758_v37, 0 }
 0x5a8   :  { %4568 = vmatmul.msk.bf16.vlgmr.msrb.gmra.mxu0 %vm348_vm4, %v706_v44  ;;  %772 = vmatpush.bf16.msrb.mxu1 %v763_v52 }
 0x5ab   :  { %4569 = vmatmul.msk.bf16.vlgmr.msrb.gmra.mxu1 %vm348_vm4, %v745_v54 }
 0x625   :  { %v736_v55 = vpop.f32.mrf.mxu0 }
 0x626   :  { %v783_v56 = vrot.slane %v736_v55, 4  ;;  %785 = vst [vmem:[#allocation1] ss:$2 sm:$0xff] %v736_v55 }
 0x628   :  { %787 = vst [vmem:[#allocation1 + $0x1] ss:$2 sm:$0xff] %v783_v56  ;;  %v774_v18 = vpop.f32.mrf.mxu1 }
 0x629   :  { %v784_v57 = vrot.slane %v774_v18, 4  ;;  %791 = vst [vmem:[#allocation1 + $0x11] ss:$2 sm:$0xff] %v774_v18 }
 0x62b   :  { %793 = vst [vmem:[#allocation1 + $0x20] ss:$2 sm:$0xff] %v784_v57 }
 0x62d   :  { %v738_v59 = vpop.f32.mrf.mxu0 }
 0x62e   :  { %789 = vst [vmem:[#allocation1 + $0x10] ss:$2 sm:$0xff] %v738_v59 }
 0x62f   :  { %v5555_v12 = vld.sshfl [vmem:[#allocation1] sm:$0xff pattern:$0x75316420] }
 0x630   :  { %812 = vst [vmem:[#allocation1] ss:$2 sm:$0xff] %v5388_v41  ;;  %v776_v60 = vpop.f32.mrf.mxu1 }
 0x631   :  { %814 = vst [vmem:[#allocation1 + $0x1] ss:$2 sm:$0xff] %v5394_v43 }
 0x632   :  { %795 = vst [vmem:[#allocation1 + $0x21] ss:$2 sm:$0xff] %v776_v60 }
 0x635   :  { %v5559_v62 = vld.sshfl [vmem:[#allocation1 + $0x10] sm:$0xff pattern:$0x75316420] }
 0x636   :  { %816 = vst [vmem:[#allocation1 + $0x10] ss:$2 sm:$0xff] %v5400_v46 }
 0x638   :  { %v817_v63 = vld.sshfl [vmem:[#allocation1] sm:$0xff pattern:$0x75316420] }
 0x639   :  { %835 = vst [vmem:[#allocation1] ss:$2 sm:$0xff] %v5388_v41  ;;  %v5563_v38 = vld.sshfl [vmem:[#allocation1 + $0x20] sm:$0xff pattern:$0x75316420]  ;;  %v831_v19 = vpack.c.bf16 %v817_v63, %v817_v63 }
 0x63a   :  { %837 = vst [vmem:[#allocation1 + $0x1] ss:$2 sm:$0xff] %v5394_v43 }
 0x63b   :  { %820 = vst [vmem:[#allocation1 + $0x20] ss:$2 sm:$0xff] %v5403_v47  ;;  %v883_v0 = vunpack.c.l.b16 %v831_v19 }
 0x63c   :  { %822 = vst [vmem:[#allocation1 + $0x21] ss:$2 sm:$0xff] %v5411_v51 }
 0x63d   :  { %v818_v20 = vld.sshfl [vmem:[#allocation1 + $0x10] sm:$0xff pattern:$0x75316420] }
 0x63e   :  { %839 = vst [vmem:[#allocation1 + $0x10] ss:$2 sm:$0xff] %v5400_v46  ;;  %v832_v45 = vpack.c.bf16 %v818_v20, %v818_v20 }
 0x640   :  { %v884_v8 = vunpack.c.l.b16 %v832_v45 }
 0x641   :  { %v840_v1 = vld.sshfl [vmem:[#allocation1] sm:$0xff pattern:$0x75316420] }
 0x642   :  { %858 = vst [vmem:[#allocation1] ss:$2 sm:$0xff] %v5391_v42  ;;  %v885_v2 = vpack.c.b16 %v884_v8, %v883_v0  ;;  %v854_v5 = vpack.c.bf16 %v840_v1, %v840_v1 }
 0x643   :  { %860 = vst [vmem:[#allocation1 + $0x1] ss:$2 sm:$0xff] %v5487_v34  ;;  %v825_v4 = vld.sshfl [vmem:[#allocation1 + $0x20] sm:$0xff pattern:$0x75316420] }
 0x644   :  { %843 = vst [vmem:[#allocation1 + $0x20] ss:$2 sm:$0xff] %v5403_v47  ;;  %886 = vrot.lane.b32.xlu1 %v885_v2, %s5283_s8  ;;  %v890_v13 = vunpack.c.l.b16 %v854_v5  ;;  %v833_v29 = vpack.c.bf16 %v825_v4, %v825_v4 }
 0x645   :  { %v841_v6 = vld.sshfl [vmem:[#allocation1 + $0x10] sm:$0xff pattern:$0x75316420]  ;;  %845 = vst [vmem:[#allocation1 + $0x21] ss:$2 sm:$0xff] %v5411_v51 }
 0x646   :  { %862 = vst [vmem:[#allocation1 + $0x10] ss:$2 sm:$0xff] %v5500_v58  ;;  %v855_v7 = vpack.c.bf16 %v841_v6, %v841_v6  ;;  %v917_v33 = vunpack.c.l.b16 %v833_v29 }
 0x648   :  { %v891_v28 = vunpack.c.l.b16 %v855_v7  ;;  %v919_v30 = vpack.c.b16 %v918_v40, %v917_v33 }
 0x64a   :  { %v892_v3 = vpack.c.b16 %v891_v28, %v890_v13 }
 0x64c   :  { %v848_v11 = vld.sshfl [vmem:[#allocation1 + $0x20] sm:$0xff pattern:$0x75316420]  ;;  %893 = vrot.lane.b32.xlu0 %v892_v3, %s5284_s9 }
 0x64d   :  { %866 = vst [vmem:[#allocation1 + $0x20] ss:$2 sm:$0xff] %v5505_v61  ;;  %v856_v32 = vpack.c.bf16 %v848_v11, %v848_v11  ;;  %v864_v40 = vld.sshfl [vmem:[#allocation1 + $0x10] sm:$0xff pattern:$0x75316420] }
 0x64e   :  { %868 = vst [vmem:[#allocation1 + $0x21] ss:$2 sm:$0xff] %v5430_v10 }
 0x64f   :  { %v924_v35 = vunpack.c.l.b16 %v856_v32 }
 0x651   :  { %v926_v36 = vpack.c.b16 %v925_v39, %v924_v35 }
 0x653   :  { %927 = vrot.lane.b32.xlu2 %v926_v36, %s5284_s9 }
 0x654   :  { %920 = vrot.lane.b32.xlu0 %v919_v30, %s5283_s8  ;;  %v863_v30 = vld.sshfl [vmem:[#allocation1] sm:$0xff pattern:$0x75316420] }
 0x655   :  { %v871_v39 = vld.sshfl [vmem:[#allocation1 + $0x20] sm:$0xff pattern:$0x75316420] }
 0x656   :  { %v879_v36 = vpack.c.bf16 %v871_v39, %v871_v39 }
 0x6ad   :  { %v928_v24 = vpop.permute.xlu2 %927 }
 0x6ae   :  { %v933_v49 = vsel %vm291_vm3, %v928_v24, 0  ;;  %v880_v24 = vpack.c.bf16 %v5451_v25, %v5451_v25 }
 0x6af   :  { %942 = vmatpush.bf16.xpose.msrb.mxu3 %v933_v49  ;;  %v878_v49 = vpack.c.bf16 %v864_v40, %v864_v40 }
 0x6b6   :  { %v887_v31 = vpop.permute.xlu1 %886 }
 0x6be   :  { %v894_v23 = vpop.permute.xlu0 %893 }
 0x6bf   :  { %v899_v50 = vsel %vm291_vm3, %v894_v23, 0  ;;  %v1040_v23 = vunpack.c.l.b16 %v879_v36 }
 0x6c0   :  { %908 = vmatpush.bf16.xpose.msrb.mxu2 %v899_v50  ;;  %v877_v50 = vpack.c.bf16 %v863_v30, %v863_v30 }
 0x6c6   :  { %v921_v44 = vpop.permute.xlu0 %920 }
 0x6c7   :  { %4570 = vmatmul.msk.bf16.vlgmr.msrb.gmra.mxu2 %vm291_vm3, %v887_v31  ;;  %4571 = vmatmul.msk.bf16.vlgmr.msrb.gmra.mxu3 %vm291_vm3, %v921_v44  ;;  %v1041_v31 = vunpack.c.l.b16 %v880_v24  ;;  %v1009_v44 = vunpack.c.l.b16 %v878_v49 }
 0x74a   :  { %v910_v37 = vpop.f32.mrf.mxu2  ;;  %v944_v48 = vpop.f32.mrf.mxu3 }
 0x74b   :  { %v949_v52 = vmul.f32 0.2773501, %v910_v37  ;;  %v951_v54 = vmul.f32 0.2773501, %v944_v48  ;;  %v1042_v37 = vpack.c.b16 %v1041_v31, %v1040_v23  ;;  %v1008_v48 = vunpack.c.l.b16 %v877_v50 }
 0x74d   :  { %v953_v55 = vsel %vm348_vm4, %v949_v52, -inf  ;;  %v959_v56 = vsel %vm348_vm4, %v951_v54, -inf }
 0x74e   :  { %954 = vmax.xlane.f32.xlu1 %v953_v55  ;;  %960 = vmax.xlane.f32.xlu0 %v959_v56 }
 0x752   :  { %v912_v18 = vpop.f32.mrf.mxu2  ;;  %v946_v57 = vpop.f32.mrf.mxu3 }
 0x753   :  { %v950_v59 = vmul.f32 0.2773501, %v912_v18  ;;  %v952_v60 = vmul.f32 0.2773501, %v946_v57 }
 0x755   :  { %v956_v63 = vsel %vm352_vm5, %v950_v59, -inf  ;;  %v962_v19 = vsel %vm352_vm5, %v952_v60, -inf }
 0x756   :  { %957 = vmax.xlane.f32.xlu2 %v956_v63  ;;  %963 = vmax.xlane.f32.xlu1 %v962_v19 }
 0x7c1   :  { %v955_v20 = vpop.xlane.xlu1 %954  ;;  %v961_v45 = vpop.xlane.xlu0 %960 }
 0x7c2   :  { %v965_v0 = vsub.f32 %v949_v52, %v955_v20  ;;  %v967_v8 = vsub.f32 %v951_v54, %v961_v45  ;;  %v1010_v52 = vpack.c.b16 %v1009_v44, %v1008_v48 }
 0x7c4   :  { %v969_v1 = vmul.f32 1.442695, %v965_v0  ;;  %v973_v2 = vmul.f32 1.442695, %v967_v8 }
 0x7c6   :  { %5041 = vpow2.f32 %v969_v1 }
 0x7c7   :  { %5043 = vpow2.f32 %v973_v2 }
 0x7c9   :  { %v958_v4 = vpop.xlane.xlu2 %957  ;;  %v964_v5 = vpop.xlane.xlu1 %963 }
 0x7ca   :  { %v966_v6 = vsub.f32 %v950_v59, %v958_v4  ;;  %v968_v7 = vsub.f32 %v952_v60, %v964_v5 }
 0x7cc   :  { %v5042_v13 = vpop.eup %5041  ;;  %v971_v28 = vmul.f32 1.442695, %v966_v6  ;;  %v975_v3 = vmul.f32 1.442695, %v968_v7 }
 0x7cd   :  { %v5044_v29 = vpop.eup %5043  ;;  %v977_v53 = vsel %vm348_vm4, %v5042_v13, 0.0 }
 0x7ce   :  { %5045 = vpow2.f32 %v971_v28  ;;  %978 = vadd.xlane.f32.xlu2 %v977_v53  ;;  %v983_v11 = vsel %vm348_vm4, %v5044_v29, 0.0 }
 0x7cf   :  { %5047 = vpow2.f32 %v975_v3  ;;  %984 = vadd.xlane.f32.xlu1 %v983_v11 }
 0x7d4   :  { %v5046_v14 = vpop.eup %5045 }
 0x7d5   :  { %v5048_v32 = vpop.eup %5047  ;;  %v980_v33 = vsel %vm352_vm5, %v5046_v14, 0.0 }
 0x7d6   :  { %981 = vadd.xlane.f32.xlu0 %v980_v33  ;;  %v986_v35 = vsel %vm352_vm5, %v5048_v32, 0.0 }
 0x7d7   :  { %987 = vadd.xlane.f32.xlu2 %v986_v35 }
 0x7e8   :  { %1043 = vrot.lane.b32.xlu1 %v1042_v37, %s5285_s10 }
 0x7ea   :  { %1011 = vrot.lane.b32.xlu0 %v1010_v52, %s5285_s10 }
 0x841   :  { %v979_v54 = vpop.xlane.xlu2 %978 }
 0x842   :  { %v985_v55 = vpop.xlane.xlu1 %984 }
 0x843   :  { %5049 = vrcp.f32 %v985_v55 }
 0x849   :  { %v982_v56 = vpop.xlane.xlu0 %981  ;;  %v5050_v25 = vpop.eup %5049 }
 0x84a   :  { %5051 = vrcp.f32 %v982_v56  ;;  %v988_v18 = vpop.xlane.xlu2 %987  ;;  %v995_v19 = vmul.f32 %v5050_v25, %v5044_v29 }
 0x84b   :  { %5053 = vrcp.f32 %v988_v18 }
 0x84c   :  { %5055 = vrcp.f32 %v979_v54  ;;  %v999_v8 = vpack.c.bf16 %v995_v19, %v995_v19 }
 0x84e   :  { %v1035_v6 = vunpack.c.l.b16 %v999_v8 }
 0x850   :  { %v5052_v57 = vpop.eup %5051 }
 0x851   :  { %v5054_v59 = vpop.eup %5053  ;;  %v994_v20 = vmul.f32 %v5052_v57, %v5046_v14 }
 0x852   :  { %v5056_v60 = vpop.eup %5055  ;;  %v996_v63 = vmul.f32 %v5054_v59, %v5048_v32 }
 0x853   :  { %v993_v45 = vmul.f32 %v5056_v60, %v5042_v13  ;;  %v998_v1 = vpack.c.bf16 %v994_v20, %v994_v20 }
 0x854   :  { %v1000_v0 = vpack.c.bf16 %v996_v63, %v996_v63 }
 0x855   :  { %v997_v2 = vpack.c.bf16 %v993_v45, %v993_v45  ;;  %v1004_v7 = vunpack.c.l.b16 %v998_v1 }
 0x856   :  { %v1036_v4 = vunpack.c.l.b16 %v1000_v0 }
 0x857   :  { %v1003_v53 = vunpack.c.l.b16 %v997_v2 }
 0x858   :  { %v1037_v11 = vpack.c.b16 %v1036_v4, %v1035_v6 }
 0x859   :  { %v1005_v29 = vpack.c.b16 %v1004_v7, %v1003_v53 }
 0x85a   :  { %v1044_v5 = vpop.permute.xlu1 %1043 }
 0x85b   :  { %v1049_v28 = vsel %vm413_vm6, %v1044_v5, 0 }
 0x85c   :  { %1058 = vmatpush.bf16.msra.mxu1 %v1049_v28  ;;  %v1012_v3 = vpop.permute.xlu0 %1011 }
 0x85d   :  { %v1017_v33 = vsel %vm413_vm6, %v1012_v3, 0 }
 0x85e   :  { %1026 = vmatpush.bf16.msra.mxu0 %v1017_v33 }
 0x85f   :  { %4573 = vmatmul.msk.bf16.vlgmr.msra.gmra.mxu1 %vm348_vm4, %v1037_v11 }
 0x861   :  { %4572 = vmatmul.msk.bf16.vlgmr.msra.gmra.mxu0 %vm348_vm4, %v1005_v29 }
 0x8dc   :  { %v1060_v13 = vpop.f32.mrf.mxu1 }
 0x8dd   :  { %v1070_v14 = vrot.slane %v1060_v13, 4  ;;  %1077 = vst [vmem:[#allocation1 + $0x11] ss:$2 sm:$0xff] %v1060_v13 }
 0x8de   :  { %v1028_v32 = vpop.f32.mrf.mxu0 }
 0x8df   :  { %1079 = vst [vmem:[#allocation1 + $0x20] ss:$2 sm:$0xff] %v1070_v14  ;;  %v1069_v35 = vrot.slane %v1028_v32, 4 }
 0x8e0   :  { %1071 = vst [vmem:[#allocation1] ss:$2 sm:$0xff] %v1028_v32 }
 0x8e1   :  { %1073 = vst [vmem:[#allocation1 + $0x1] ss:$2 sm:$0xff] %v1069_v35 }
 0x8e4   :  { %v1062_v39 = vpop.f32.mrf.mxu1 }
 0x8e5   :  { %1081 = vst [vmem:[#allocation1 + $0x21] ss:$2 sm:$0xff] %v1062_v39 }
 0x8e6   :  { %v1030_v40 = vpop.f32.mrf.mxu0 }
 0x8e7   :  { %1075 = vst [vmem:[#allocation1 + $0x10] ss:$2 sm:$0xff] %v1030_v40 }
 0x8e8   :  { %v5604_v36 = vld.sshfl [vmem:[#allocation1] sm:$0xff pattern:$0x75316420] }
 0x8e9   :  { %1098 = vst [vmem:[#allocation1] ss:$2 sm:$0xff] %v5388_v41 }
 0x8ea   :  { %1100 = vst [vmem:[#allocation1 + $0x1] ss:$2 sm:$0xff] %v5394_v43 }
 0x8ec   :  { %v5608_v30 = vld.sshfl [vmem:[#allocation1 + $0x20] sm:$0xff pattern:$0x75316420] }
 0x8ed   :  { %1106 = vst [vmem:[#allocation1 + $0x20] ss:$2 sm:$0xff] %v5403_v47 }
 0x8ee   :  { %1108 = vst [vmem:[#allocation1 + $0x21] ss:$2 sm:$0xff] %v5411_v51  ;;  %v5612_v24 = vld.sshfl [vmem:[#allocation1 + $0x10] sm:$0xff pattern:$0x75316420] }
 0x8ef   :  { %1102 = vst [vmem:[#allocation1 + $0x10] ss:$2 sm:$0xff] %v5400_v46 }
 0x8f1   :  { %v1103_v49 = vld.sshfl [vmem:[#allocation1] sm:$0xff pattern:$0x75316420] }
 0x8f2   :  { %1121 = vst [vmem:[#allocation1] ss:$2 sm:$0xff] %v5388_v41  ;;  %v1117_v50 = vpack.c.bf16 %v1103_v49, %v1103_v49  ;;  %v1143_v41 = vpack.c.bf16 %v5455_v27, %v5455_v27 }
 0x8f3   :  { %1123 = vst [vmem:[#allocation1 + $0x1] ss:$2 sm:$0xff] %v5394_v43  ;;  %v1120_v43 = vpack.c.bf16 %v5453_v26, %v5453_v26 }
 0x8f4   :  { %v1169_v37 = vunpack.c.l.b16 %v1117_v50  ;;  %v1211_v25 = vunpack.c.l.b16 %v1143_v41 }
 0x8f5   :  { %v1111_v23 = vld.sshfl [vmem:[#allocation1 + $0x20] sm:$0xff pattern:$0x75316420]  ;;  %v1204_v57 = vunpack.c.l.b16 %v1120_v43 }
 0x8f6   :  { %1129 = vst [vmem:[#allocation1 + $0x20] ss:$2 sm:$0xff] %v5403_v47  ;;  %v1104_v31 = vld.sshfl [vmem:[#allocation1 + $0x10] sm:$0xff pattern:$0x75316420]  ;;  %v1119_v55 = vpack.c.bf16 %v1111_v23, %v1111_v23 }
 0x8f7   :  { %1131 = vst [vmem:[#allocation1 + $0x21] ss:$2 sm:$0xff] %v5411_v51  ;;  %v1118_v44 = vpack.c.bf16 %v1104_v31, %v1104_v31 }
 0x8f8   :  { %1125 = vst [vmem:[#allocation1 + $0x10] ss:$2 sm:$0xff] %v5400_v46 }
 0x8f9   :  { %v1170_v48 = vunpack.c.l.b16 %v1118_v44 }
 0x8fa   :  { %v1126_v52 = vld.sshfl [vmem:[#allocation1] sm:$0xff pattern:$0x75316420] }
 0x8fb   :  { %1144 = vst [vmem:[#allocation1] ss:$2 sm:$0xff] %v5391_v42  ;;  %v1171_v54 = vpack.c.b16 %v1170_v48, %v1169_v37  ;;  %v1140_v46 = vpack.c.bf16 %v1126_v52, %v1126_v52  ;;  %v1203_v42 = vunpack.c.l.b16 %v1119_v55 }
 0x8fc   :  { %1146 = vst [vmem:[#allocation1 + $0x1] ss:$2 sm:$0xff] %v5487_v34 }
 0x8fd   :  { %1172 = vrot.lane.b32.xlu0 %v1171_v54, %s5286_s11  ;;  %v1176_v59 = vunpack.c.l.b16 %v1140_v46  ;;  %v1205_v63 = vpack.c.b16 %v1204_v57, %v1203_v42 }
 0x8fe   :  { %v1134_v47 = vld.sshfl [vmem:[#allocation1 + $0x20] sm:$0xff pattern:$0x75316420] }
 0x8ff   :  { %1152 = vst [vmem:[#allocation1 + $0x20] ss:$2 sm:$0xff] %v5505_v61  ;;  %v1127_v51 = vld.sshfl [vmem:[#allocation1 + $0x10] sm:$0xff pattern:$0x75316420]  ;;  %v1142_v56 = vpack.c.bf16 %v1134_v47, %v1134_v47 }
 0x900   :  { %1154 = vst [vmem:[#allocation1 + $0x21] ss:$2 sm:$0xff] %v5430_v10  ;;  %v1141_v18 = vpack.c.bf16 %v1127_v51, %v1127_v51 }
 0x901   :  { %1148 = vst [vmem:[#allocation1 + $0x10] ss:$2 sm:$0xff] %v5500_v58  ;;  %v1210_v34 = vunpack.c.l.b16 %v1142_v56 }
 0x902   :  { %v1177_v27 = vunpack.c.l.b16 %v1141_v18  ;;  %v1158_v18 = vld.sshfl [vmem:[#allocation1 + $0x30] sm:$0xff pattern:$0x75316420] }
 0x903   :  { %v1212_v60 = vpack.c.b16 %v1211_v25, %v1210_v34  ;;  %v1149_v43 = vld.sshfl [vmem:[#allocation1] sm:$0xff pattern:$0x75316420] }
 0x904   :  { %v1178_v26 = vpack.c.b16 %v1177_v27, %v1176_v59  ;;  %v1163_v42 = vpack.c.bf16 %v1149_v43, %v1149_v43  ;;  %v1166_v59 = vpack.c.bf16 %v1158_v18, %v1158_v18  ;;  %v4905_v18 = vld [vmem:[#allocation3 + $0x4c] sm:$0xf0] }
 0x905   :  { %1213 = vrot.lane.b32.xlu1 %v1212_v60, %s5287_s12  ;;  %1206 = vrot.lane.b32.xlu0 %v1205_v63, %s5286_s11 }
 0x906   :  { %1179 = vrot.lane.b32.xlu2 %v1178_v26, %s5287_s12  ;;  %v1294_v57 = vunpack.c.l.b16 %v1163_v42  ;;  %v1327_v63 = vunpack.c.l.b16 %v1166_v59  ;;  %v4584_v42 = vld [vmem:[#allocation3 + $0x48] sm:$0xf] }
 0x907   :  { %v1157_v51 = vld.sshfl [vmem:[#allocation1 + $0x20] sm:$0xff pattern:$0x75316420] }
 0x908   :  { %v1150_v41 = vld.sshfl [vmem:[#allocation1 + $0x10] sm:$0xff pattern:$0x75316420]  ;;  %v1165_v25 = vpack.c.bf16 %v1157_v51, %v1157_v51 }
 0x909   :  { %v1164_v46 = vpack.c.bf16 %v1150_v41, %v1150_v41 }
 0x90a   :  { %v1326_v60 = vunpack.c.l.b16 %v1165_v25  ;;  %v4904_v25 = vld [vmem:[#allocation3 + $0x3c] sm:$0xf0] }
 0x90b   :  { %v1295_v34 = vunpack.c.l.b16 %v1164_v46  ;;  %v4906_v46 = vld [vmem:[#allocation3 + $0x5c] sm:$0xf0] }
 0x90c   :  { %v1328_v26 = vpack.c.b16 %v1327_v63, %v1326_v60 }
 0x90d   :  { %v1296_v27 = vpack.c.b16 %v1295_v34, %v1294_v57  ;;  %v4580_v34 = vld [vmem:[#allocation3 + $0x38] sm:$0xf] }
 0x90e   :  { %v4581_v57 = vor.u32 %v4904_v25, %v4580_v34 }
 0x960   :  { %v1180_v61 = vpop.permute.xlu2 %1179 }
 0x961   :  { %v1185_v10 = vsel %vm291_vm3, %v1180_v61, 0 }
 0x962   :  { %1194 = vmatpush.bf16.xpose.msra.mxu2 %v1185_v10 }
 0x96f   :  { %v1173_v58 = vpop.permute.xlu0 %1172 }
 0x970   :  { %4574 = vmatmul.msk.bf16.vlgmr.msra.gmra.mxu2 %vm291_vm3, %v1173_v58 }
 0x977   :  { %v1214_v19 = vpop.permute.xlu1 %1213  ;;  %v1207_v45 = vpop.permute.xlu0 %1206 }
 0x978   :  { %v1219_v20 = vsel %vm291_vm3, %v1214_v19, 0 }
 0x979   :  { %1228 = vmatpush.bf16.xpose.msra.mxu3 %v1219_v20 }
 0x980   :  { %4575 = vmatmul.msk.bf16.vlgmr.msra.gmra.mxu3 %vm291_vm3, %v1207_v45 }
 0x9f3   :  { %v1196_v0 = vpop.f32.mrf.mxu2 }
 0x9f4   :  { %v1235_v8 = vmul.f32 0.2773501, %v1196_v0 }
 0x9f6   :  { %v1239_v1 = vsel %vm348_vm4, %v1235_v8, -inf }
 0x9f7   :  { %1240 = vmax.xlane.f32.xlu2 %v1239_v1 }
 0x9fb   :  { %v1198_v2 = vpop.f32.mrf.mxu2 }
 0x9fc   :  { %v1236_v4 = vmul.f32 0.2773501, %v1198_v2 }
 0x9fe   :  { %v1242_v5 = vsel %vm352_vm5, %v1236_v4, -inf }
 0x9ff   :  { %1243 = vmax.xlane.f32.xlu1 %v1242_v5 }
 0xa03   :  { %v1230_v6 = vpop.f32.mrf.mxu3 }
 0xa04   :  { %v1237_v7 = vmul.f32 0.2773501, %v1230_v6 }
 0xa06   :  { %v1245_v28 = vsel %vm348_vm4, %v1237_v7, -inf }
 0xa07   :  { %1246 = vmax.xlane.f32.xlu0 %v1245_v28 }
 0xa0b   :  { %v1232_v3 = vpop.f32.mrf.mxu3 }
 0xa0c   :  { %v1238_v53 = vmul.f32 0.2773501, %v1232_v3 }
 0xa0e   :  { %v1248_v11 = vsel %vm352_vm5, %v1238_v53, -inf }
 0xa0f   :  { %1249 = vmax.xlane.f32.xlu2 %v1248_v11 }
 0xa6a   :  { %v1241_v33 = vpop.xlane.xlu2 %1240 }
 0xa6b   :  { %v1251_v29 = vsub.f32 %v1235_v8, %v1241_v33 }
 0xa6d   :  { %v1255_v13 = vmul.f32 1.442695, %v1251_v29 }
 0xa6f   :  { %5057 = vpow2.f32 %v1255_v13 }
 0xa72   :  { %v1244_v14 = vpop.xlane.xlu1 %1243 }
 0xa73   :  { %v1252_v32 = vsub.f32 %v1236_v4, %v1244_v14 }
 0xa75   :  { %v5058_v35 = vpop.eup %5057  ;;  %v1257_v39 = vmul.f32 1.442695, %v1252_v32 }
 0xa76   :  { %v1263_v40 = vsel %vm348_vm4, %v5058_v35, 0.0 }
 0xa77   :  { %5059 = vpow2.f32 %v1257_v39  ;;  %1264 = vadd.xlane.f32.xlu1 %v1263_v40 }
 0xa7a   :  { %v1247_v49 = vpop.xlane.xlu0 %1246 }
 0xa7b   :  { %v1253_v23 = vsub.f32 %v1237_v7, %v1247_v49 }
 0xa7d   :  { %v5060_v50 = vpop.eup %5059  ;;  %v1259_v31 = vmul.f32 1.442695, %v1253_v23 }
 0xa7e   :  { %v1266_v44 = vsel %vm352_vm5, %v5060_v50, 0.0 }
 0xa7f   :  { %5061 = vpow2.f32 %v1259_v31  ;;  %1267 = vadd.xlane.f32.xlu2 %v1266_v44 }
 0xa82   :  { %v1250_v37 = vpop.xlane.xlu2 %1249 }
 0xa83   :  { %v1254_v48 = vsub.f32 %v1238_v53, %v1250_v37 }
 0xa85   :  { %v5062_v52 = vpop.eup %5061  ;;  %v1261_v54 = vmul.f32 1.442695, %v1254_v48 }
 0xa86   :  { %v1269_v55 = vsel %vm348_vm4, %v5062_v52, 0.0 }
 0xa87   :  { %5063 = vpow2.f32 %v1261_v54  ;;  %1270 = vadd.xlane.f32.xlu0 %v1269_v55  ;;  %v1395_v55 = vld [vmem:[#allocation3 + $0x68] sm:$0x3] }
 0xa88   :  { %v1409_v41 = vunpack.c.l.b16 %v1395_v55 }
 0xa8a   :  { %v1413_v43 = vpack.c.b16 %v1409_v41, %v1409_v41 }
 0xa8c   :  { %v1424_v51 = vsel %vm161_vm0, %v1413_v43, 0 }
 0xa8d   :  { %v5064_v47 = vpop.eup %5063  ;;  %1430 = vmatpush.bf16.msrb.mxu2 %v1424_v51 }
 0xa8e   :  { %v1272_v56 = vsel %vm352_vm5, %v5064_v47, 0.0 }
 0xa8f   :  { %1273 = vadd.xlane.f32.xlu1 %v1272_v56 }
 0xa97   :  { %1297 = vrot.lane.b32.xlu2 %v1296_v27, %s5288_s13 }
 0xa9b   :  { %1329 = vrot.lane.b32.xlu0 %v1328_v26, %s5288_s13 }
 0xa9f   :  { %1085 = vrot.lane.b32.xlu2 %v5604_v36, %s5289_s14 }
 0xaa3   :  { %801 = vrot.lane.b32.xlu0 %v5559_v62, %s5290_s15 }
 0xaa8   :  { %799 = vrot.lane.b32.xlu1 %v5555_v12, %s5290_s15 }
 0xaab   :  { %1087 = vrot.lane.b32.xlu0 %v5612_v24, %s5289_s14 }
 0xab3   :  { %803 = vrot.lane.b32.xlu0 %v5563_v38, %s5290_s15 }
 0xaea   :  { %v1265_v61 = vpop.xlane.xlu1 %1264 }
 0xaeb   :  { %5065 = vrcp.f32 %v1265_v61 }
 0xaf1   :  { %v5066_v58 = vpop.eup %5065 }
 0xaf2   :  { %v1268_v10 = vpop.xlane.xlu2 %1267  ;;  %v1279_v19 = vmul.f32 %v5066_v58, %v5058_v35 }
 0xaf3   :  { %5067 = vrcp.f32 %v1268_v10 }
 0xaf4   :  { %v1283_v20 = vpack.c.bf16 %v1279_v19, %v1279_v19 }
 0xaf6   :  { %v1289_v24 = vunpack.c.l.b16 %v1283_v20 }
 0xaf9   :  { %v5068_v36 = vpop.eup %5067 }
 0xafa   :  { %v1280_v45 = vmul.f32 %v5068_v36, %v5060_v50  ;;  %v1271_v0 = vpop.xlane.xlu0 %1270  ;;  %v1298_v62 = vpop.permute.xlu2 %1297  ;;  %v1444_v36 = vld [vmem:[%s6374_s2 + $0x1] ss:$0 sm:$0xff] }
 0xafb   :  { %v1303_v8 = vsel %vm413_vm6, %v1298_v62, 0  ;;  %5069 = vrcp.f32 %v1271_v0 }
 0xafc   :  { %v1284_v12 = vpack.c.bf16 %v1280_v45, %v1280_v45  ;;  %1312 = vmatpush.bf16.msrb.mxu0 %v1303_v8 }
 0xafe   :  { %v1290_v1 = vunpack.c.l.b16 %v1284_v12 }
 0xb00   :  { %v1291_v2 = vpack.c.b16 %v1290_v1, %v1289_v24 }
 0xb01   :  { %v5070_v4 = vpop.eup %5069 }
 0xb02   :  { %v1274_v38 = vpop.xlane.xlu1 %1273  ;;  %4576 = vmatmul.msk.bf16.vlgmr.msrb.gmra.mxu0 %vm348_vm4, %v1291_v2  ;;  %v1281_v5 = vmul.f32 %v5070_v4, %v5062_v52  ;;  %v1086_v35 = vpop.permute.xlu2 %1085 }
 0xb03   :  { %5071 = vrcp.f32 %v1274_v38 }
 0xb04   :  { %v1285_v7 = vpack.c.bf16 %v1281_v5, %v1281_v5 }
 0xb06   :  { %v1321_v11 = vunpack.c.l.b16 %v1285_v7 }
 0xb09   :  { %v5072_v6 = vpop.eup %5071 }
 0xb0a   :  { %v1282_v28 = vmul.f32 %v5072_v6, %v5064_v47  ;;  %v4588_v47 = vld [vmem:[#allocation3 + $0x58] sm:$0xf] }
 0xb0b   :  { %v4589_v56 = vor.u32 %v4906_v46, %v4588_v47 }
 0xb0c   :  { %v1286_v3 = vpack.c.bf16 %v1282_v28, %v1282_v28 }
 0xb0d   :  { %v1330_v53 = vpop.permute.xlu0 %1329  ;;  %1431 = vmatpush.bf16.msrb.mxu2 %v4589_v56 }
 0xb0e   :  { %v1322_v33 = vunpack.c.l.b16 %v1286_v3  ;;  %v1335_v29 = vsel %vm413_vm6, %v1330_v53, 0 }
 0xb0f   :  { %1344 = vmatpush.bf16.msrb.mxu1 %v1335_v29  ;;  %v5292_v29 = vmov 52.0  }
 0xb10   :  { %v1323_v13 = vpack.c.b16 %v1322_v33, %v1321_v11  ;;  %5073 = vrcp.f32 %v5292_v29  ;;  %v4910_v29 = vld [vmem:[#allocation3 + $0x84] sm:$0xf0] }
 0xb12   :  { %4577 = vmatmul.msk.bf16.vlgmr.msrb.gmra.mxu1 %vm348_vm4, %v1323_v13 }
 0xb15   :  { %v802_v14 = vpop.permute.xlu0 %801 }
 0xb16   :  { %810 = vst.msk [vmem:[#allocation2 + $0x8] sm:$0xff] %vm808_vm8, %v802_v14  ;;  %v5074_v13 = vpop.eup %5073 }
 0xb17   :  { %v1498_v14 = vmul.f32 52.0, %v5074_v13  ;;  %vm1502_vm11 = vweird.f32 %v5074_v13 }
 0xb1a   :  { %v800_v32 = vpop.permute.xlu1 %799 }
 0xb1b   :  { %809 = vst.msk [vmem:[#allocation2] sm:$0xff] %vm808_vm8, %v800_v32  ;;  %v1499_v32 = vsub.f32 1.0, %v1498_v14 }
 0xb1c   :  { %1095 = vst.msk [vmem:[#allocation2] sm:$0xff] %vm1094_vm9, %v1086_v35 }
 0xb1d   :  { %v1088_v39 = vpop.permute.xlu0 %1087 }
 0xb1e   :  { %1096 = vst.msk [vmem:[#allocation2 + $0x8] sm:$0xff] %vm1094_vm9, %v1088_v39  ;;  %v5294_v39 = vmov 1985246804  }
 0xb25   :  { %v804_v40 = vpop.permute.xlu0 %803 }
 0xb26   :  { %811 = vst.msk [vmem:[#allocation2 + $0x10] sm:$0xff] %vm808_vm8, %v804_v40  ;;  %v1515_v40 = vunpack.c.l.s4 %v5294_v39  ;;  %v4908_v39 = vld [vmem:[#allocation3 + $0x74] sm:$0xf0] }
 0xb7f   :  { %v1314_v49 = vpop.f32.mrf.mxu0 }
 0xb80   :  { %v1355_v23 = vrot.slane %v1314_v49, 4  ;;  %1357 = vst [vmem:[#allocation1] ss:$2 sm:$0xff] %v1314_v49 }
 0xb82   :  { %1359 = vst [vmem:[#allocation1 + $0x1] ss:$2 sm:$0xff] %v1355_v23 }
 0xb87   :  { %v1316_v50 = vpop.f32.mrf.mxu0 }
 0xb88   :  { %1361 = vst [vmem:[#allocation1 + $0x10] ss:$2 sm:$0xff] %v1316_v50  ;;  %v5696_v50 = vunpack.c.0.s8 %v1515_v40  ;;  %v4907_v40 = vld [vmem:[#allocation3 + $0x74] sm:$0xf] }
 0xb89   :  { %v1368_v31 = vld.sshfl [vmem:[#allocation1] sm:$0xff pattern:$0x75316420] }
 0xb8a   :  { %1371 = vrot.lane.b32.xlu1 %v1368_v31, %s5291_s3 }
 0xb8f   :  { %v1346_v44 = vpop.f32.mrf.mxu1 }
 0xb90   :  { %v1356_v37 = vrot.slane %v1346_v44, 4  ;;  %1363 = vst [vmem:[#allocation1 + $0x11] ss:$2 sm:$0xff] %v1346_v44 }
 0xb92   :  { %1365 = vst [vmem:[#allocation1 + $0x20] ss:$2 sm:$0xff] %v1356_v37  ;;  %1089 = vrot.lane.b32.xlu1 %v5608_v30, %s5289_s14  ;;  %v4585_v30 = vor.u32 %v4905_v18, %v4584_v42 }
 0xb94   :  { %1432 = vmatpush.bf16.msrb.mxu2 %v4585_v30 }
 0xb97   :  { %v1369_v48 = vld.sshfl [vmem:[#allocation1 + $0x10] sm:$0xff pattern:$0x75316420]  ;;  %v1348_v52 = vpop.f32.mrf.mxu1 }
 0xb98   :  { %1367 = vst [vmem:[#allocation1 + $0x21] ss:$2 sm:$0xff] %v1348_v52  ;;  %1373 = vrot.lane.b32.xlu2 %v1369_v48, %s5291_s3  ;;  %1433 = vmatpush.bf16.msrb.mxu2 %v4581_v57 }
 0xb9f   :  { %v1370_v54 = vld.sshfl [vmem:[#allocation1 + $0x20] sm:$0xff pattern:$0x75316420] }
 0xba0   :  { %1375 = vrot.lane.b32.xlu2 %v1370_v54, %s5291_s3 }
 0xbf2   :  { %v1374_v59 = vpop.permute.xlu2 %1373 }
 0xbf3   :  { %1382 = vst.msk [vmem:[#allocation2 + $0x8] sm:$0xff] %vm1380_vm10, %v1374_v59 }
 0xbfa   :  { %v1385_v26 = vld [vmem:[#allocation2 + $0x8] sm:$0xff]  ;;  %v1376_v61 = vpop.permute.xlu2 %1375 }
 0xbfc   :  { %v1372_v27 = vpop.permute.xlu1 %1371 }
 0xbfd   :  { %1381 = vst.msk [vmem:[#allocation2] sm:$0xff] %vm1380_vm10, %v1372_v27 }
 0xc04   :  { %v1090_v60 = vpop.permute.xlu1 %1089  ;;  %v1384_v63 = vld [vmem:[#allocation2] sm:$0xff] }
 0xc05   :  { %1097 = vst.msk [vmem:[#allocation2 + $0x10] sm:$0xff] %vm1094_vm9, %v1090_v60  ;;  %v1387_v10 = vpack.c.bf16 %v1385_v26, %v1384_v63 }
 0xc06   :  { %1383 = vst.msk [vmem:[#allocation2 + $0x10] sm:$0xff] %vm1380_vm10, %v1376_v61 }
 0xc07   :  { %4590 = vmatmul.msk.bf16.vlgmr.msrb.gmra.mxu2 %vm154_vm1, %v1387_v10 }
 0xc0d   :  { %v1386_v58 = vld [vmem:[#allocation2 + $0x10] sm:$0xff] }
 0xc0e   :  { %v1388_v19 = vpack.c.bf16 %v1386_v58, %v1386_v58 }
 0xc17   :  { %4591 = vmatmul.msk.bf16.gmra.mxu2 %vm154_vm1, %v1388_v19 }
 0xc8a   :  { %v1435_v20 = vpop.f32.mrf.mxu2 }
 0xc8b   :  { %v1445_v45 = vadd.f32 %v1444_v36, %v1435_v20 }
 0xc8d   :  { %v1451_v0 = vrot.slane %v1445_v45, 4  ;;  %v1457_v62 = vadd.f32 %v1445_v45, %v5350_v9 }
 0xc8f   :  { %v1458_v8 = vadd.f32 %v1451_v0, %v83_v17  ;;  %1471 = vst [vmem:[#allocation1] ss:$2 sm:$0xff] %v1457_v62  ;;  %v1708_v0 = vld [vmem:[#allocation3 + $0xa0] sm:$0x33] }
 0xc91   :  { %1473 = vst [vmem:[#allocation1 + $0x1] ss:$2 sm:$0xff] %v1458_v8 }
 0xc92   :  { %v1437_v12 = vpop.f32.mrf.mxu2 }
 0xc93   :  { %v1446_v24 = vadd.f32 %v1444_v36, %v1437_v12  ;;  %v1736_v12 = vunpack.c.h.b16 %v1708_v0 }
 0xc95   :  { %v1452_v1 = vrot.slane %v1446_v24, 4  ;;  %v1459_v2 = vadd.f32 %v1446_v24, %v5357_v15 }
 0xc97   :  { %v1460_v38 = vadd.f32 %v1452_v1, %v5362_v16  ;;  %1475 = vst [vmem:[#allocation1 + $0x10] ss:$2 sm:$0xff] %v1459_v2  ;;  %v1500_v16 = vmul.f32 %v5074_v13, %v1499_v32  ;;  %v4909_v32 = vld [vmem:[#allocation3 + $0x84] sm:$0xf] }
 0xc98   :  { %v1482_v4 = vld.sshfl [vmem:[#allocation1] sm:$0xff pattern:$0x75316420] }
 0xc99   :  { %1477 = vst [vmem:[#allocation1 + $0x11] ss:$2 sm:$0xff] %v1460_v38  ;;  %v1488_v5 = vsel %vm154_vm1, %v1482_v4, 0.0 }
 0xc9a   :  { %1489 = vadd.xlane.f32.xlu0 %v1488_v5  ;;  %v1440_v6 = vpop.f32.mrf.mxu2  ;;  %v4611_v5 = vld [vmem:[#allocation3 + $0x90] sm:$0xf] }
 0xc9b   :  { %v1447_v7 = vadd.f32 %v1444_v36, %v1440_v6  ;;  %v4912_v6 = vld [vmem:[#allocation3 + $0x94] sm:$0xf0] }
 0xc9d   :  { %v1453_v28 = vrot.slane %v1447_v7, 4  ;;  %v1461_v9 = vadd.f32 %v1447_v7, %v84_v21  ;;  %v1501_v21 = vadd.f32 %v5074_v13, %v1500_v16  ;;  %v4911_v7 = vld [vmem:[#allocation3 + $0x94] sm:$0xf]  ;;  %v4605_v16 = vld [vmem:[#allocation3 + $0x88] sm:$0xf0] }
 0xc9f   :  { %v1462_v17 = vadd.f32 %v1453_v28, %v5370_v22  ;;  %1479 = vst [vmem:[#allocation1 + $0x20] ss:$2 sm:$0xff] %v1461_v9  ;;  %v5293_v22 = vmov 839922192   ;;  %v5692_v49 = vsel %vm1502_vm11, %v5074_v13, %v1501_v21  ;;  %v4608_v21 = vor.u32 %v4909_v32, %v4605_v16  ;;  %v4647_v32 = vld [vmem:[#allocation3 + $0x108] sm:$0xf] }
 0xca0   :  { %v1483_v3 = vld.sshfl [vmem:[#allocation1 + $0x10] sm:$0xff pattern:$0x75316420]  ;;  %v1511_v35 = vunpack.c.l.s4 %v5293_v22 }
 0xca1   :  { %1481 = vst [vmem:[#allocation1 + $0x21] ss:$2 sm:$0xff] %v1462_v17  ;;  %v1491_v15 = vsel %vm154_vm1, %v1483_v3, 0.0  ;;  %v4919_v16 = vld [vmem:[#allocation3 + $0x10c] sm:$0xf0] }
 0xca2   :  { %1492 = vadd.xlane.f32.xlu1 %v1491_v15  ;;  %v1442_v53 = vpop.f32.mrf.mxu2  ;;  %v5694_v23 = vunpack.c.0.s8 %v1511_v35  ;;  %v4595_v35 = vld [vmem:[#allocation3 + $0x70] sm:$0xf] }
 0xca8   :  { %v1484_v11 = vld.sshfl [vmem:[#allocation1 + $0x20] sm:$0xff pattern:$0x75316420] }
 0xca9   :  { %v1494_v33 = vsel %vm154_vm1, %v1484_v11, 0.0 }
 0xcaa   :  { %1495 = vadd.xlane.f32.xlu2 %v1494_v33  ;;  %v4603_v33 = vld [vmem:[#allocation3 + $0x80] sm:$0xf] }
 0xcab   :  { %v4604_v14 = vor.u32 %v4910_v29, %v4603_v33  ;;  %v4920_v29 = vld [vmem:[#allocation3 + $0x11c] sm:$0xf0] }
 0xd0d   :  { %v1490_v31 = vpop.xlane.xlu0 %1489 }
 0xd0e   :  { %v1504_v44 = vmul.f32 %v5692_v49, %v1490_v31 }
 0xd10   :  { %v1513_v37 = vperm.slane %v1504_v44, %v5694_v23  ;;  %v1517_v48 = vperm.slane %v1504_v44, %v5696_v50 }
 0xd12   :  { %v5701_v52 = vsub.f32 %v1457_v62, %v1513_v37  ;;  %v5703_v54 = vsub.f32 %v1458_v8, %v1517_v48  ;;  %v1735_v8 = vunpack.c.l.b16 %v1708_v0  ;;  %v4596_v37 = vor.u32 %v4908_v39, %v4595_v35  ;;  %v4597_v48 = vld [vmem:[#allocation3 + $0x78] sm:$0xf0]  ;;  %v4926_v35 = vld [vmem:[#allocation3 + $0x17c] sm:$0xf0] }
 0xd14   :  { %v1546_v55 = vmul.f32 %v5701_v52, %v5701_v52  ;;  %v1547_v41 = vmul.f32 %v5703_v54, %v5703_v54  ;;  %v1743_v1 = vpack.c.b16 %v1735_v8, %v1735_v8 }
 0xd15   :  { %v1493_v43 = vpop.xlane.xlu1 %1492 }
 0xd16   :  { %1558 = vst [vmem:[#allocation1] ss:$2 sm:$0xff] %v1546_v55  ;;  %v1505_v47 = vmul.f32 %v5692_v49, %v1493_v43 }
 0xd17   :  { %1560 = vst [vmem:[#allocation1 + $0x1] ss:$2 sm:$0xff] %v1547_v41  ;;  %v4600_v41 = vor.u32 %v4907_v40, %v4597_v48 }
 0xd18   :  { %v1521_v46 = vperm.slane %v1505_v47, %v5694_v23  ;;  %v1525_v51 = vperm.slane %v1505_v47, %v5696_v50 }
 0xd1a   :  { %v5712_v56 = vsub.f32 %v1459_v2, %v1521_v46  ;;  %v5714_v42 = vsub.f32 %v1460_v38, %v1525_v51  ;;  %v1744_v2 = vpack.c.b16 %v1736_v12, %v1736_v12  ;;  %v1758_v38 = vsel %vm161_vm0, %v1743_v1, 0  ;;  %v5742_v51 = vld [vmem:[%s6374_s2 + $0x2] ss:$0 sm:$0xff] }
 0xd1b   :  { %1767 = vmatpush.bf16.msrb.mxu3 %v1758_v38 }
 0xd1c   :  { %v1548_v18 = vmul.f32 %v5712_v56, %v5712_v56  ;;  %v1549_v30 = vmul.f32 %v5714_v42, %v5714_v42  ;;  %v1761_v4 = vsel %vm161_vm0, %v1744_v2, 0 }
 0xd1d   :  { %v1496_v34 = vpop.xlane.xlu2 %1495  ;;  %1785 = vmatpush.bf16.msra.mxu0 %v1761_v4 }
 0xd1e   :  { %v1569_v25 = vld.sshfl [vmem:[#allocation1] sm:$0xff pattern:$0x75316420]  ;;  %1562 = vst [vmem:[#allocation1 + $0x10] ss:$2 sm:$0xff] %v1548_v18  ;;  %v1506_v57 = vmul.f32 %v5692_v49, %v1496_v34 }
 0xd1f   :  { %1564 = vst [vmem:[#allocation1 + $0x11] ss:$2 sm:$0xff] %v1549_v30  ;;  %v1575_v59 = vsel %vm154_vm1, %v1569_v25, 0.0  ;;  %v5747_v34 = vld [vmem:[%s6374_s2 + $0x3] ss:$0 sm:$0xff] }
 0xd20   :  { %v1529_v27 = vperm.slane %v1506_v57, %v5694_v23  ;;  %v1533_v60 = vperm.slane %v1506_v57, %v5696_v50  ;;  %1576 = vadd.xlane.f32.xlu0 %v1575_v59  ;;  %v5750_v59 = vrot.slane %v5742_v51, 4 }
 0xd22   :  { %v5724_v63 = vsub.f32 %v1461_v9, %v1529_v27  ;;  %v5726_v26 = vsub.f32 %v1462_v17, %v1533_v60  ;;  %v4612_v9 = vor.u32 %v4912_v6, %v4611_v5  ;;  %v4613_v17 = vld [vmem:[#allocation3 + $0x98] sm:$0xf0] }
 0xd23   :  { %v4616_v15 = vor.u32 %v4911_v7, %v4613_v17  ;;  %v4683_v7 = vld [vmem:[#allocation3 + $0x198] sm:$0xf] }
 0xd24   :  { %v1550_v61 = vmul.f32 %v5724_v63, %v5724_v63  ;;  %v1551_v10 = vmul.f32 %v5726_v26, %v5726_v26  ;;  %1768 = vmatpush.bf16.msrb.mxu3 %v4612_v9 }
 0xd25   :  { %1786 = vmatpush.bf16.msra.mxu0 %v4616_v15  ;;  %v4679_v15 = vld [vmem:[#allocation3 + $0x188] sm:$0xf] }
 0xd26   :  { %v1570_v58 = vld.sshfl [vmem:[#allocation1 + $0x10] sm:$0xff pattern:$0x75316420]  ;;  %1566 = vst [vmem:[#allocation1 + $0x20] ss:$2 sm:$0xff] %v1550_v61 }
 0xd27   :  { %1568 = vst [vmem:[#allocation1 + $0x21] ss:$2 sm:$0xff] %v1551_v10  ;;  %v1578_v19 = vsel %vm154_vm1, %v1570_v58, 0.0  ;;  %v5755_v10 = vrot.slane %v5747_v34, 4 }
 0xd28   :  { %1579 = vadd.xlane.f32.xlu1 %v1578_v19  ;;  %1769 = vmatpush.bf16.msrb.mxu3 %v4604_v14 }
 0xd29   :  { %1787 = vmatpush.bf16.msra.mxu0 %v4608_v21 }
 0xd2c   :  { %1770 = vmatpush.bf16.msrb.mxu3 %v4596_v37  ;;  %v4918_v37 = vld [vmem:[#allocation3 + $0xfc] sm:$0xf0] }
 0xd2d   :  { %1788 = vmatpush.bf16.msra.mxu0 %v4600_v41 }
 0xd2e   :  { %v1571_v36 = vld.sshfl [vmem:[#allocation1 + $0x20] sm:$0xff pattern:$0x75316420] }
 0xd2f   :  { %v1581_v20 = vsel %vm154_vm1, %v1571_v36, 0.0 }
 0xd30   :  { %1582 = vadd.xlane.f32.xlu2 %v1581_v20 }
 0xd93   :  { %v1577_v45 = vpop.xlane.xlu0 %1576 }
 0xd94   :  { %v1584_v62 = vmul.f32 %v1577_v45, %v5692_v49 }
 0xd96   :  { %v1587_v24 = vadd.f32 1e-05, %v1584_v62 }
 0xd98   :  { %5075 = vrsqrt.f32 %v1587_v24  ;;  %vm1596_vm13 = vweird.f32 %v1587_v24 }
 0xd9b   :  { %v1580_v28 = vpop.xlane.xlu1 %1579 }
 0xd9c   :  { %v1585_v3 = vmul.f32 %v1580_v28, %v5692_v49  ;;  %v4928_v28 = vld [vmem:[#allocation3 + $0x19c] sm:$0xf0] }
 0xd9e   :  { %v5076_v53 = vpop.eup %5075  ;;  %v1588_v11 = vadd.f32 1e-05, %v1585_v3  ;;  %v4684_v3 = vor.u32 %v4928_v28, %v4683_v7  ;;  %v4921_v7 = vld [vmem:[#allocation3 + $0x12c] sm:$0xf0] }
 0xd9f   :  { %v1591_v13 = vmul.f32 %v5076_v53, %v1587_v24  ;;  %vm1597_vm12 = vweird.f32 %v5076_v53 }
 0xda0   :  { %5077 = vrsqrt.f32 %v1588_v11  ;;  %vm1598_vm14 = vmor %vm1596_vm13, %vm1597_vm12  ;;  %vm1606_vm11 = vweird.f32 %v1588_v11  ;;  %1955 = vmatpush.bf16.msra.mxu2 %v4684_v3 }
 0xda1   :  { %v1592_v22 = vmul.f32 %v5076_v53, %v1591_v13 }
 0xda3   :  { %v1593_v31 = vmul.f32 0.5, %v1592_v22  ;;  %v1583_v44 = vpop.xlane.xlu2 %1582  ;;  %v4675_v22 = vld [vmem:[#allocation3 + $0x178] sm:$0xf] }
 0xda4   :  { %v1586_v55 = vmul.f32 %v1583_v44, %v5692_v49  ;;  %v4643_v44 = vld [vmem:[#allocation3 + $0xf8] sm:$0xf]  ;;  %v4676_v41 = vor.u32 %v4926_v35, %v4675_v22 }
 0xda5   :  { %v1594_v43 = vsub.f32 1.5, %v1593_v31  ;;  %v4648_v31 = vor.u32 %v4919_v16, %v4647_v32 }
 0xda6   :  { %v5078_v47 = vpop.eup %5077  ;;  %v1589_v46 = vadd.f32 1e-05, %v1586_v55 }
 0xda7   :  { %v1595_v18 = vmul.f32 %v5076_v53, %v1594_v43  ;;  %v1601_v30 = vmul.f32 %v5078_v47, %v1588_v11  ;;  %vm1607_vm15 = vweird.f32 %v5078_v47  ;;  %v4651_v11 = vld [vmem:[#allocation3 + $0x118] sm:$0xf]  ;;  %v4671_v43 = vld [vmem:[#allocation3 + $0x168] sm:$0xf] }
 0xda8   :  { %5079 = vrsqrt.f32 %v1589_v46  ;;  %vm1608_vm12 = vmor %vm1606_vm11, %vm1607_vm15  ;;  %v4652_v14 = vor.u32 %v4920_v29, %v4651_v11 }
 0xda9   :  { %v1599_v25 = vsel %vm1598_vm14, %v5076_v53, %v1595_v18  ;;  %v1602_v57 = vmul.f32 %v5078_v47, %v1601_v30  ;;  %v4927_v53 = vld [vmem:[#allocation3 + $0x18c] sm:$0xf0]  ;;  %vm1616_vm14 = vweird.f32 %v1589_v46  ;;  %v4644_v30 = vor.u32 %v4918_v37, %v4643_v44 }
 0xdaa   :  { %v1626_v27 = vperm.slane %v1599_v25, %v5694_v23  ;;  %v1630_v60 = vperm.slane %v1599_v25, %v5696_v50  ;;  %1937 = vmatpush.bf16.msra.mxu1 %v4652_v14 }
 0xdab   :  { %v1603_v61 = vmul.f32 0.5, %v1602_v57 }
 0xdac   :  { %v1653_v58 = vmul.f32 %v1626_v27, %v5701_v52  ;;  %v1654_v19 = vmul.f32 %v1630_v60, %v5703_v54  ;;  %v4667_v60 = vld [vmem:[#allocation3 + $0x158] sm:$0xf] }
 0xdad   :  { %v1604_v36 = vsub.f32 1.5, %v1603_v61  ;;  %v4924_v61 = vld [vmem:[#allocation3 + $0x15c] sm:$0xf0] }
 0xdae   :  { %v5080_v20 = vpop.eup %5079  ;;  %v1662_v45 = vmul.f32 %v1653_v58, %v5742_v51  ;;  %v1663_v0 = vmul.f32 %v5750_v59, %v1654_v19  ;;  %1938 = vmatpush.bf16.msra.mxu1 %v4648_v31  ;;  %v4639_v58 = vld [vmem:[#allocation3 + $0xe8] sm:$0xf]  ;;  %v4917_v19 = vld [vmem:[#allocation3 + $0xec] sm:$0xf0] }
 0xdaf   :  { %v1605_v62 = vmul.f32 %v5078_v47, %v1604_v36  ;;  %v1611_v8 = vmul.f32 %v5080_v20, %v1589_v46  ;;  %vm1617_vm13 = vweird.f32 %v5080_v20  ;;  %v4640_v36 = vor.u32 %v4917_v19, %v4639_v58 }
 0xdb0   :  { %v5762_v12 = vadd.f32 %v1662_v45, %v5747_v34  ;;  %v5765_v24 = vadd.f32 %v5755_v10, %v1663_v0  ;;  %vm1618_vm15 = vmor %vm1616_vm14, %vm1617_vm13  ;;  %v4923_v45 = vld [vmem:[#allocation3 + $0x14c] sm:$0xf0] }
 0xdb1   :  { %v1609_v52 = vsel %vm1608_vm12, %v5078_v47, %v1605_v62  ;;  %v1612_v1 = vmul.f32 %v5080_v20, %v1611_v8  ;;  %v4925_v47 = vld [vmem:[#allocation3 + $0x16c] sm:$0xf0]  ;;  %v4635_v62 = vld [vmem:[#allocation3 + $0xd8] sm:$0xf]  ;;  %v4916_v8 = vld [vmem:[#allocation3 + $0xdc] sm:$0xf0] }
 0xdb2   :  { %1683 = vst [vmem:[#allocation1] ss:$2 sm:$0xff] %v5762_v12  ;;  %v1634_v54 = vperm.slane %v1609_v52, %v5694_v23  ;;  %v1638_v2 = vperm.slane %v1609_v52, %v5696_v50  ;;  %1939 = vmatpush.bf16.msra.mxu1 %v4644_v30  ;;  %v4636_v52 = vor.u32 %v4916_v8, %v4635_v62 }
 0xdb3   :  { %1685 = vst [vmem:[#allocation1 + $0x1] ss:$2 sm:$0xff] %v5765_v24  ;;  %v1613_v38 = vmul.f32 0.5, %v1612_v1  ;;  %v4659_v1 = vld [vmem:[#allocation3 + $0x138] sm:$0xf] }
 0xdb4   :  { %v1655_v4 = vmul.f32 %v1634_v54, %v5712_v56  ;;  %v1656_v5 = vmul.f32 %v1638_v2, %v5714_v42  ;;  %v4680_v42 = vor.u32 %v4927_v53, %v4679_v15  ;;  %v4922_v54 = vld [vmem:[#allocation3 + $0x13c] sm:$0xf0]  ;;  %v4623_v15 = vld [vmem:[#allocation3 + $0xa8] sm:$0xf]  ;;  %v4913_v53 = vld [vmem:[#allocation3 + $0xac] sm:$0xf0] }
 0xdb5   :  { %v1614_v6 = vsub.f32 1.5, %v1613_v38  ;;  %v4660_v2 = vor.u32 %v4922_v54, %v4659_v1  ;;  %v4631_v38 = vld [vmem:[#allocation3 + $0xc8] sm:$0xf]  ;;  %v4624_v11 = vor.u32 %v4913_v53, %v4623_v15 }
 0xdb6   :  { %v1664_v9 = vmul.f32 %v1655_v4, %v5742_v51  ;;  %v1665_v17 = vmul.f32 %v5750_v59, %v1656_v5  ;;  %1956 = vmatpush.bf16.msra.mxu2 %v4680_v42  ;;  %1940 = vmatpush.bf16.msra.mxu1 %v4640_v36  ;;  %v4915_v4 = vld [vmem:[#allocation3 + $0xcc] sm:$0xf0] }
 0xdb7   :  { %v1615_v33 = vmul.f32 %v5080_v20, %v1614_v6  ;;  %v4632_v5 = vor.u32 %v4915_v4, %v4631_v38  ;;  %v4655_v6 = vld [vmem:[#allocation3 + $0x128] sm:$0xf] }
 0xdb8   :  { %v5776_v13 = vadd.f32 %v1664_v9, %v5747_v34  ;;  %v5779_v56 = vadd.f32 %v5755_v10, %v1665_v17  ;;  %v4656_v28 = vor.u32 %v4921_v7, %v4655_v6  ;;  %v4627_v9 = vld [vmem:[#allocation3 + $0xb8] sm:$0xf]  ;;  %v4914_v17 = vld [vmem:[#allocation3 + $0xbc] sm:$0xf0] }
 0xdb9   :  { %v1619_v21 = vsel %vm1618_vm15, %v5080_v20, %v1615_v33  ;;  %v4663_v20 = vld [vmem:[#allocation3 + $0x148] sm:$0xf]  ;;  %v4628_v3 = vor.u32 %v4914_v17, %v4627_v9  ;;  %v4592_v33 = vld [vmem:[%s6374_s2 + $0x4] ss:$8 sm:$0x3] }
 0xdba   :  { %1687 = vst [vmem:[#allocation1 + $0x10] ss:$2 sm:$0xff] %v5776_v13  ;;  %v1642_v39 = vperm.slane %v1619_v21, %v5694_v23  ;;  %v1646_v40 = vperm.slane %v1619_v21, %v5696_v50  ;;  %1957 = vmatpush.bf16.msra.mxu2 %v4676_v41  ;;  %v1694_v27 = vld.sshfl [vmem:[#allocation1] sm:$0xff pattern:$0x75316420]  ;;  %v4664_v0 = vor.u32 %v4923_v45, %v4663_v20  ;;  %v1713_v42 = vperm.slane %v4592_v33, 1 }
 0xdbb   :  { %1689 = vst [vmem:[#allocation1 + $0x11] ss:$2 sm:$0xff] %v5779_v56  ;;  %1941 = vmatpush.bf16.msra.mxu1 %v4636_v52  ;;  %v1712_v21 = vperm.slane %v4592_v33, 0 }
 0xdbc   :  { %v1657_v48 = vmul.f32 %v1642_v39, %v5724_v63  ;;  %v1658_v55 = vmul.f32 %v1646_v40, %v5726_v26  ;;  %v4672_v63 = vor.u32 %v4925_v47, %v4671_v43 }
 0xdbe   :  { %v1666_v46 = vmul.f32 %v1657_v48, %v5742_v51  ;;  %v1667_v18 = vmul.f32 %v5750_v59, %v1658_v55  ;;  %1958 = vmatpush.bf16.msra.mxu2 %v4672_v63 }
 0xdbf   :  { %1942 = vmatpush.bf16.msra.mxu1 %v4632_v5 }
 0xdc0   :  { %v5790_v25 = vadd.f32 %v1666_v46, %v5747_v34  ;;  %v5793_v57 = vadd.f32 %v5755_v10, %v1667_v18  ;;  %v4668_v10 = vor.u32 %v4924_v61, %v4667_v60  ;;  %v1973_v61 = vld [vmem:[%s6374_s2 + $0x5] ss:$0 sm:$0xff] }
 0xdc2   :  { %v1695_v26 = vld.sshfl [vmem:[#allocation1 + $0x10] sm:$0xff pattern:$0x75316420]  ;;  %1691 = vst [vmem:[#allocation1 + $0x20] ss:$2 sm:$0xff] %v5790_v25  ;;  %1959 = vmatpush.bf16.msra.mxu2 %v4668_v10 }
 0xdc3   :  { %1693 = vst [vmem:[#allocation1 + $0x21] ss:$2 sm:$0xff] %v5793_v57  ;;  %v1700_v51 = vpack.c.bf16 %v1695_v26, %v1694_v27  ;;  %1943 = vmatpush.bf16.msra.mxu1 %v4628_v3 }
 0xdc5   :  { %4617 = vmatmul.msk.bf16.vlgmr.msrb.gmra.mxu3 %vm154_vm1, %v1700_v51  ;;  %4619 = vmatmul.msk.bf16.vlgmr.msra.gmra.mxu0 %vm154_vm1, %v1700_v51 }
 0xdc6   :  { %1960 = vmatpush.bf16.msra.mxu2 %v4664_v0 }
 0xdc7   :  { %1944 = vmatpush.bf16.msra.mxu1 %v4624_v11 }
 0xdca   :  { %v1696_v34 = vld.sshfl [vmem:[#allocation1 + $0x20] sm:$0xff pattern:$0x75316420]  ;;  %1961 = vmatpush.bf16.msra.mxu2 %v4660_v2 }
 0xdcb   :  { %v1701_v59 = vpack.c.bf16 %v1696_v34, %v1696_v34 }
 0xdce   :  { %1962 = vmatpush.bf16.msra.mxu2 %v4656_v28 }
 0xdd5   :  { %4618 = vmatmul.msk.bf16.gmra.mxu3 %vm154_vm1, %v1701_v59  ;;  %4620 = vmatmul.msk.bf16.gmra.mxu0 %vm154_vm1, %v1701_v59 }
 0xe42   :  { %v1790_v29 = vpop.f32.mrf.mxu0 }
 0xe43   :  { %v1791_v32 = vadd.f32 %v1790_v29, %v1713_v42 }
 0xe45   :  { %v1800_v35 = vmax.f32 %v1791_v32, 0.0 }
 0xe48   :  { %v1772_v14 = vpop.f32.mrf.mxu3 }
 0xe49   :  { %v1773_v40 = vadd.f32 %v1772_v14, %v1712_v21 }
 0xe4a   :  { %v1792_v16 = vpop.f32.mrf.mxu0 }
 0xe4b   :  { %v1793_v22 = vadd.f32 %v1792_v16, %v1713_v42  ;;  %v1799_v55 = vmax.f32 %v1773_v40, 0.0 }
 0xe4d   :  { %v1802_v39 = vmax.f32 %v1793_v22, 0.0 }
 0xe4f   :  { %v1806_v31 = vpack.c.bf16 %v1802_v39, %v1800_v35 }
 0xe50   :  { %v1774_v44 = vpop.f32.mrf.mxu3 }
 0xe51   :  { %v1775_v37 = vadd.f32 %v1774_v44, %v1712_v21  ;;  %1963 = vmatmul.bf16.vlgmr.msra.gmra.mxu2 %v1806_v31 }
 0xe52   :  { %v1795_v48 = vpop.f32.mrf.mxu0 }
 0xe53   :  { %v1801_v41 = vmax.f32 %v1775_v37, 0.0  ;;  %v1796_v47 = vadd.f32 %v1795_v48, %v1713_v42 }
 0xe55   :  { %v1805_v43 = vpack.c.bf16 %v1801_v41, %v1799_v55  ;;  %v1804_v30 = vmax.f32 %v1796_v47, 0.0 }
 0xe57   :  { %1945 = vmatmul.bf16.vlgmr.msra.gmra.mxu1 %v1805_v43  ;;  %v1808_v27 = vpack.c.bf16 %v1804_v30, %v1804_v30 }
 0xe58   :  { %v1777_v46 = vpop.f32.mrf.mxu3 }
 0xe59   :  { %v1778_v63 = vadd.f32 %v1777_v46, %v1712_v21 }
 0xe5a   :  { %v1797_v18 = vpop.f32.mrf.mxu0 }
 0xe5b   :  { %v1803_v51 = vmax.f32 %v1778_v63, 0.0 }
 0xe5d   :  { %v1807_v34 = vpack.c.bf16 %v1803_v51, %v1803_v51 }
 0xe60   :  { %v1779_v26 = vpop.f32.mrf.mxu3 }
 0xe61   :  { %1968 = vmatmul.bf16.gmra.mxu2 %v1808_v27 }
 0xe67   :  { %1950 = vmatmul.bf16.gmra.mxu1 %v1807_v34  ;;  %v2230_v34 = vld [vmem:[#allocation6 + $0x30] sm:$0x33] }
 0xed4   :  { %v1946_v59 = vpop.f32.mrf.mxu1  ;;  %v1964_v60 = vpop.f32.mrf.mxu2 }
 0xed5   :  { %v1965_v10 = vadd.f32 %v1964_v60, %v1946_v59  ;;  %v2256_v59 = vunpack.c.l.b16 %v2230_v34  ;;  %v2257_v60 = vunpack.c.h.b16 %v2230_v34 }
 0xed7   :  { %v1974_v58 = vadd.f32 %v1973_v61, %v1965_v10 }
 0xed9   :  { %v1980_v19 = vrot.slane %v1974_v58, 4  ;;  %v1986_v36 = vadd.f32 %v1974_v58, %v5762_v12  ;;  %v2264_v58 = vpack.c.b16 %v2256_v59, %v2256_v59 }
 0xedb   :  { %v1987_v20 = vadd.f32 %v1980_v19, %v5765_v24  ;;  %2000 = vst [vmem:[#allocation1] ss:$2 sm:$0xff] %v1986_v36  ;;  %v2265_v19 = vpack.c.b16 %v2257_v60, %v2257_v60 }
 0xedc   :  { %v1948_v45 = vpop.f32.mrf.mxu1  ;;  %v1966_v0 = vpop.f32.mrf.mxu2 }
 0xedd   :  { %2002 = vst [vmem:[#allocation1 + $0x1] ss:$2 sm:$0xff] %v1987_v20  ;;  %v1967_v62 = vadd.f32 %v1966_v0, %v1948_v45  ;;  %v2282_v45 = vsel %vm161_vm0, %v2265_v19, 0  ;;  %v4703_v0 = vld [vmem:[#allocation6 + $0x20] sm:$0xf] }
 0xede   :  { %2306 = vmatpush.bf16.msrb.mxu0 %v2282_v45 }
 0xedf   :  { %v1975_v8 = vadd.f32 %v1973_v61, %v1967_v62  ;;  %v4934_v62 = vld [vmem:[#allocation6 + $0x24] sm:$0xf0] }
 0xee1   :  { %v1981_v52 = vrot.slane %v1975_v8, 4  ;;  %v1988_v1 = vadd.f32 %v1975_v8, %v5776_v13  ;;  %v4933_v8 = vld [vmem:[#allocation6 + $0x24] sm:$0xf] }
 0xee3   :  { %v1989_v54 = vadd.f32 %v1981_v52, %v5779_v56  ;;  %2004 = vst [vmem:[#allocation1 + $0x10] ss:$2 sm:$0xff] %v1988_v1  ;;  %v4704_v52 = vor.u32 %v4934_v62, %v4703_v0 }
 0xee4   :  { %v2011_v2 = vld.sshfl [vmem:[#allocation1] sm:$0xff pattern:$0x75316420]  ;;  %v1951_v38 = vpop.f32.mrf.mxu1  ;;  %v1969_v4 = vpop.f32.mrf.mxu2 }
 0xee5   :  { %2006 = vst [vmem:[#allocation1 + $0x11] ss:$2 sm:$0xff] %v1989_v54  ;;  %v1970_v5 = vadd.f32 %v1969_v4, %v1951_v38  ;;  %v2017_v12 = vsel %vm154_vm1, %v2011_v2, 0.0  ;;  %v4695_v4 = vld [vmem:[#allocation6 + $0x10] sm:$0xf] }
 0xee6   :  { %2018 = vadd.xlane.f32.xlu0 %v2017_v12  ;;  %v4931_v12 = vld [vmem:[#allocation6 + $0x14] sm:$0xf] }
 0xee7   :  { %v1976_v24 = vadd.f32 %v1973_v61, %v1970_v5  ;;  %v4932_v5 = vld [vmem:[#allocation6 + $0x14] sm:$0xf0] }
 0xee9   :  { %v1982_v6 = vrot.slane %v1976_v24, 4  ;;  %v1990_v7 = vadd.f32 %v1976_v24, %v5790_v25  ;;  %v4696_v24 = vor.u32 %v4932_v5, %v4695_v4 }
 0xeeb   :  { %v1991_v28 = vadd.f32 %v1982_v6, %v5793_v57  ;;  %2008 = vst [vmem:[#allocation1 + $0x20] ss:$2 sm:$0xff] %v1990_v7  ;;  %v4697_v6 = vld [vmem:[#allocation6 + $0x18] sm:$0xf0] }
 0xeec   :  { %v1953_v9 = vpop.f32.mrf.mxu1  ;;  %v1971_v13 = vpop.f32.mrf.mxu2  ;;  %v2012_v17 = vld.sshfl [vmem:[#allocation1 + $0x10] sm:$0xff pattern:$0x75316420] }
 0xeed   :  { %2010 = vst [vmem:[#allocation1 + $0x21] ss:$2 sm:$0xff] %v1991_v28  ;;  %v2020_v56 = vsel %vm154_vm1, %v2012_v17, 0.0  ;;  %v4700_v9 = vor.u32 %v4931_v12, %v4697_v6  ;;  %v4687_v17 = vld [vmem:[#allocation6] sm:$0xf] }
 0xeee   :  { %2021 = vadd.xlane.f32.xlu1 %v2020_v56  ;;  %v4930_v56 = vld [vmem:[#allocation6 + $0x4] sm:$0xf0] }
 0xef4   :  { %v2013_v3 = vld.sshfl [vmem:[#allocation1 + $0x20] sm:$0xff pattern:$0x75316420] }
 0xef5   :  { %v2023_v15 = vsel %vm154_vm1, %v2013_v3, 0.0 }
 0xef6   :  { %2024 = vadd.xlane.f32.xlu2 %v2023_v15  ;;  %v4688_v15 = vor.u32 %v4930_v56, %v4687_v17 }
 0xf59   :  { %v2019_v53 = vpop.xlane.xlu0 %2018 }
 0xf5a   :  { %v2026_v11 = vmul.f32 %v2019_v53, %v5692_v49  ;;  %v4929_v53 = vld [vmem:[#allocation6 + $0x4] sm:$0xf] }
 0xf5c   :  { %v2035_v33 = vperm.slane %v2026_v11, %v5694_v23  ;;  %v2039_v25 = vperm.slane %v2026_v11, %v5696_v50  ;;  %v4689_v11 = vld [vmem:[#allocation6 + $0x8] sm:$0xf0] }
 0xf5e   :  { %v5819_v57 = vsub.f32 %v1986_v36, %v2035_v33  ;;  %v5821_v29 = vsub.f32 %v1987_v20, %v2039_v25  ;;  %v2279_v20 = vsel %vm161_vm0, %v2264_v58, 0  ;;  %v4692_v33 = vor.u32 %v4929_v53, %v4689_v11 }
 0xf5f   :  { %2288 = vmatpush.bf16.msra.mxu3 %v2279_v20 }
 0xf60   :  { %v2068_v42 = vmul.f32 %v5819_v57, %v5819_v57  ;;  %v2069_v14 = vmul.f32 %v5821_v29, %v5821_v29 }
 0xf61   :  { %v2022_v32 = vpop.xlane.xlu1 %2021 }
 0xf62   :  { %2080 = vst [vmem:[#allocation1] ss:$2 sm:$0xff] %v2068_v42  ;;  %v2027_v16 = vmul.f32 %v2022_v32, %v5692_v49 }
 0xf63   :  { %2082 = vst [vmem:[#allocation1 + $0x1] ss:$2 sm:$0xff] %v2069_v14  ;;  %2289 = vmatpush.bf16.msra.mxu3 %v4704_v52 }
 0xf64   :  { %v2043_v21 = vperm.slane %v2027_v16, %v5694_v23  ;;  %v2047_v22 = vperm.slane %v2027_v16, %v5696_v50 }
 0xf66   :  { %v5830_v35 = vsub.f32 %v1988_v1, %v2043_v21  ;;  %v5832_v39 = vsub.f32 %v1989_v54, %v2047_v22  ;;  %v4705_v1 = vld [vmem:[#allocation6 + $0x28] sm:$0xf0]  ;;  %v1992_v22 = vld [vmem:[%s6374_s2 + $0x6] ss:$0 sm:$0xff] }
 0xf67   :  { %v4708_v54 = vor.u32 %v4933_v8, %v4705_v1  ;;  %2290 = vmatpush.bf16.msra.mxu3 %v4696_v24 }
 0xf68   :  { %v2070_v40 = vmul.f32 %v5830_v35, %v5830_v35  ;;  %v2071_v31 = vmul.f32 %v5832_v39, %v5832_v39 }
 0xf69   :  { %v2025_v44 = vpop.xlane.xlu2 %2024  ;;  %2307 = vmatpush.bf16.msrb.mxu0 %v4708_v54 }
 0xf6a   :  { %v2091_v37 = vld.sshfl [vmem:[#allocation1] sm:$0xff pattern:$0x75316420]  ;;  %2084 = vst [vmem:[#allocation1 + $0x10] ss:$2 sm:$0xff] %v2070_v40  ;;  %v2028_v48 = vmul.f32 %v2025_v44, %v5692_v49 }
 0xf6b   :  { %2086 = vst [vmem:[#allocation1 + $0x11] ss:$2 sm:$0xff] %v2071_v31  ;;  %v2097_v55 = vsel %vm154_vm1, %v2091_v37, 0.0  ;;  %2291 = vmatpush.bf16.msra.mxu3 %v4688_v15  ;;  %v1993_v44 = vld [vmem:[%s6374_s2 + $0x7] ss:$0 sm:$0xff] }
 0xf6c   :  { %v2051_v41 = vperm.slane %v2028_v48, %v5694_v23  ;;  %v2055_v43 = vperm.slane %v2028_v48, %v5696_v50  ;;  %2098 = vadd.xlane.f32.xlu0 %v2097_v55  ;;  %v2182_v55 = vrot.slane %v1992_v22, 4 }
 0xf6d   :  { %2308 = vmatpush.bf16.msrb.mxu0 %v4700_v9 }
 0xf6e   :  { %v5842_v47 = vsub.f32 %v1990_v7, %v2051_v41  ;;  %v5844_v46 = vsub.f32 %v1991_v28, %v2055_v43 }
 0xf70   :  { %v2072_v18 = vmul.f32 %v5842_v47, %v5842_v47  ;;  %v2073_v30 = vmul.f32 %v5844_v46, %v5844_v46 }
 0xf71   :  { %2309 = vmatpush.bf16.msrb.mxu0 %v4692_v33 }
 0xf72   :  { %2088 = vst [vmem:[#allocation1 + $0x20] ss:$2 sm:$0xff] %v2072_v18  ;;  %v2092_v63 = vld.sshfl [vmem:[#allocation1 + $0x10] sm:$0xff pattern:$0x75316420] }
 0xf73   :  { %2090 = vst [vmem:[#allocation1 + $0x21] ss:$2 sm:$0xff] %v2073_v30  ;;  %v2100_v27 = vsel %vm154_vm1, %v2092_v63, 0.0  ;;  %v2191_v30 = vrot.slane %v1993_v44, 4 }
 0xf74   :  { %2101 = vadd.xlane.f32.xlu1 %v2100_v27 }
 0xf7a   :  { %v2093_v26 = vld.sshfl [vmem:[#allocation1 + $0x20] sm:$0xff pattern:$0x75316420] }
 0xf7b   :  { %v2103_v51 = vsel %vm154_vm1, %v2093_v26, 0.0 }
 0xf7c   :  { %2104 = vadd.xlane.f32.xlu2 %v2103_v51 }
 0xfdf   :  { %v2099_v61 = vpop.xlane.xlu0 %2098 }
 0xfe0   :  { %v2106_v10 = vmul.f32 %v2099_v61, %v5692_v49 }
 0xfe2   :  { %v2109_v36 = vadd.f32 1e-05, %v2106_v10 }
 0xfe4   :  { %5081 = vrsqrt.f32 %v2109_v36  ;;  %vm2118_vm12 = vweird.f32 %v2109_v36 }
 0xfe7   :  { %v2102_v2 = vpop.xlane.xlu1 %2101 }
 0xfe8   :  { %v2107_v38 = vmul.f32 %v2102_v2, %v5692_v49 }
 0xfea   :  { %v5082_v7 = vpop.eup %5081  ;;  %v2110_v28 = vadd.f32 1e-05, %v2107_v38 }
 0xfeb   :  { %v2113_v13 = vmul.f32 %v5082_v7, %v2109_v36  ;;  %vm2119_vm11 = vweird.f32 %v5082_v7 }
 0xfec   :  { %5083 = vrsqrt.f32 %v2110_v28  ;;  %vm2120_vm13 = vmor %vm2118_vm12, %vm2119_vm11  ;;  %vm2128_vm15 = vweird.f32 %v2110_v28 }
 0xfed   :  { %v2114_v3 = vmul.f32 %v5082_v7, %v2113_v13 }
 0xfef   :  { %v2115_v25 = vmul.f32 0.5, %v2114_v3  ;;  %v2105_v42 = vpop.xlane.xlu2 %2104 }
 0xff0   :  { %v2108_v14 = vmul.f32 %v2105_v42, %v5692_v49 }
 0xff1   :  { %v2116_v32 = vsub.f32 1.5, %v2115_v25 }
 0xff2   :  { %v5084_v16 = vpop.eup %5083  ;;  %v2111_v21 = vadd.f32 1e-05, %v2108_v14 }
 0xff3   :  { %v2117_v40 = vmul.f32 %v5082_v7, %v2116_v32  ;;  %v2123_v31 = vmul.f32 %v5084_v16, %v2110_v28  ;;  %vm2129_vm14 = vweird.f32 %v5084_v16 }
 0xff4   :  { %5085 = vrsqrt.f32 %v2111_v21  ;;  %vm2130_vm11 = vmor %vm2128_vm15, %vm2129_vm14 }
 0xff5   :  { %v2121_v37 = vsel %vm2120_vm13, %v5082_v7, %v2117_v40  ;;  %v2124_v48 = vmul.f32 %v5084_v16, %v2123_v31  ;;  %vm2138_vm13 = vweird.f32 %v2111_v21 }
 0xff6   :  { %v2148_v41 = vperm.slane %v2121_v37, %v5694_v23  ;;  %v2152_v43 = vperm.slane %v2121_v37, %v5696_v50 }
 0xff7   :  { %v2125_v18 = vmul.f32 0.5, %v2124_v48 }
 0xff8   :  { %v2175_v63 = vmul.f32 %v2148_v41, %v5819_v57  ;;  %v2176_v27 = vmul.f32 %v2152_v43, %v5821_v29 }
 0xff9   :  { %v2126_v26 = vsub.f32 1.5, %v2125_v18 }
 0xffa   :  { %v5086_v51 = vpop.eup %5085  ;;  %v2184_v34 = vmul.f32 %v2175_v63, %v1992_v22  ;;  %v2185_v59 = vmul.f32 %v2182_v55, %v2176_v27 }
 0xffb   :  { %v2127_v60 = vmul.f32 %v5084_v16, %v2126_v26  ;;  %v2133_v61 = vmul.f32 %v5086_v51, %v2111_v21  ;;  %vm2139_vm12 = vweird.f32 %v5086_v51 }
 0xffc   :  { %v5867_v10 = vadd.f32 %v2184_v34, %v1993_v44  ;;  %v5869_v58 = vadd.f32 %v2191_v30, %v2185_v59  ;;  %vm2140_vm14 = vmor %vm2138_vm13, %vm2139_vm12 }
 0xffd   :  { %v2131_v19 = vsel %vm2130_vm11, %v5084_v16, %v2127_v60  ;;  %v2134_v36 = vmul.f32 %v5086_v51, %v2133_v61 }
 0xffe   :  { %2205 = vst [vmem:[#allocation1] ss:$2 sm:$0xff] %v5867_v10  ;;  %v2156_v57 = vperm.slane %v2131_v19, %v5694_v23  ;;  %v2160_v29 = vperm.slane %v2131_v19, %v5696_v50 }
 0xfff   :  { %2207 = vst [vmem:[#allocation1 + $0x1] ss:$2 sm:$0xff] %v5869_v58  ;;  %v2135_v20 = vmul.f32 0.5, %v2134_v36 }
0x1000   :  { %v2177_v45 = vmul.f32 %v2156_v57, %v5830_v35  ;;  %v2178_v0 = vmul.f32 %v2160_v29, %v5832_v39 }
0x1001   :  { %v2136_v62 = vsub.f32 1.5, %v2135_v20 }
0x1002   :  { %v2186_v8 = vmul.f32 %v2177_v45, %v1992_v22  ;;  %v2187_v52 = vmul.f32 %v2182_v55, %v2178_v0 }
0x1003   :  { %v2137_v1 = vmul.f32 %v5086_v51, %v2136_v62 }
0x1004   :  { %v5877_v54 = vadd.f32 %v2186_v8, %v1993_v44  ;;  %v5879_v2 = vadd.f32 %v2191_v30, %v2187_v52 }
0x1005   :  { %v2141_v38 = vsel %vm2140_vm14, %v5086_v51, %v2137_v1 }
0x1006   :  { %2209 = vst [vmem:[#allocation1 + $0x10] ss:$2 sm:$0xff] %v5877_v54  ;;  %v2164_v4 = vperm.slane %v2141_v38, %v5694_v23  ;;  %v2168_v35 = vperm.slane %v2141_v38, %v5696_v50  ;;  %v2216_v28 = vld.sshfl [vmem:[#allocation1] sm:$0xff pattern:$0x75316420] }
0x1007   :  { %2211 = vst [vmem:[#allocation1 + $0x11] ss:$2 sm:$0xff] %v5879_v2 }
0x1008   :  { %v2179_v39 = vmul.f32 %v2164_v4, %v5842_v47  ;;  %v2180_v5 = vmul.f32 %v2168_v35, %v5844_v46  ;;  %v2231_v46 = vld [vmem:[%s6376_s4] ss:$8 sm:$0x3] }
0x1009   :  { %v2234_v56 = vperm.slane %v2231_v46, 1  ;;  %v2233_v53 = vperm.slane %v2231_v46, 0 }
0x100a   :  { %v2188_v12 = vmul.f32 %v2179_v39, %v1992_v22  ;;  %v2189_v24 = vmul.f32 %v2182_v55, %v2180_v5 }
0x100c   :  { %v5887_v6 = vadd.f32 %v2188_v12, %v1993_v44  ;;  %v5889_v7 = vadd.f32 %v2191_v30, %v2189_v24 }
0x100e   :  { %2213 = vst [vmem:[#allocation1 + $0x20] ss:$2 sm:$0xff] %v5887_v6  ;;  %v2217_v9 = vld.sshfl [vmem:[#allocation1 + $0x10] sm:$0xff pattern:$0x75316420] }
0x100f   :  { %2215 = vst [vmem:[#allocation1 + $0x21] ss:$2 sm:$0xff] %v5889_v7  ;;  %v2222_v13 = vpack.c.bf16 %v2217_v9, %v2216_v28 }
0x1011   :  { %4709 = vmatmul.msk.bf16.vlgmr.msra.gmra.mxu3 %vm154_vm1, %v2222_v13  ;;  %4711 = vmatmul.msk.bf16.vlgmr.msrb.gmra.mxu0 %vm154_vm1, %v2222_v13 }
0x1016   :  { %v2218_v47 = vld.sshfl [vmem:[#allocation1 + $0x20] sm:$0xff pattern:$0x75316420] }
0x1017   :  { %v2223_v17 = vpack.c.bf16 %v2218_v47, %v2218_v47 }
0x1021   :  { %4710 = vmatmul.msk.bf16.gmra.mxu3 %vm154_vm1, %v2223_v17  ;;  %4712 = vmatmul.msk.bf16.gmra.mxu0 %vm154_vm1, %v2223_v17 }
0x108e   :  { %v2311_v3 = vpop.f32.mrf.mxu0 }
0x108f   :  { %v5900_v15 = vadd.f32 %v2311_v3, %v2234_v56 }
0x1094   :  { %v2293_v11 = vpop.f32.mrf.mxu3 }
0x1095   :  { %v5902_v33 = vadd.f32 %v2293_v11, %v2233_v53 }
0x1096   :  { %v2313_v25 = vpop.f32.mrf.mxu0 }
0x1097   :  { %v5905_v42 = vrot.slane %v5902_v33, 4  ;;  %2326 = vst [vmem:[#allocation1] ss:$2 sm:$0xff] %v5902_v33  ;;  %v5908_v14 = vadd.f32 %v2313_v25, %v2234_v56 }
0x1099   :  { %2328 = vst [vmem:[#allocation1 + $0x1] ss:$2 sm:$0xff] %v5905_v42 }
0x109c   :  { %v2295_v32 = vpop.f32.mrf.mxu3 }
0x109d   :  { %v5911_v16 = vadd.f32 %v2295_v32, %v2233_v53 }
0x109e   :  { %v2316_v21 = vpop.f32.mrf.mxu0 }
0x109f   :  { %v5914_v22 = vrot.slane %v5911_v16, 4  ;;  %2330 = vst [vmem:[#allocation1 + $0x10] ss:$2 sm:$0xff] %v5911_v16  ;;  %v5940_v0 = vadd.f32 %v2316_v21, %v2234_v56 }
0x10a0   :  { %v5917_v40 = vld.sshfl [vmem:[#allocation1] sm:$0xff pattern:$0x75316420] }
0x10a1   :  { %2349 = vst [vmem:[#allocation1] ss:$2 sm:$0xff] %v5902_v33  ;;  %v5945_v8 = vrot.slane %v5940_v0, 4  ;;  %v2345_v46 = vpack.c.bf16 %v5917_v40, %v5917_v40 }
0x10a2   :  { %2351 = vst [vmem:[#allocation1 + $0x1] ss:$2 sm:$0xff] %v5905_v42 }
0x10a3   :  { %2334 = vst [vmem:[#allocation1 + $0x20] ss:$2 sm:$0xff] %v5914_v22  ;;  %v2397_v3 = vunpack.c.l.b16 %v2345_v46 }
0x10a4   :  { %v2298_v31 = vpop.f32.mrf.mxu3 }
0x10a5   :  { %v5922_v44 = vadd.f32 %v2298_v31, %v2233_v53 }
0x10a6   :  { %v5924_v37 = vld.sshfl [vmem:[#allocation1 + $0x10] sm:$0xff pattern:$0x75316420]  ;;  %v2318_v48 = vpop.f32.mrf.mxu0 }
0x10a7   :  { %2353 = vst [vmem:[#allocation1 + $0x10] ss:$2 sm:$0xff] %v5911_v16  ;;  %v2325_v55 = vrot.slane %v5922_v44, 4  ;;  %v2660_v52 = vsel %vm541_vm2, %v5945_v8, %v5922_v44  ;;  %v2346_v13 = vpack.c.bf16 %v5924_v37, %v5924_v37 }
0x10a8   :  { %2336 = vst [vmem:[#allocation1 + $0x21] ss:$2 sm:$0xff] %v5922_v44  ;;  %v2661_v1 = vrot.slane %v2660_v52, 4 }
0x10a9   :  { %2338 = vst [vmem:[#allocation1 + $0x30] ss:$2 sm:$0xff] %v2325_v55  ;;  %v2354_v41 = vld.sshfl [vmem:[#allocation1] sm:$0xff pattern:$0x75316420]  ;;  %v2398_v56 = vunpack.c.l.b16 %v2346_v13 }
0x10aa   :  { %2372 = vst [vmem:[#allocation1] ss:$2 sm:$0xff] %v5902_v33  ;;  %v2368_v18 = vpack.c.bf16 %v2354_v41, %v2354_v41 }
0x10ab   :  { %2374 = vst [vmem:[#allocation1 + $0x1] ss:$2 sm:$0xff] %v5905_v42  ;;  %v2399_v53 = vpack.c.b16 %v2398_v56, %v2397_v3 }
0x10ac   :  { %v2300_v43 = vpop.f32.mrf.mxu3  ;;  %v2402_v51 = vunpack.c.l.b16 %v2368_v18 }
0x10ae   :  { %v2355_v30 = vld.sshfl [vmem:[#allocation1 + $0x10] sm:$0xff pattern:$0x75316420] }
0x10af   :  { %v2339_v63 = vld.sshfl [vmem:[#allocation1 + $0x20] sm:$0xff pattern:$0x75316420]  ;;  %v2369_v27 = vpack.c.bf16 %v2355_v30, %v2355_v30  ;;  %2376 = vst [vmem:[#allocation1 + $0x10] ss:$2 sm:$0xff] %v5911_v16 }
0x10b0   :  { %2359 = vst [vmem:[#allocation1 + $0x21] ss:$2 sm:$0xff] %v5922_v44  ;;  %v2340_v26 = vld.sshfl [vmem:[#allocation1 + $0x30] sm:$0xff pattern:$0x75316420]  ;;  %v2347_v21 = vpack.c.bf16 %v2339_v63, %v2339_v63 }
0x10b1   :  { %2357 = vst [vmem:[#allocation1 + $0x20] ss:$2 sm:$0xff] %v5914_v22  ;;  %v2403_v34 = vunpack.c.l.b16 %v2369_v27  ;;  %v2348_v11 = vpack.c.bf16 %v2340_v26, %v2340_v26 }
0x10b2   :  { %2361 = vst [vmem:[#allocation1 + $0x30] ss:$2 sm:$0xff] %v2325_v55  ;;  %v2429_v37 = vunpack.c.l.b16 %v2347_v21 }
0x10b3   :  { %v2404_v59 = vpack.c.b16 %v2403_v34, %v2402_v51  ;;  %v2430_v31 = vunpack.c.l.b16 %v2348_v11 }
0x10b5   :  { %2405 = vrot.lane.b32.xlu0 %v2404_v59, %s5278_s26  ;;  %v2431_v48 = vpack.c.b16 %v2430_v31, %v2429_v37 }
0x10b8   :  { %v2362_v60 = vld.sshfl [vmem:[#allocation1 + $0x20] sm:$0xff pattern:$0x75316420] }
0x10b9   :  { %v2363_v61 = vld.sshfl [vmem:[#allocation1 + $0x30] sm:$0xff pattern:$0x75316420]  ;;  %v2370_v19 = vpack.c.bf16 %v2362_v60, %v2362_v60  ;;  %2380 = vst [vmem:[#allocation1 + $0x20] ss:$2 sm:$0xff] %v5914_v22 }
0x10ba   :  { %v2371_v36 = vpack.c.bf16 %v2363_v61, %v2363_v61  ;;  %2382 = vst [vmem:[#allocation1 + $0x21] ss:$2 sm:$0xff] %v5922_v44 }
0x10bb   :  { %2384 = vst [vmem:[#allocation1 + $0x30] ss:$2 sm:$0xff] %v2325_v55  ;;  %v2434_v57 = vunpack.c.l.b16 %v2370_v19 }
0x10bc   :  { %v2435_v29 = vunpack.c.l.b16 %v2371_v36 }
0x10be   :  { %v2436_v20 = vpack.c.b16 %v2435_v29, %v2434_v57 }
0x10c0   :  { %2437 = vrot.lane.b32.xlu1 %v2436_v20, %s5278_s26  ;;  %s4521_s26 = sshll.u32 %s5297_s17, 4  ;;  %s4522_s26 = int_to_ptr.vmem [resolvable:$true] %s4521_s26 }
0x10c2   :  { %v5938_v45 = vld.sshfl [vmem:[#allocation1 + $0x30] sm:$0xff pattern:$0x75316420] }
0x10c3   :  { %2613 = vst [vmem:[#allocation1 + $0x30] ss:$2 sm:$0xff] %v2325_v55  ;;  %v2394_v31 = vpack.c.bf16 %v5938_v45, %v5938_v45 }
0x10ca   :  { %v5942_v62 = vld.sshfl [vmem:[#allocation1 + $0x30] sm:$0xff pattern:$0x75316420] }
0x10cb   :  { %2636 = vst [vmem:[#allocation1 + $0x30] ss:$2 sm:$0xff] %v2325_v55 }
0x10d2   :  { %v5950_v38 = vld.sshfl [vmem:[#allocation1 + $0x30] sm:$0xff pattern:$0x75316420] }
0x10d3   :  { %2676 = vst [vmem:[#allocation1 + $0x30] ss:$2 sm:$0xff] %v2661_v1 }
0x10da   :  { %v2679_v4 = vld.sshfl [vmem:[#allocation1 + $0x30] sm:$0xff pattern:$0x75316420]  ;;  %v2680_v35 = vld.sshfl [vmem:[#allocation1 + $0x38] sm:$0xff pattern:$0x75316420] }
0x10db   :  { %v5952_v39 = vpack.c.bf16 %v2680_v35, %v2679_v4  ;;  %2933 = vst [vmem:[#allocation1 + $0x30] ss:$2 sm:$0xff] %v2325_v55  ;;  %v2378_v35 = vld.sshfl [vmem:[#allocation1 + $0x10] sm:$0xff pattern:$0x75316420] }
0x10dc   :  { %v2392_v46 = vpack.c.bf16 %v2378_v35, %v2378_v35 }
0x10e2   :  { %v5954_v5 = vld.sshfl [vmem:[#allocation1 + $0x30] sm:$0xff pattern:$0x75316420] }
0x10e3   :  { %2956 = vst [vmem:[#allocation1 + $0x30] ss:$2 sm:$0xff] %v2325_v55 }
0x10ea   :  { %v5956_v12 = vld.sshfl [vmem:[#allocation1 + $0x30] sm:$0xff pattern:$0x75316420] }
0x10eb   :  { %2979 = vst [vmem:[#allocation1 + $0x30] ss:$2 sm:$0xff] %v5945_v8 }
0x10f2   :  { %v5959_v24 = vld.sshfl [vmem:[#allocation1 + $0x30] sm:$0xff pattern:$0x75316420] }
0x10f3   :  { %3218 = vst [vmem:[#allocation1 + $0x30] ss:$2 sm:$0xff] %v2325_v55 }
0x10fa   :  { %v5961_v28 = vld.sshfl [vmem:[#allocation1 + $0x30] sm:$0xff pattern:$0x75316420] }
0x10fb   :  { %3241 = vst [vmem:[#allocation1 + $0x30] ss:$2 sm:$0xff] %v2325_v55 }
0x1102   :  { %v5963_v9 = vld.sshfl [vmem:[#allocation1 + $0x30] sm:$0xff pattern:$0x75316420] }
0x1103   :  { %3264 = vst [vmem:[#allocation1 + $0x30] ss:$2 sm:$0xff] %v5945_v8 }
0x1127   :  { %v2406_v47 = vpop.permute.xlu0 %2405 }
0x1128   :  { %v2411_v17 = vsel %vm291_vm3, %v2406_v47, 0 }
0x1129   :  { %2420 = vmatpush.bf16.xpose.msrb.mxu1 %v2411_v17  ;;  %v2377_v17 = vld.sshfl [vmem:[#allocation1] sm:$0xff pattern:$0x75316420] }
0x112a   :  { %v2391_v3 = vpack.c.bf16 %v2377_v17, %v2377_v17 }
0x112c   :  { %v2518_v11 = vunpack.c.l.b16 %v2391_v3 }
0x1130   :  { %4713 = vmatmul.msk.bf16.vlgmr.msrb.gmra.mxu1 %vm291_vm3, %v2399_v53  ;;  %v2519_v53 = vunpack.c.l.b16 %v2392_v46 }
0x1132   :  { %v2438_v25 = vpop.permute.xlu1 %2437 }
0x1133   :  { %v2443_v32 = vsel %vm291_vm3, %v2438_v25, 0  ;;  %v2520_v25 = vpack.c.b16 %v2519_v53, %v2518_v11 }
0x1134   :  { %2452 = vmatpush.bf16.xpose.msrb.mxu2 %v2443_v32  ;;  %v2385_v32 = vld.sshfl [vmem:[#allocation1 + $0x20] sm:$0xff pattern:$0x75316420] }
0x113b   :  { %4714 = vmatmul.msk.bf16.vlgmr.msrb.gmra.mxu2 %vm291_vm3, %v2431_v48  ;;  %v2393_v48 = vpack.c.bf16 %v2385_v32, %v2385_v32 }
0x11ad   :  { %v2422_v55 = vpop.f32.mrf.mxu1 }
0x11ae   :  { %v2459_v41 = vmul.f32 0.2773501, %v2422_v55  ;;  %v2551_v55 = vunpack.c.l.b16 %v2394_v31 }
0x11b0   :  { %v2463_v40 = vsel %vm348_vm4, %v2459_v41, -inf }
0x11b1   :  { %2464 = vmax.xlane.f32.xlu2 %v2463_v40 }
0x11b5   :  { %v2424_v43 = vpop.f32.mrf.mxu1 }
0x11b6   :  { %v2460_v18 = vmul.f32 0.2773501, %v2424_v43 }
0x11b8   :  { %v2466_v30 = vsel %vm352_vm5, %v2460_v18, -inf }
0x11b9   :  { %2467 = vmax.xlane.f32.xlu2 %v2466_v30 }
0x11be   :  { %v2454_v27 = vpop.f32.mrf.mxu2 }
0x11bf   :  { %v2461_v26 = vmul.f32 0.2773501, %v2454_v27 }
0x11c1   :  { %v2469_v63 = vsel %vm348_vm4, %v2461_v26, -inf }
0x11c2   :  { %2470 = vmax.xlane.f32.xlu2 %v2469_v63 }
0x11c6   :  { %v2456_v51 = vpop.f32.mrf.mxu2 }
0x11c7   :  { %v2462_v34 = vmul.f32 0.2773501, %v2456_v51 }
0x11c9   :  { %v2472_v59 = vsel %vm352_vm5, %v2462_v34, -inf }
0x11ca   :  { %2473 = vmax.xlane.f32.xlu0 %v2472_v59 }
0x1224   :  { %v2465_v60 = vpop.xlane.xlu2 %2464 }
0x1225   :  { %v2475_v61 = vsub.f32 %v2459_v41, %v2465_v60  ;;  %v2550_v41 = vunpack.c.l.b16 %v2393_v48 }
0x1227   :  { %v2479_v19 = vmul.f32 1.442695, %v2475_v61  ;;  %v2552_v40 = vpack.c.b16 %v2551_v55, %v2550_v41  ;;  %v5996_v41 = vrot.slane %v5900_v15, 4 }
0x1229   :  { %5087 = vpow2.f32 %v2479_v19 }
0x122c   :  { %v2468_v36 = vpop.xlane.xlu2 %2467 }
0x122d   :  { %v2476_v57 = vsub.f32 %v2460_v18, %v2468_v36 }
0x122f   :  { %v5088_v29 = vpop.eup %5087  ;;  %v2481_v20 = vmul.f32 1.442695, %v2476_v57 }
0x1230   :  { %v2487_v52 = vsel %vm348_vm4, %v5088_v29, 0.0 }
0x1231   :  { %5089 = vpow2.f32 %v2481_v20  ;;  %2488 = vadd.xlane.f32.xlu2 %v2487_v52 }
0x1235   :  { %v2471_v43 = vpop.xlane.xlu2 %2470 }
0x1236   :  { %v2477_v18 = vsub.f32 %v2461_v26, %v2471_v43  ;;  %v2653_v43 = vsel %vm541_vm2, %v5902_v33, %v5996_v41 }
0x1237   :  { %v5090_v1 = vpop.eup %5089 }
0x1238   :  { %v2490_v4 = vsel %vm352_vm5, %v5090_v1, 0.0  ;;  %v2483_v30 = vmul.f32 1.442695, %v2477_v18 }
0x1239   :  { %2491 = vadd.xlane.f32.xlu1 %v2490_v4 }
0x123d   :  { %v2474_v13 = vpop.xlane.xlu0 %2473 }
0x123e   :  { %v2478_v47 = vsub.f32 %v2462_v34, %v2474_v13 }
0x1240   :  { %v2485_v56 = vmul.f32 1.442695, %v2478_v47 }
0x1242   :  { %5091 = vpow2.f32 %v2485_v56 }
0x1243   :  { %5093 = vpow2.f32 %v2483_v30 }
0x1248   :  { %v5092_v21 = vpop.eup %5091 }
0x1249   :  { %v2496_v37 = vsel %vm352_vm5, %v5092_v21, 0.0  ;;  %2521 = vrot.lane.b32.xlu2 %v2520_v25, %s5279_s27  ;;  %v5094_v27 = vpop.eup %5093 }
0x124a   :  { %2497 = vadd.xlane.f32.xlu0 %v2496_v37  ;;  %v2493_v63 = vsel %vm348_vm4, %v5094_v27, 0.0 }
0x1252   :  { %2553 = vrot.lane.b32.xlu1 %v2552_v40, %s5279_s27  ;;  %v2654_v40 = vsel %vm541_vm2, %v5996_v41, %v5902_v33 }
0x1253   :  { %v2655_v18 = vrot.slane %v2654_v40, 4 }
0x1272   :  { %2494 = vadd.xlane.f32.xlu2 %v2493_v63 }
0x12a4   :  { %v2489_v45 = vpop.xlane.xlu2 %2488 }
0x12a5   :  { %5095 = vrcp.f32 %v2489_v45 }
0x12ab   :  { %v5096_v59 = vpop.eup %5095 }
0x12ac   :  { %v2492_v51 = vpop.xlane.xlu1 %2491  ;;  %v2522_v34 = vpop.permute.xlu2 %2521  ;;  %v2503_v61 = vmul.f32 %v5096_v59, %v5088_v29 }
0x12ad   :  { %5097 = vrcp.f32 %v2492_v51  ;;  %v2527_v60 = vsel %vm413_vm6, %v2522_v34, 0 }
0x12ae   :  { %2536 = vmatpush.bf16.msrb.mxu3 %v2527_v60  ;;  %v2507_v36 = vpack.c.bf16 %v2503_v61, %v2503_v61  ;;  %v6011_v60 = vrot.slane %v5908_v14, 4 }
0x12b0   :  { %v2513_v20 = vunpack.c.l.b16 %v2507_v36  ;;  %v2656_v36 = vsel %vm541_vm2, %v5911_v16, %v6011_v60 }
0x12b3   :  { %v5098_v19 = vpop.eup %5097 }
0x12b4   :  { %v2504_v57 = vmul.f32 %v5098_v19, %v5090_v1 }
0x12b6   :  { %v2508_v26 = vpack.c.bf16 %v2504_v57, %v2504_v57 }
0x12b8   :  { %v2514_v52 = vunpack.c.l.b16 %v2508_v26 }
0x12ba   :  { %v2515_v4 = vpack.c.b16 %v2514_v52, %v2513_v20  ;;  %v2657_v20 = vsel %vm541_vm2, %v6011_v60, %v5911_v16 }
0x12bc   :  { %4715 = vmatmul.msk.bf16.vlgmr.msrb.gmra.mxu3 %vm348_vm4, %v2515_v4 }
0x12bd   :  { %v2498_v47 = vpop.xlane.xlu0 %2497 }
0x12be   :  { %5099 = vrcp.f32 %v2498_v47 }
0x12c4   :  { %v2554_v35 = vpop.permute.xlu1 %2553  ;;  %v5100_v46 = vpop.eup %5099 }
0x12c5   :  { %v2559_v13 = vsel %vm413_vm6, %v2554_v35, 0  ;;  %v2506_v56 = vmul.f32 %v5100_v46, %v5092_v21  ;;  %v2658_v46 = vrot.slane %v2657_v20, 4 }
0x12c6   :  { %2568 = vmatpush.bf16.msra.mxu0 %v2559_v13 }
0x12c7   :  { %v2510_v3 = vpack.c.bf16 %v2506_v56, %v2506_v56  ;;  %v2646_v56 = vpack.c.bf16 %v5950_v38, %v5950_v38 }
0x12c9   :  { %v2546_v11 = vunpack.c.l.b16 %v2510_v3 }
0x12e5   :  { %v2495_v17 = vpop.xlane.xlu2 %2494 }
0x12e6   :  { %5101 = vrcp.f32 %v2495_v17 }
0x12ec   :  { %v5102_v29 = vpop.eup %5101 }
0x12ed   :  { %v2505_v53 = vmul.f32 %v5102_v29, %v5094_v27 }
0x12ef   :  { %v2509_v1 = vpack.c.bf16 %v2505_v53, %v2505_v53  ;;  %v2659_v53 = vsel %vm541_vm2, %v5922_v44, %v5945_v8  ;;  %v2623_v8 = vpack.c.bf16 %v5942_v62, %v5942_v62 }
0x12f1   :  { %v2545_v25 = vunpack.c.l.b16 %v2509_v1 }
0x12f3   :  { %v2547_v32 = vpack.c.b16 %v2546_v11, %v2545_v25 }
0x12f5   :  { %4716 = vmatmul.msk.bf16.vlgmr.msra.gmra.mxu0 %vm348_vm4, %v2547_v32 }
0x133f   :  { %v2538_v31 = vpop.f32.mrf.mxu3 }
0x1340   :  { %v2579_v37 = vrot.slane %v2538_v31, 4  ;;  %2581 = vst [vmem:[#allocation1] ss:$2 sm:$0xff] %v2538_v31 }
0x1342   :  { %2583 = vst [vmem:[#allocation1 + $0x1] ss:$2 sm:$0xff] %v2579_v37 }
0x1347   :  { %v2540_v48 = vpop.f32.mrf.mxu3 }
0x1348   :  { %2585 = vst [vmem:[#allocation1 + $0x10] ss:$2 sm:$0xff] %v2540_v48  ;;  %v2737_v48 = vunpack.c.l.b16 %v2646_v56 }
0x1349   :  { %v2592_v55 = vld.sshfl [vmem:[#allocation1] sm:$0xff pattern:$0x75316420] }
0x134a   :  { %2601 = vst [vmem:[#allocation1] ss:$2 sm:$0xff] %v5902_v33 }
0x134b   :  { %2603 = vst [vmem:[#allocation1 + $0x1] ss:$2 sm:$0xff] %v5905_v42 }
0x134c   :  { %2598 = vst.msk [vmem:[#allocation2] sm:$0xff] %vm291_vm3, %v2592_v55 }
0x1352   :  { %v2606_v21 = vld.sshfl [vmem:[#allocation1] sm:$0xff pattern:$0x75316420] }
0x1353   :  { %2624 = vst [vmem:[#allocation1] ss:$2 sm:$0xff] %v5902_v33  ;;  %v2620_v29 = vpack.c.bf16 %v2606_v21, %v2606_v21 }
0x1354   :  { %2626 = vst [vmem:[#allocation1 + $0x1] ss:$2 sm:$0xff] %v5905_v42 }
0x1355   :  { %v2695_v40 = vunpack.c.l.b16 %v2620_v29 }
0x135b   :  { %v2629_v30 = vld.sshfl [vmem:[#allocation1] sm:$0xff pattern:$0x75316420] }
0x135c   :  { %2662 = vst [vmem:[#allocation1] ss:$2 sm:$0xff] %v2653_v43  ;;  %v2643_v19 = vpack.c.bf16 %v2629_v30, %v2629_v30 }
0x135d   :  { %2664 = vst [vmem:[#allocation1 + $0x1] ss:$2 sm:$0xff] %v2655_v18 }
0x135e   :  { %v2702_v52 = vunpack.c.l.b16 %v2643_v19 }
0x1364   :  { %v2667_v47 = vld.sshfl [vmem:[#allocation1] sm:$0xff pattern:$0x75316420]  ;;  %v2668_v17 = vld.sshfl [vmem:[#allocation1 + $0x8] sm:$0xff pattern:$0x75316420] }
0x1365   :  { %v2689_v25 = vpack.c.bf16 %v2668_v17, %v2667_v47 }
0x1367   :  { %v2820_v43 = vunpack.c.l.b16 %v2689_v25 }
0x1372   :  { %v2570_v27 = vpop.f32.mrf.mxu0 }
0x1373   :  { %v2580_v63 = vrot.slane %v2570_v27, 4  ;;  %2587 = vst [vmem:[#allocation1 + $0x11] ss:$2 sm:$0xff] %v2570_v27 }
0x1375   :  { %2589 = vst [vmem:[#allocation1 + $0x20] ss:$2 sm:$0xff] %v2580_v63 }
0x137a   :  { %v2572_v45 = vpop.f32.mrf.mxu0  ;;  %v2593_v51 = vld.sshfl [vmem:[#allocation1 + $0x10] sm:$0xff pattern:$0x75316420] }
0x137b   :  { %2591 = vst [vmem:[#allocation1 + $0x21] ss:$2 sm:$0xff] %v2572_v45 }
0x137c   :  { %2605 = vst [vmem:[#allocation1 + $0x10] ss:$2 sm:$0xff] %v5911_v16 }
0x137d   :  { %2599 = vst.msk [vmem:[#allocation2 + $0x8] sm:$0xff] %vm291_vm3, %v2593_v51 }
0x1382   :  { %v2594_v34 = vld.sshfl [vmem:[#allocation1 + $0x20] sm:$0xff pattern:$0x75316420] }
0x1383   :  { %2609 = vst [vmem:[#allocation1 + $0x20] ss:$2 sm:$0xff] %v5914_v22  ;;  %v2607_v59 = vld.sshfl [vmem:[#allocation1 + $0x10] sm:$0xff pattern:$0x75316420] }
0x1384   :  { %2611 = vst [vmem:[#allocation1 + $0x21] ss:$2 sm:$0xff] %v5922_v44  ;;  %v2621_v13 = vpack.c.bf16 %v2607_v59, %v2607_v59  ;;  %v2730_v59 = vunpack.c.l.b16 %v2623_v8 }
0x1385   :  { %2600 = vst.msk [vmem:[#allocation2 + $0x10] sm:$0xff] %vm291_vm3, %v2594_v34 }
0x1386   :  { %2628 = vst [vmem:[#allocation1 + $0x10] ss:$2 sm:$0xff] %v5911_v16  ;;  %v2696_v32 = vunpack.c.l.b16 %v2621_v13 }
0x1388   :  { %v2697_v21 = vpack.c.b16 %v2696_v32, %v2695_v40 }
0x138b   :  { %v2614_v61 = vld.sshfl [vmem:[#allocation1 + $0x20] sm:$0xff pattern:$0x75316420] }
0x138c   :  { %2632 = vst [vmem:[#allocation1 + $0x20] ss:$2 sm:$0xff] %v5914_v22  ;;  %v2622_v30 = vpack.c.bf16 %v2614_v61, %v2614_v61 }
0x138d   :  { %2634 = vst [vmem:[#allocation1 + $0x21] ss:$2 sm:$0xff] %v5922_v44  ;;  %v2630_v57 = vld.sshfl [vmem:[#allocation1 + $0x10] sm:$0xff pattern:$0x75316420] }
0x138e   :  { %v2644_v26 = vpack.c.bf16 %v2630_v57, %v2630_v57  ;;  %2666 = vst [vmem:[#allocation1 + $0x10] ss:$2 sm:$0xff] %v2656_v36  ;;  %v2729_v51 = vunpack.c.l.b16 %v2622_v30  ;;  %v2860_v36 = vunpack.c.l.b16 %v5952_v39 }
0x1390   :  { %v2703_v4 = vunpack.c.l.b16 %v2644_v26  ;;  %v2731_v57 = vpack.c.b16 %v2730_v59, %v2729_v51 }
0x1392   :  { %v2704_v35 = vpack.c.b16 %v2703_v4, %v2702_v52 }
0x1394   :  { %2705 = vrot.lane.b32.xlu0 %v2704_v35, %s5280_s28  ;;  %v2637_v3 = vld.sshfl [vmem:[#allocation1 + $0x20] sm:$0xff pattern:$0x75316420] }
0x1395   :  { %v2645_v1 = vpack.c.bf16 %v2637_v3, %v2637_v3  ;;  %2672 = vst [vmem:[#allocation1 + $0x20] ss:$2 sm:$0xff] %v2658_v46  ;;  %v2669_v11 = vld.sshfl [vmem:[#allocation1 + $0x10] sm:$0xff pattern:$0x75316420] }
0x1396   :  { %2674 = vst [vmem:[#allocation1 + $0x21] ss:$2 sm:$0xff] %v2659_v53  ;;  %v2670_v31 = vld.sshfl [vmem:[#allocation1 + $0x18] sm:$0xff pattern:$0x75316420] }
0x1397   :  { %v2736_v37 = vunpack.c.l.b16 %v2645_v1  ;;  %v2690_v55 = vpack.c.bf16 %v2670_v31, %v2669_v11 }
0x1399   :  { %v2738_v38 = vpack.c.b16 %v2737_v48, %v2736_v37  ;;  %v2822_v18 = vunpack.c.l.b16 %v2690_v55  ;;  %v2823_v37 = vunpack.c.h.b16 %v2690_v55  ;;  %v2821_v48 = vunpack.c.h.b16 %v2689_v25 }
0x139b   :  { %2739 = vrot.lane.b32.xlu1 %v2738_v38, %s5280_s28  ;;  %v6028_v27 = vpack.c.b16 %v2822_v18, %v2820_v43  ;;  %v2825_v40 = vpack.c.b16 %v2823_v37, %v2821_v48  ;;  %v2861_v43 = vunpack.c.h.b16 %v5952_v39 }
0x139c   :  { %2698 = vrot.lane.b32.xlu0 %v2697_v21, %s5281_s29 }
0x139d   :  { %v2677_v63 = vld.sshfl [vmem:[#allocation1 + $0x20] sm:$0xff pattern:$0x75316420]  ;;  %v2678_v45 = vld.sshfl [vmem:[#allocation1 + $0x28] sm:$0xff pattern:$0x75316420] }
0x139e   :  { %v2691_v34 = vpack.c.bf16 %v2678_v45, %v2677_v63 }
0x13a0   :  { %v2858_v19 = vunpack.c.l.b16 %v2691_v34  ;;  %v2859_v38 = vunpack.c.h.b16 %v2691_v34 }
0x13a2   :  { %v2862_v26 = vpack.c.b16 %v2860_v36, %v2858_v19  ;;  %v2863_v18 = vpack.c.b16 %v2861_v43, %v2859_v38 }
0x13a4   :  { %2732 = vrot.lane.b32.xlu0 %v2731_v57, %s5281_s29  ;;  %s4523_s29 = sshll.u32 %s6379_s7, 4  ;;  %s4524_s29 = int_to_ptr.hbm [resolvable:$true] %s4523_s29 }
0x1406   :  { %v2706_v61 = vpop.permute.xlu0 %2705 }
0x1407   :  { %v2711_v20 = vsel %vm291_vm3, %v2706_v61, 0 }
0x1408   :  { %2720 = vmatpush.bf16.xpose.msra.mxu1 %v2711_v20 }
0x140d   :  { %v2740_v52 = vpop.permute.xlu1 %2739 }
0x140e   :  { %v2699_v4 = vpop.permute.xlu0 %2698  ;;  %v2745_v62 = vsel %vm291_vm3, %v2740_v52, 0 }
0x140f   :  { %4717 = vmatmul.msk.bf16.vlgmr.msra.gmra.mxu1 %vm291_vm3, %v2699_v4  ;;  %2754 = vmatpush.bf16.xpose.msra.mxu2 %v2745_v62 }
0x1416   :  { %v2733_v35 = vpop.permute.xlu0 %2732 }
0x1417   :  { %4718 = vmatmul.msk.bf16.vlgmr.msra.gmra.mxu2 %vm291_vm3, %v2733_v35 }
0x148c   :  { %v2722_v13 = vpop.f32.mrf.mxu1 }
0x148d   :  { %v2761_v47 = vmul.f32 0.2773501, %v2722_v13 }
0x148f   :  { %v2765_v17 = vsel %vm348_vm4, %v2761_v47, -inf }
0x1490   :  { %2766 = vmax.xlane.f32.xlu2 %v2765_v17 }
0x1494   :  { %v2724_v46 = vpop.f32.mrf.mxu1 }
0x1495   :  { %v2762_v56 = vmul.f32 0.2773501, %v2724_v46 }
0x1497   :  { %v2768_v29 = vsel %vm352_vm5, %v2762_v56, -inf }
0x1498   :  { %2769 = vmax.xlane.f32.xlu1 %v2768_v29 }
0x149a   :  { %v2756_v3 = vpop.f32.mrf.mxu2 }
0x149b   :  { %v2763_v53 = vmul.f32 0.2773501, %v2756_v3 }
0x149d   :  { %v2771_v1 = vsel %vm348_vm4, %v2763_v53, -inf }
0x149e   :  { %2772 = vmax.xlane.f32.xlu0 %v2771_v1 }
0x14a2   :  { %v2758_v11 = vpop.f32.mrf.mxu2 }
0x14a3   :  { %v2764_v32 = vmul.f32 0.2773501, %v2758_v11 }
0x14a5   :  { %v2774_v31 = vsel %vm352_vm5, %v2764_v32, -inf }
0x14a6   :  { %2775 = vmax.xlane.f32.xlu2 %v2774_v31 }
0x14b1   :  { %2828 = vrot.lane.b32.xlu1 %v2825_v40, %s5282_s30 }
0x14b9   :  { %2866 = vrot.lane.b32.xlu1 %v2863_v18, %s5282_s30 }
0x1503   :  { %v2767_v21 = vpop.xlane.xlu2 %2766 }
0x1504   :  { %v2777_v30 = vsub.f32 %v2761_v47, %v2767_v21 }
0x1506   :  { %v2781_v8 = vmul.f32 1.442695, %v2777_v30 }
0x1508   :  { %5103 = vpow2.f32 %v2781_v8 }
0x150b   :  { %v2770_v63 = vpop.xlane.xlu1 %2769 }
0x150c   :  { %v2778_v45 = vsub.f32 %v2762_v56, %v2770_v63 }
0x150e   :  { %v5104_v51 = vpop.eup %5103  ;;  %v2783_v59 = vmul.f32 1.442695, %v2778_v45 }
0x150f   :  { %v2789_v55 = vsel %vm348_vm4, %v5104_v51, 0.0 }
0x1510   :  { %5105 = vpow2.f32 %v2783_v59  ;;  %2790 = vadd.xlane.f32.xlu2 %v2789_v55 }
0x1511   :  { %v2773_v25 = vpop.xlane.xlu0 %2772 }
0x1512   :  { %v2779_v19 = vsub.f32 %v2763_v53, %v2773_v25 }
0x1514   :  { %v2785_v34 = vmul.f32 1.442695, %v2779_v19 }
0x1516   :  { %v5106_v36 = vpop.eup %5105  ;;  %5107 = vpow2.f32 %v2785_v34 }
0x1517   :  { %v2792_v39 = vsel %vm352_vm5, %v5106_v36, 0.0 }
0x1518   :  { %2793 = vadd.xlane.f32.xlu2 %v2792_v39 }
0x1519   :  { %v2776_v20 = vpop.xlane.xlu2 %2775 }
0x151a   :  { %v2780_v52 = vsub.f32 %v2764_v32, %v2776_v20 }
0x151c   :  { %v5108_v57 = vpop.eup %5107  ;;  %v2787_v4 = vmul.f32 1.442695, %v2780_v52 }
0x151d   :  { %v2795_v61 = vsel %vm348_vm4, %v5108_v57, 0.0 }
0x151e   :  { %2796 = vadd.xlane.f32.xlu0 %v2795_v61  ;;  %5109 = vpow2.f32 %v2787_v4 }
0x1523   :  { %v2829_v29 = vpop.permute.xlu1 %2828 }
0x1524   :  { %v5110_v62 = vpop.eup %5109 }
0x1525   :  { %v2798_v35 = vsel %vm352_vm5, %v5110_v62, 0.0 }
0x152b   :  { %v2867_v40 = vpop.permute.xlu1 %2866 }
0x1530   :  { %2826 = vrot.lane.b32.xlu2 %v6028_v27, %s5282_s30 }
0x1532   :  { %2864 = vrot.lane.b32.xlu0 %v2862_v26, %s5282_s30 }
0x1559   :  { %2799 = vadd.xlane.f32.xlu2 %v2798_v35 }
0x1583   :  { %v2791_v13 = vpop.xlane.xlu2 %2790 }
0x1584   :  { %5111 = vrcp.f32 %v2791_v13 }
0x158a   :  { %v5112_v17 = vpop.eup %5111 }
0x158b   :  { %v2794_v47 = vpop.xlane.xlu2 %2793  ;;  %v2805_v46 = vmul.f32 %v5112_v17, %v5104_v51 }
0x158c   :  { %5113 = vrcp.f32 %v2794_v47 }
0x158d   :  { %v2809_v3 = vpack.c.bf16 %v2805_v46, %v2805_v46 }
0x158f   :  { %v2815_v32 = vunpack.c.l.b16 %v2809_v3 }
0x1591   :  { %v2797_v48 = vpop.xlane.xlu0 %2796 }
0x1592   :  { %v5114_v56 = vpop.eup %5113  ;;  %5115 = vrcp.f32 %v2797_v48 }
0x1593   :  { %v2806_v27 = vmul.f32 %v5114_v56, %v5106_v36  ;;  %v2827_v53 = vpop.permute.xlu2 %2826 }
0x1594   :  { %v2830_v26 = vsel %vm719_vm7, %v2827_v53, %v2829_v29 }
0x1595   :  { %v2810_v1 = vpack.c.bf16 %v2806_v27, %v2806_v27  ;;  %v2835_v11 = vsel %vm413_vm6, %v2830_v26, 0  ;;  %v2943_v27 = vpack.c.bf16 %v5954_v5, %v5954_v5  ;;  %v2966_v5 = vpack.c.bf16 %v5956_v12, %v5956_v12 }
0x1596   :  { %2844 = vmatpush.bf16.msra.mxu3 %v2835_v11 }
0x1597   :  { %v2816_v31 = vunpack.c.l.b16 %v2810_v1 }
0x1598   :  { %v5116_v30 = vpop.eup %5115 }
0x1599   :  { %v2817_v37 = vpack.c.b16 %v2816_v31, %v2815_v32  ;;  %v2807_v8 = vmul.f32 %v5116_v30, %v5108_v57 }
0x159b   :  { %4719 = vmatmul.msk.bf16.vlgmr.msra.gmra.mxu3 %vm348_vm4, %v2817_v37  ;;  %v2811_v45 = vpack.c.bf16 %v2807_v8, %v2807_v8  ;;  %v3027_v37 = vunpack.c.l.b16 %v2943_v27  ;;  %v3034_v8 = vunpack.c.l.b16 %v2966_v5 }
0x159d   :  { %v2853_v55 = vunpack.c.l.b16 %v2811_v45 }
0x15a4   :  { %v2865_v38 = vpop.permute.xlu0 %2864 }
0x15a5   :  { %v2868_v43 = vsel %vm719_vm7, %v2865_v38, %v2867_v40 }
0x15a6   :  { %v2873_v18 = vsel %vm413_vm6, %v2868_v43, 0 }
0x15a7   :  { %2882 = vmatpush.bf16.msrb.mxu0 %v2873_v18 }
0x15cc   :  { %v2800_v21 = vpop.xlane.xlu2 %2799 }
0x15cd   :  { %5117 = vrcp.f32 %v2800_v21 }
0x15d3   :  { %v5118_v63 = vpop.eup %5117 }
0x15d4   :  { %v2808_v51 = vmul.f32 %v5118_v63, %v5110_v62 }
0x15d6   :  { %v2812_v59 = vpack.c.bf16 %v2808_v51, %v2808_v51 }
0x15d8   :  { %v2854_v25 = vunpack.c.l.b16 %v2812_v59 }
0x15da   :  { %v2855_v19 = vpack.c.b16 %v2854_v25, %v2853_v55 }
0x15dc   :  { %4720 = vmatmul.msk.bf16.vlgmr.msrb.gmra.mxu0 %vm348_vm4, %v2855_v19 }
0x161e   :  { %v2846_v34 = vpop.f32.mrf.mxu3 }
0x161f   :  { %v2893_v36 = vrot.slane %v2846_v34, 4  ;;  %2895 = vst [vmem:[#allocation1] ss:$2 sm:$0xff] %v2846_v34 }
0x1621   :  { %2897 = vst [vmem:[#allocation1 + $0x1] ss:$2 sm:$0xff] %v2893_v36 }
0x1626   :  { %v2848_v39 = vpop.f32.mrf.mxu3 }
0x1627   :  { %2899 = vst [vmem:[#allocation1 + $0x10] ss:$2 sm:$0xff] %v2848_v39 }
0x1628   :  { %v6059_v61 = vld.sshfl [vmem:[#allocation1] sm:$0xff pattern:$0x75316420] }
0x1629   :  { %2921 = vst [vmem:[#allocation1] ss:$2 sm:$0xff] %v5902_v33 }
0x162a   :  { %2923 = vst [vmem:[#allocation1 + $0x1] ss:$2 sm:$0xff] %v5905_v42 }
0x1631   :  { %v2926_v57 = vld.sshfl [vmem:[#allocation1] sm:$0xff pattern:$0x75316420] }
0x1632   :  { %2944 = vst [vmem:[#allocation1] ss:$2 sm:$0xff] %v5902_v33  ;;  %v2940_v47 = vpack.c.bf16 %v2926_v57, %v2926_v57 }
0x1633   :  { %2946 = vst [vmem:[#allocation1 + $0x1] ss:$2 sm:$0xff] %v5905_v42 }
0x1634   :  { %v2992_v56 = vunpack.c.l.b16 %v2940_v47 }
0x163a   :  { %v2949_v20 = vld.sshfl [vmem:[#allocation1] sm:$0xff pattern:$0x75316420] }
0x163b   :  { %2967 = vst [vmem:[#allocation1] ss:$2 sm:$0xff] %v5900_v15  ;;  %v2963_v53 = vpack.c.bf16 %v2949_v20, %v2949_v20 }
0x163c   :  { %2969 = vst [vmem:[#allocation1 + $0x1] ss:$2 sm:$0xff] %v5996_v41 }
0x163d   :  { %v2999_v48 = vunpack.c.l.b16 %v2963_v53 }
0x1659   :  { %v2884_v52 = vpop.f32.mrf.mxu0 }
0x165a   :  { %v2894_v4 = vrot.slane %v2884_v52, 4  ;;  %2901 = vst [vmem:[#allocation1 + $0x11] ss:$2 sm:$0xff] %v2884_v52 }
0x165c   :  { %2903 = vst [vmem:[#allocation1 + $0x20] ss:$2 sm:$0xff] %v2894_v4 }
0x1661   :  { %v2886_v62 = vpop.f32.mrf.mxu0  ;;  %v6067_v35 = vld.sshfl [vmem:[#allocation1 + $0x10] sm:$0xff pattern:$0x75316420] }
0x1662   :  { %2905 = vst [vmem:[#allocation1 + $0x21] ss:$2 sm:$0xff] %v2886_v62 }
0x1663   :  { %2925 = vst [vmem:[#allocation1 + $0x10] ss:$2 sm:$0xff] %v5911_v16 }
0x1669   :  { %v6070_v13 = vld.sshfl [vmem:[#allocation1 + $0x20] sm:$0xff pattern:$0x75316420] }
0x166a   :  { %2929 = vst [vmem:[#allocation1 + $0x20] ss:$2 sm:$0xff] %v5914_v22  ;;  %v2927_v17 = vld.sshfl [vmem:[#allocation1 + $0x10] sm:$0xff pattern:$0x75316420] }
0x166b   :  { %2931 = vst [vmem:[#allocation1 + $0x21] ss:$2 sm:$0xff] %v5922_v44  ;;  %v2941_v46 = vpack.c.bf16 %v2927_v17, %v2927_v17 }
0x166c   :  { %2948 = vst [vmem:[#allocation1 + $0x10] ss:$2 sm:$0xff] %v5911_v16 }
0x166d   :  { %v2993_v29 = vunpack.c.l.b16 %v2941_v46 }
0x166f   :  { %v2994_v3 = vpack.c.b16 %v2993_v29, %v2992_v56 }
0x1671   :  { %2995 = vrot.lane.b32.xlu1 %v2994_v3, %s5283_s8 }
0x1672   :  { %v2934_v26 = vld.sshfl [vmem:[#allocation1 + $0x20] sm:$0xff pattern:$0x75316420] }
0x1673   :  { %v2950_v1 = vld.sshfl [vmem:[#allocation1 + $0x10] sm:$0xff pattern:$0x75316420]  ;;  %v2942_v11 = vpack.c.bf16 %v2934_v26, %v2934_v26  ;;  %2952 = vst [vmem:[#allocation1 + $0x20] ss:$2 sm:$0xff] %v5914_v22 }
0x1674   :  { %v2964_v32 = vpack.c.bf16 %v2950_v1, %v2950_v1  ;;  %2971 = vst [vmem:[#allocation1 + $0x10] ss:$2 sm:$0xff] %v5908_v14 }
0x1675   :  { %v3026_v31 = vunpack.c.l.b16 %v2942_v11  ;;  %2954 = vst [vmem:[#allocation1 + $0x21] ss:$2 sm:$0xff] %v5922_v44 }
0x1676   :  { %v3000_v40 = vunpack.c.l.b16 %v2964_v32 }
0x1677   :  { %v3028_v38 = vpack.c.b16 %v3027_v37, %v3026_v31 }
0x1678   :  { %v3001_v43 = vpack.c.b16 %v3000_v40, %v2999_v48 }
0x1679   :  { %3029 = vrot.lane.b32.xlu1 %v3028_v38, %s5283_s8 }
0x167a   :  { %3002 = vrot.lane.b32.xlu0 %v3001_v43, %s5284_s9 }
0x167c   :  { %v2957_v18 = vld.sshfl [vmem:[#allocation1 + $0x20] sm:$0xff pattern:$0x75316420] }
0x167d   :  { %v2965_v21 = vpack.c.bf16 %v2957_v18, %v2957_v18  ;;  %2975 = vst [vmem:[#allocation1 + $0x20] ss:$2 sm:$0xff] %v6011_v60 }
0x167e   :  { %2977 = vst [vmem:[#allocation1 + $0x21] ss:$2 sm:$0xff] %v5940_v0 }
0x167f   :  { %v3033_v30 = vunpack.c.l.b16 %v2965_v21 }
0x1681   :  { %v3035_v63 = vpack.c.b16 %v3034_v8, %v3033_v30  ;;  %v2973_v30 = vld.sshfl [vmem:[#allocation1 + $0x10] sm:$0xff pattern:$0x75316420] }
0x1683   :  { %3036 = vrot.lane.b32.xlu0 %v3035_v63, %s5284_s9  ;;  %v2972_v63 = vld.sshfl [vmem:[#allocation1] sm:$0xff pattern:$0x75316420] }
0x16e3   :  { %v2996_v59 = vpop.permute.xlu1 %2995 }
0x16eb   :  { %v3030_v25 = vpop.permute.xlu1 %3029 }
0x16ec   :  { %v3003_v45 = vpop.permute.xlu0 %3002 }
0x16ed   :  { %v3008_v51 = vsel %vm291_vm3, %v3003_v45, 0 }
0x16ee   :  { %3017 = vmatpush.bf16.xpose.msrb.mxu1 %v3008_v51  ;;  %v2987_v51 = vpack.c.bf16 %v2973_v30, %v2973_v30 }
0x16f5   :  { %v3037_v55 = vpop.permute.xlu0 %3036  ;;  %4721 = vmatmul.msk.bf16.vlgmr.msrb.gmra.mxu1 %vm291_vm3, %v2996_v59  ;;  %v2980_v59 = vld.sshfl [vmem:[#allocation1 + $0x20] sm:$0xff pattern:$0x75316420] }
0x16f6   :  { %v3042_v12 = vsel %vm291_vm3, %v3037_v55, 0  ;;  %v2986_v55 = vpack.c.bf16 %v2972_v63, %v2972_v63 }
0x16f7   :  { %3051 = vmatpush.bf16.xpose.msrb.mxu2 %v3042_v12  ;;  %v2988_v12 = vpack.c.bf16 %v2980_v59, %v2980_v59 }
0x16fe   :  { %4722 = vmatmul.msk.bf16.vlgmr.msrb.gmra.mxu2 %vm291_vm3, %v3030_v25  ;;  %v3118_v25 = vunpack.c.l.b16 %v2987_v51 }
0x1772   :  { %v3019_v19 = vpop.f32.mrf.mxu1 }
0x1773   :  { %v3058_v34 = vmul.f32 0.2773501, %v3019_v19  ;;  %v2989_v19 = vpack.c.bf16 %v5959_v24, %v5959_v24 }
0x1775   :  { %v3062_v36 = vsel %vm348_vm4, %v3058_v34, -inf }
0x1776   :  { %3063 = vmax.xlane.f32.xlu0 %v3062_v36  ;;  %v3149_v36 = vunpack.c.l.b16 %v2988_v12 }
0x177a   :  { %v3021_v39 = vpop.f32.mrf.mxu1 }
0x177b   :  { %v3059_v57 = vmul.f32 0.2773501, %v3021_v39 }
0x177d   :  { %v3065_v20 = vsel %vm352_vm5, %v3059_v57, -inf }
0x177e   :  { %3066 = vmax.xlane.f32.xlu1 %v3065_v20 }
0x1781   :  { %v3053_v52 = vpop.f32.mrf.mxu2 }
0x1782   :  { %v3060_v4 = vmul.f32 0.2773501, %v3053_v52 }
0x1784   :  { %v3068_v62 = vsel %vm348_vm4, %v3060_v4, -inf }
0x1785   :  { %3069 = vmax.xlane.f32.xlu2 %v3068_v62 }
0x1789   :  { %v3055_v47 = vpop.f32.mrf.mxu2 }
0x178a   :  { %v3061_v17 = vmul.f32 0.2773501, %v3055_v47 }
0x178c   :  { %v3071_v46 = vsel %vm352_vm5, %v3061_v17, -inf }
0x178d   :  { %3072 = vmax.xlane.f32.xlu2 %v3071_v46 }
0x17e9   :  { %v3064_v56 = vpop.xlane.xlu0 %3063 }
0x17ea   :  { %v3074_v29 = vsub.f32 %v3058_v34, %v3064_v56  ;;  %v3117_v34 = vunpack.c.l.b16 %v2986_v55 }
0x17ec   :  { %v3078_v3 = vmul.f32 1.442695, %v3074_v29  ;;  %v3119_v39 = vpack.c.b16 %v3118_v25, %v3117_v34 }
0x17ee   :  { %5119 = vpow2.f32 %v3078_v3 }
0x17f1   :  { %v3067_v27 = vpop.xlane.xlu1 %3066 }
0x17f2   :  { %v3075_v53 = vsub.f32 %v3059_v57, %v3067_v27  ;;  %v3150_v57 = vunpack.c.l.b16 %v2989_v19 }
0x17f4   :  { %v5120_v26 = vpop.eup %5119  ;;  %v3080_v1 = vmul.f32 1.442695, %v3075_v53  ;;  %v3151_v20 = vpack.c.b16 %v3150_v57, %v3149_v36 }
0x17f5   :  { %v3086_v11 = vsel %vm348_vm4, %v5120_v26, 0.0 }
0x17f6   :  { %5121 = vpow2.f32 %v3080_v1  ;;  %3087 = vadd.xlane.f32.xlu2 %v3086_v11 }
0x17f8   :  { %v3070_v32 = vpop.xlane.xlu2 %3069 }
0x17f9   :  { %v3076_v31 = vsub.f32 %v3060_v4, %v3070_v32 }
0x17fb   :  { %v3082_v37 = vmul.f32 1.442695, %v3076_v31 }
0x17fc   :  { %v5122_v48 = vpop.eup %5121 }
0x17fd   :  { %5123 = vpow2.f32 %v3082_v37  ;;  %v3089_v40 = vsel %vm352_vm5, %v5122_v48, 0.0 }
0x17fe   :  { %3090 = vadd.xlane.f32.xlu2 %v3089_v40 }
0x1800   :  { %v3073_v38 = vpop.xlane.xlu2 %3072 }
0x1801   :  { %v3077_v43 = vsub.f32 %v3061_v17, %v3073_v38 }
0x1803   :  { %v5124_v5 = vpop.eup %5123  ;;  %v3084_v18 = vmul.f32 1.442695, %v3077_v43 }
0x1804   :  { %v3092_v21 = vsel %vm348_vm4, %v5124_v5, 0.0 }
0x1805   :  { %5125 = vpow2.f32 %v3084_v18  ;;  %3093 = vadd.xlane.f32.xlu0 %v3092_v21 }
0x180b   :  { %v5126_v8 = vpop.eup %5125 }
0x180c   :  { %v3095_v45 = vsel %vm352_vm5, %v5126_v8, 0.0 }
0x180d   :  { %3096 = vadd.xlane.f32.xlu1 %v3095_v45 }
0x1816   :  { %3120 = vrot.lane.b32.xlu2 %v3119_v39, %s5285_s10 }
0x1819   :  { %3152 = vrot.lane.b32.xlu0 %v3151_v20, %s5285_s10 }
0x1869   :  { %v3088_v52 = vpop.xlane.xlu2 %3087 }
0x186a   :  { %5127 = vrcp.f32 %v3088_v52 }
0x1870   :  { %v5128_v62 = vpop.eup %5127 }
0x1871   :  { %v3091_v4 = vpop.xlane.xlu2 %3090  ;;  %v3102_v47 = vmul.f32 %v5128_v62, %v5120_v26 }
0x1872   :  { %5129 = vrcp.f32 %v3091_v4 }
0x1873   :  { %v3106_v56 = vpack.c.bf16 %v3102_v47, %v3102_v47 }
0x1875   :  { %v3112_v53 = vunpack.c.l.b16 %v3106_v56 }
0x1878   :  { %v5130_v17 = vpop.eup %5129  ;;  %v3094_v46 = vpop.xlane.xlu0 %3093 }
0x1879   :  { %v3103_v29 = vmul.f32 %v5130_v17, %v5122_v48  ;;  %v3121_v24 = vpop.permute.xlu2 %3120  ;;  %5131 = vrcp.f32 %v3094_v46 }
0x187a   :  { %v3126_v3 = vsel %vm413_vm6, %v3121_v24, 0 }
0x187b   :  { %v3107_v27 = vpack.c.bf16 %v3103_v29, %v3103_v29  ;;  %3135 = vmatpush.bf16.msrb.mxu3 %v3126_v3 }
0x187d   :  { %v3113_v1 = vunpack.c.l.b16 %v3107_v27 }
0x187f   :  { %v3114_v11 = vpack.c.b16 %v3113_v1, %v3112_v53  ;;  %v5132_v31 = vpop.eup %5131 }
0x1880   :  { %v3097_v32 = vpop.xlane.xlu1 %3096  ;;  %v3104_v37 = vmul.f32 %v5132_v31, %v5124_v5 }
0x1881   :  { %5133 = vrcp.f32 %v3097_v32  ;;  %4723 = vmatmul.msk.bf16.vlgmr.msrb.gmra.mxu3 %vm348_vm4, %v3114_v11 }
0x1882   :  { %v3108_v40 = vpack.c.bf16 %v3104_v37, %v3104_v37 }
0x1884   :  { %v3144_v18 = vunpack.c.l.b16 %v3108_v40 }
0x1887   :  { %v5134_v26 = vpop.eup %5133 }
0x1888   :  { %v3105_v38 = vmul.f32 %v5134_v26, %v5126_v8 }
0x188a   :  { %v3109_v43 = vpack.c.bf16 %v3105_v38, %v3105_v38 }
0x188b   :  { %v3153_v48 = vpop.permute.xlu0 %3152 }
0x188c   :  { %v3145_v21 = vunpack.c.l.b16 %v3109_v43  ;;  %v3158_v30 = vsel %vm413_vm6, %v3153_v48, 0 }
0x188d   :  { %3167 = vmatpush.bf16.msra.mxu0 %v3158_v30 }
0x188e   :  { %v3146_v63 = vpack.c.b16 %v3145_v21, %v3144_v18 }
0x1890   :  { %4724 = vmatmul.msk.bf16.vlgmr.msra.gmra.mxu0 %vm348_vm4, %v3146_v63 }
0x1904   :  { %v3137_v45 = vpop.f32.mrf.mxu3 }
0x1905   :  { %v3178_v51 = vrot.slane %v3137_v45, 4  ;;  %3180 = vst [vmem:[#allocation1] ss:$2 sm:$0xff] %v3137_v45 }
0x1907   :  { %3182 = vst [vmem:[#allocation1 + $0x1] ss:$2 sm:$0xff] %v3178_v51 }
0x190c   :  { %v3139_v59 = vpop.f32.mrf.mxu3 }
0x190d   :  { %3184 = vst [vmem:[#allocation1 + $0x10] ss:$2 sm:$0xff] %v3139_v59  ;;  %v3169_v5 = vpop.f32.mrf.mxu0 }
0x190e   :  { %v6108_v55 = vld.sshfl [vmem:[#allocation1] sm:$0xff pattern:$0x75316420]  ;;  %v3179_v8 = vrot.slane %v3169_v5, 4  ;;  %3186 = vst [vmem:[#allocation1 + $0x11] ss:$2 sm:$0xff] %v3169_v5 }
0x190f   :  { %3206 = vst [vmem:[#allocation1] ss:$2 sm:$0xff] %v5902_v33 }
0x1910   :  { %3208 = vst [vmem:[#allocation1 + $0x1] ss:$2 sm:$0xff] %v5905_v42 }
0x1911   :  { %3188 = vst [vmem:[#allocation1 + $0x20] ss:$2 sm:$0xff] %v3179_v8 }
0x1915   :  { %v3171_v12 = vpop.f32.mrf.mxu0  ;;  %v6112_v25 = vld.sshfl [vmem:[#allocation1 + $0x10] sm:$0xff pattern:$0x75316420] }
0x1916   :  { %3190 = vst [vmem:[#allocation1 + $0x21] ss:$2 sm:$0xff] %v3171_v12 }
0x1917   :  { %3210 = vst [vmem:[#allocation1 + $0x10] ss:$2 sm:$0xff] %v5911_v16  ;;  %v3211_v19 = vld.sshfl [vmem:[#allocation1] sm:$0xff pattern:$0x75316420] }
0x1918   :  { %3229 = vst [vmem:[#allocation1] ss:$2 sm:$0xff] %v5902_v33  ;;  %v3225_v36 = vpack.c.bf16 %v3211_v19, %v3211_v19 }
0x1919   :  { %3231 = vst [vmem:[#allocation1 + $0x1] ss:$2 sm:$0xff] %v5905_v42  ;;  %v3228_v42 = vpack.c.bf16 %v5961_v28, %v5961_v28  ;;  %v3251_v28 = vpack.c.bf16 %v5963_v9, %v5963_v9 }
0x191a   :  { %v3277_v52 = vunpack.c.l.b16 %v3225_v36 }
0x191b   :  { %v3312_v29 = vunpack.c.l.b16 %v3228_v42  ;;  %v3319_v53 = vunpack.c.l.b16 %v3251_v28 }
0x191d   :  { %v6117_v34 = vld.sshfl [vmem:[#allocation1 + $0x20] sm:$0xff pattern:$0x75316420] }
0x191e   :  { %3214 = vst [vmem:[#allocation1 + $0x20] ss:$2 sm:$0xff] %v5914_v22  ;;  %v3212_v39 = vld.sshfl [vmem:[#allocation1 + $0x10] sm:$0xff pattern:$0x75316420] }
0x191f   :  { %3216 = vst [vmem:[#allocation1 + $0x21] ss:$2 sm:$0xff] %v5922_v44  ;;  %v3226_v57 = vpack.c.bf16 %v3212_v39, %v3212_v39 }
0x1920   :  { %3233 = vst [vmem:[#allocation1 + $0x10] ss:$2 sm:$0xff] %v5911_v16  ;;  %v3234_v20 = vld.sshfl [vmem:[#allocation1] sm:$0xff pattern:$0x75316420] }
0x1921   :  { %v3278_v4 = vunpack.c.l.b16 %v3226_v57  ;;  %3252 = vst [vmem:[#allocation1] ss:$2 sm:$0xff] %v5900_v15  ;;  %v3248_v62 = vpack.c.bf16 %v3234_v20, %v3234_v20 }
0x1922   :  { %3254 = vst [vmem:[#allocation1 + $0x1] ss:$2 sm:$0xff] %v5996_v41 }
0x1923   :  { %v3279_v33 = vpack.c.b16 %v3278_v4, %v3277_v52  ;;  %v3284_v15 = vunpack.c.l.b16 %v3248_v62 }
0x1925   :  { %3280 = vrot.lane.b32.xlu2 %v3279_v33, %s5286_s11 }
0x1926   :  { %v3219_v47 = vld.sshfl [vmem:[#allocation1 + $0x20] sm:$0xff pattern:$0x75316420] }
0x1927   :  { %v3235_v17 = vld.sshfl [vmem:[#allocation1 + $0x10] sm:$0xff pattern:$0x75316420]  ;;  %v3227_v46 = vpack.c.bf16 %v3219_v47, %v3219_v47  ;;  %3237 = vst [vmem:[#allocation1 + $0x20] ss:$2 sm:$0xff] %v5914_v22 }
0x1928   :  { %v3249_v16 = vpack.c.bf16 %v3235_v17, %v3235_v17  ;;  %3256 = vst [vmem:[#allocation1 + $0x10] ss:$2 sm:$0xff] %v5908_v14 }
0x1929   :  { %v3311_v56 = vunpack.c.l.b16 %v3227_v46  ;;  %3239 = vst [vmem:[#allocation1 + $0x21] ss:$2 sm:$0xff] %v5922_v44  ;;  %v3257_v59 = vld.sshfl [vmem:[#allocation1] sm:$0xff pattern:$0x75316420] }
0x192a   :  { %v3285_v41 = vunpack.c.l.b16 %v3249_v16  ;;  %v3271_v8 = vpack.c.bf16 %v3257_v59, %v3257_v59 }
0x192b   :  { %v3313_v24 = vpack.c.b16 %v3312_v29, %v3311_v56 }
0x192c   :  { %v3286_v3 = vpack.c.b16 %v3285_v41, %v3284_v15  ;;  %v3402_v19 = vunpack.c.l.b16 %v3271_v8 }
0x192d   :  { %3314 = vrot.lane.b32.xlu0 %v3313_v24, %s5286_s11 }
0x192e   :  { %3287 = vrot.lane.b32.xlu1 %v3286_v3, %s5287_s12 }
0x192f   :  { %v3258_v51 = vld.sshfl [vmem:[#allocation1 + $0x10] sm:$0xff pattern:$0x75316420] }
0x1930   :  { %v3242_v27 = vld.sshfl [vmem:[#allocation1 + $0x20] sm:$0xff pattern:$0x75316420]  ;;  %v3272_v5 = vpack.c.bf16 %v3258_v51, %v3258_v51 }
0x1931   :  { %v3250_v22 = vpack.c.bf16 %v3242_v27, %v3242_v27  ;;  %3260 = vst [vmem:[#allocation1 + $0x20] ss:$2 sm:$0xff] %v6011_v60 }
0x1932   :  { %3262 = vst [vmem:[#allocation1 + $0x21] ss:$2 sm:$0xff] %v5940_v0  ;;  %v3403_v12 = vunpack.c.l.b16 %v3272_v5 }
0x1933   :  { %v3318_v14 = vunpack.c.l.b16 %v3250_v22 }
0x1934   :  { %v3404_v36 = vpack.c.b16 %v3403_v12, %v3402_v19 }
0x1935   :  { %v3320_v44 = vpack.c.b16 %v3319_v53, %v3318_v14  ;;  %v3266_v14 = vld.sshfl [vmem:[#allocation1 + $0x30] sm:$0xff pattern:$0x75316420] }
0x1937   :  { %3321 = vrot.lane.b32.xlu2 %v3320_v44, %s5287_s12  ;;  %v3274_v44 = vpack.c.bf16 %v3266_v14, %v3266_v14  ;;  %v4935_v14 = vld [vmem:[#allocation6 + $0x3c] sm:$0xf0] }
0x1939   :  { %v3265_v22 = vld.sshfl [vmem:[#allocation1 + $0x20] sm:$0xff pattern:$0x75316420] }
0x193a   :  { %v3273_v53 = vpack.c.bf16 %v3265_v22, %v3265_v22  ;;  %v4731_v22 = vld [vmem:[#allocation6 + $0x38] sm:$0xf] }
0x197f   :  { %v3281_v1 = vpop.permute.xlu2 %3280 }
0x1991   :  { %v3322_v11 = vpop.permute.xlu2 %3321 }
0x1992   :  { %v3327_v32 = vsel %vm291_vm3, %v3322_v11, 0  ;;  %v3434_v11 = vunpack.c.l.b16 %v3273_v53 }
0x1993   :  { %3336 = vmatpush.bf16.xpose.msra.mxu2 %v3327_v32  ;;  %v3435_v32 = vunpack.c.l.b16 %v3274_v44 }
0x199f   :  { %v3315_v31 = vpop.permute.xlu0 %3314 }
0x19a0   :  { %v3288_v37 = vpop.permute.xlu1 %3287  ;;  %4726 = vmatmul.msk.bf16.vlgmr.msra.gmra.mxu2 %vm291_vm3, %v3315_v31  ;;  %v3436_v31 = vpack.c.b16 %v3435_v32, %v3434_v11 }
0x19a1   :  { %v3293_v9 = vsel %vm291_vm3, %v3288_v37, 0 }
0x19a2   :  { %3302 = vmatpush.bf16.xpose.msra.mxu1 %v3293_v9 }
0x19a9   :  { %4725 = vmatmul.msk.bf16.vlgmr.msra.gmra.mxu1 %vm291_vm3, %v3281_v1 }
0x1a23   :  { %v3338_v0 = vpop.f32.mrf.mxu2 }
0x1a24   :  { %v3345_v60 = vmul.f32 0.2773501, %v3338_v0 }
0x1a26   :  { %v3304_v26 = vpop.f32.mrf.mxu1  ;;  %v3353_v40 = vsel %vm348_vm4, %v3345_v60, -inf }
0x1a27   :  { %v3343_v38 = vmul.f32 0.2773501, %v3304_v26  ;;  %3354 = vmax.xlane.f32.xlu0 %v3353_v40 }
0x1a29   :  { %v3347_v43 = vsel %vm348_vm4, %v3343_v38, -inf }
0x1a2a   :  { %3348 = vmax.xlane.f32.xlu1 %v3347_v43 }
0x1a2b   :  { %v3340_v30 = vpop.f32.mrf.mxu2 }
0x1a2c   :  { %v3346_v63 = vmul.f32 0.2773501, %v3340_v30 }
0x1a2e   :  { %v3306_v48 = vpop.f32.mrf.mxu1  ;;  %v3356_v45 = vsel %vm352_vm5, %v3346_v63, -inf }
0x1a2f   :  { %v3344_v18 = vmul.f32 0.2773501, %v3306_v48 }
0x1a31   :  { %v3350_v21 = vsel %vm352_vm5, %v3344_v18, -inf }
0x1a32   :  { %3351 = vmax.xlane.f32.xlu2 %v3350_v21 }
0x1a3a   :  { %3357 = vmax.xlane.f32.xlu2 %v3356_v45 }
0x1a52   :  { %3405 = vrot.lane.b32.xlu2 %v3404_v36, %s5288_s13 }
0x1a5a   :  { %2911 = vrot.lane.b32.xlu2 %v6067_v35, %s5290_s15 }
0x1a62   :  { %3196 = vrot.lane.b32.xlu2 %v6112_v25, %s5289_s14 }
0x1a6a   :  { %2913 = vrot.lane.b32.xlu2 %v6070_v13, %s5290_s15 }
0x1a9a   :  { %v3355_v39 = vpop.xlane.xlu0 %3354 }
0x1a9b   :  { %v3361_v52 = vsub.f32 %v3345_v60, %v3355_v39 }
0x1a9d   :  { %v3349_v57 = vpop.xlane.xlu1 %3348  ;;  %v3367_v33 = vmul.f32 1.442695, %v3361_v52 }
0x1a9e   :  { %v3359_v20 = vsub.f32 %v3343_v38, %v3349_v57 }
0x1aa0   :  { %v3363_v4 = vmul.f32 1.442695, %v3359_v20 }
0x1aa2   :  { %5135 = vpow2.f32 %v3363_v4 }
0x1aa3   :  { %5137 = vpow2.f32 %v3367_v33 }
0x1aa5   :  { %v3352_v42 = vpop.xlane.xlu2 %3351 }
0x1aa6   :  { %v3360_v62 = vsub.f32 %v3344_v18, %v3352_v42 }
0x1aa8   :  { %v5136_v47 = vpop.eup %5135  ;;  %v3365_v17 = vmul.f32 1.442695, %v3360_v62 }
0x1aa9   :  { %v3371_v35 = vsel %vm348_vm4, %v5136_v47, 0.0  ;;  %v5138_v46 = vpop.eup %5137 }
0x1aaa   :  { %5139 = vpow2.f32 %v3365_v17  ;;  %3372 = vadd.xlane.f32.xlu1 %v3371_v35  ;;  %v3377_v15 = vsel %vm348_vm4, %v5138_v46, 0.0 }
0x1aad   :  { %v3358_v25 = vpop.xlane.xlu2 %3357 }
0x1aae   :  { %v3362_v16 = vsub.f32 %v3346_v63, %v3358_v25 }
0x1ab0   :  { %v5140_v13 = vpop.eup %5139  ;;  %v3369_v56 = vmul.f32 1.442695, %v3362_v16  ;;  %v3502_v16 = vld [vmem:[#allocation6 + $0x68] sm:$0x3] }
0x1ab1   :  { %v3374_v29 = vsel %vm352_vm5, %v5140_v13, 0.0 }
0x1ab2   :  { %5141 = vpow2.f32 %v3369_v56  ;;  %3375 = vadd.xlane.f32.xlu0 %v3374_v29  ;;  %3378 = vadd.xlane.f32.xlu1 %v3377_v15  ;;  %v4739_v29 = vld [vmem:[#allocation6 + $0x58] sm:$0xf]  ;;  %v4937_v15 = vld [vmem:[#allocation6 + $0x5c] sm:$0xf0] }
0x1ab5   :  { %v3406_v41 = vpop.permute.xlu2 %3405 }
0x1ab6   :  { %v3411_v24 = vsel %vm413_vm6, %v3406_v41, 0 }
0x1ab7   :  { %3420 = vmatpush.bf16.msra.mxu3 %v3411_v24  ;;  %v4740_v24 = vor.u32 %v4937_v15, %v4739_v29 }
0x1ab8   :  { %v5142_v3 = vpop.eup %5141 }
0x1ab9   :  { %v3380_v28 = vsel %vm352_vm5, %v5142_v3, 0.0 }
0x1aba   :  { %3381 = vadd.xlane.f32.xlu0 %v3380_v28  ;;  %v4936_v28 = vld [vmem:[#allocation6 + $0x4c] sm:$0xf0] }
0x1abd   :  { %v2912_v27 = vpop.permute.xlu2 %2911 }
0x1abe   :  { %2919 = vst.msk [vmem:[#allocation2 + $0x8] sm:$0xff] %vm808_vm8, %v2912_v27 }
0x1ac5   :  { %v3197_v1 = vpop.permute.xlu2 %3196 }
0x1ac6   :  { %3204 = vst.msk [vmem:[#allocation2 + $0x8] sm:$0xff] %vm1094_vm9, %v3197_v1 }
0x1acb   :  { %3437 = vrot.lane.b32.xlu1 %v3436_v31, %s5288_s13 }
0x1acd   :  { %v2914_v37 = vpop.permute.xlu2 %2913 }
0x1ace   :  { %2920 = vst.msk [vmem:[#allocation2 + $0x10] sm:$0xff] %vm808_vm8, %v2914_v37  ;;  %2909 = vrot.lane.b32.xlu0 %v6059_v61, %s5290_s15 }
0x1ad6   :  { %3194 = vrot.lane.b32.xlu0 %v6108_v55, %s5289_s14 }
0x1b1d   :  { %v3373_v9 = vpop.xlane.xlu1 %3372 }
0x1b1e   :  { %5143 = vrcp.f32 %v3373_v9 }
0x1b24   :  { %v5144_v60 = vpop.eup %5143 }
0x1b25   :  { %v3376_v0 = vpop.xlane.xlu0 %3375  ;;  %v3387_v26 = vmul.f32 %v5144_v60, %v5136_v47  ;;  %v3379_v40 = vpop.xlane.xlu1 %3378  ;;  %v3551_v60 = vld [vmem:[%s6376_s4 + $0x1] ss:$0 sm:$0xff] }
0x1b26   :  { %5145 = vrcp.f32 %v3376_v0 }
0x1b27   :  { %5147 = vrcp.f32 %v3379_v40  ;;  %v3391_v48 = vpack.c.bf16 %v3387_v26, %v3387_v26 }
0x1b29   :  { %v3397_v30 = vunpack.c.l.b16 %v3391_v48 }
0x1b2c   :  { %v5146_v38 = vpop.eup %5145 }
0x1b2d   :  { %v3382_v43 = vpop.xlane.xlu0 %3381  ;;  %v3388_v18 = vmul.f32 %v5146_v38, %v5140_v13  ;;  %v5148_v61 = vpop.eup %5147  ;;  %v3516_v13 = vunpack.c.l.b16 %v3502_v16 }
0x1b2e   :  { %5149 = vrcp.f32 %v3382_v43  ;;  %v3389_v59 = vmul.f32 %v5148_v61, %v5138_v46 }
0x1b2f   :  { %v3392_v21 = vpack.c.bf16 %v3388_v18, %v3388_v18  ;;  %v3520_v56 = vpack.c.b16 %v3516_v13, %v3516_v13 }
0x1b30   :  { %v3393_v8 = vpack.c.bf16 %v3389_v59, %v3389_v59 }
0x1b31   :  { %v3398_v63 = vunpack.c.l.b16 %v3392_v21  ;;  %v3531_v41 = vsel %vm161_vm0, %v3520_v56, 0 }
0x1b32   :  { %v3429_v36 = vunpack.c.l.b16 %v3393_v8  ;;  %3537 = vmatpush.bf16.msrb.mxu1 %v3531_v41 }
0x1b33   :  { %v3399_v51 = vpack.c.b16 %v3398_v63, %v3397_v30 }
0x1b34   :  { %v5150_v45 = vpop.eup %5149 }
0x1b35   :  { %v3390_v55 = vmul.f32 %v5150_v45, %v5142_v3  ;;  %4727 = vmatmul.msk.bf16.vlgmr.msra.gmra.mxu3 %vm348_vm4, %v3399_v51  ;;  %v4735_v3 = vld [vmem:[#allocation6 + $0x48] sm:$0xf] }
0x1b36   :  { %3538 = vmatpush.bf16.msrb.mxu1 %v4740_v24  ;;  %v4736_v27 = vor.u32 %v4936_v28, %v4735_v3 }
0x1b37   :  { %v3394_v5 = vpack.c.bf16 %v3390_v55, %v3390_v55 }
0x1b39   :  { %v3430_v12 = vunpack.c.l.b16 %v3394_v5 }
0x1b3a   :  { %3539 = vmatpush.bf16.msrb.mxu1 %v4736_v27 }
0x1b3b   :  { %v3431_v57 = vpack.c.b16 %v3430_v12, %v3429_v36 }
0x1b3d   :  { %v3438_v19 = vpop.permute.xlu1 %3437 }
0x1b3e   :  { %v3443_v39 = vsel %vm413_vm6, %v3438_v19, 0 }
0x1b3f   :  { %3452 = vmatpush.bf16.msrb.mxu0 %v3443_v39 }
0x1b40   :  { %v2910_v20 = vpop.permute.xlu0 %2909 }
0x1b41   :  { %2918 = vst.msk [vmem:[#allocation2] sm:$0xff] %vm808_vm8, %v2910_v20 }
0x1b42   :  { %4728 = vmatmul.msk.bf16.vlgmr.msrb.gmra.mxu0 %vm348_vm4, %v3431_v57 }
0x1b48   :  { %v3195_v52 = vpop.permute.xlu0 %3194 }
0x1b49   :  { %3203 = vst.msk [vmem:[#allocation2] sm:$0xff] %vm1094_vm9, %v3195_v52 }
0x1bb8   :  { %v3422_v4 = vpop.f32.mrf.mxu3 }
0x1bb9   :  { %v3463_v33 = vrot.slane %v3422_v4, 4  ;;  %3465 = vst [vmem:[#allocation1] ss:$2 sm:$0xff] %v3422_v4 }
0x1bbb   :  { %3467 = vst [vmem:[#allocation1 + $0x1] ss:$2 sm:$0xff] %v3463_v33 }
0x1bbf   :  { %v3454_v42 = vpop.f32.mrf.mxu0 }
0x1bc0   :  { %v3464_v62 = vrot.slane %v3454_v42, 4  ;;  %3471 = vst [vmem:[#allocation1 + $0x11] ss:$2 sm:$0xff] %v3454_v42  ;;  %v3424_v47 = vpop.f32.mrf.mxu3 }
0x1bc1   :  { %3469 = vst [vmem:[#allocation1 + $0x10] ss:$2 sm:$0xff] %v3424_v47 }
0x1bc2   :  { %3473 = vst [vmem:[#allocation1 + $0x20] ss:$2 sm:$0xff] %v3464_v62  ;;  %v3476_v17 = vld.sshfl [vmem:[#allocation1] sm:$0xff pattern:$0x75316420] }
0x1bc3   :  { %3479 = vrot.lane.b32.xlu1 %v3476_v17, %s5291_s3 }
0x1bc7   :  { %v3456_v35 = vpop.f32.mrf.mxu0 }
0x1bc8   :  { %3475 = vst [vmem:[#allocation1 + $0x21] ss:$2 sm:$0xff] %v3456_v35  ;;  %v3477_v25 = vld.sshfl [vmem:[#allocation1 + $0x10] sm:$0xff pattern:$0x75316420] }
0x1bc9   :  { %3481 = vrot.lane.b32.xlu0 %v3477_v25, %s5291_s3 }
0x1bcb   :  { %3198 = vrot.lane.b32.xlu1 %v6117_v34, %s5289_s14  ;;  %v4732_v34 = vor.u32 %v4935_v14, %v4731_v22 }
0x1bcd   :  { %3540 = vmatpush.bf16.msrb.mxu1 %v4732_v34 }
0x1bcf   :  { %v3478_v46 = vld.sshfl [vmem:[#allocation1 + $0x20] sm:$0xff pattern:$0x75316420] }
0x1bd1   :  { %3483 = vrot.lane.b32.xlu0 %v3478_v46, %s5291_s3 }
0x1c35   :  { %v3480_v53 = vpop.permute.xlu1 %3479 }
0x1c36   :  { %3488 = vst.msk [vmem:[#allocation2] sm:$0xff] %vm1380_vm10, %v3480_v53 }
0x1c3b   :  { %v3482_v44 = vpop.permute.xlu0 %3481 }
0x1c3c   :  { %3489 = vst.msk [vmem:[#allocation2 + $0x8] sm:$0xff] %vm1380_vm10, %v3482_v44  ;;  %v3808_v44 = vld [vmem:[#allocation6 + $0xa0] sm:$0x33] }
0x1c3d   :  { %v3199_v1 = vpop.permute.xlu1 %3198  ;;  %v3491_v32 = vld [vmem:[#allocation2] sm:$0xff] }
0x1c3e   :  { %3205 = vst.msk [vmem:[#allocation2 + $0x10] sm:$0xff] %vm1094_vm9, %v3199_v1  ;;  %v3835_v1 = vunpack.c.l.b16 %v3808_v44 }
0x1c43   :  { %v3484_v11 = vpop.permute.xlu0 %3483  ;;  %v3492_v31 = vld [vmem:[#allocation2 + $0x8] sm:$0xff] }
0x1c44   :  { %3490 = vst.msk [vmem:[#allocation2 + $0x10] sm:$0xff] %vm1380_vm10, %v3484_v11  ;;  %v3494_v37 = vpack.c.bf16 %v3492_v31, %v3491_v32  ;;  %v3836_v11 = vunpack.c.h.b16 %v3808_v44  ;;  %v3843_v31 = vpack.c.b16 %v3835_v1, %v3835_v1 }
0x1c46   :  { %4741 = vmatmul.msk.bf16.vlgmr.msrb.gmra.mxu1 %vm154_vm1, %v3494_v37  ;;  %v3844_v37 = vpack.c.b16 %v3836_v11, %v3836_v11 }
0x1c4b   :  { %v3493_v9 = vld [vmem:[#allocation2 + $0x10] sm:$0xff] }
0x1c4c   :  { %v3495_v0 = vpack.c.bf16 %v3493_v9, %v3493_v9 }
0x1c56   :  { %4742 = vmatmul.msk.bf16.gmra.mxu1 %vm154_vm1, %v3495_v0  ;;  %v3858_v0 = vsel %vm161_vm0, %v3843_v31, 0 }
0x1c57   :  { %3867 = vmatpush.bf16.msrb.mxu2 %v3858_v0 }
0x1cc3   :  { %v3542_v26 = vpop.f32.mrf.mxu1 }
0x1cc4   :  { %v3552_v40 = vadd.f32 %v3551_v60, %v3542_v26 }
0x1cc6   :  { %v3558_v38 = vrot.slane %v3552_v40, 4  ;;  %v3564_v43 = vadd.f32 %v3552_v40, %v5867_v10  ;;  %v4762_v40 = vld [vmem:[#allocation6 + $0x90] sm:$0xf] }
0x1cc8   :  { %v3565_v48 = vadd.f32 %v3558_v38, %v5869_v58  ;;  %3578 = vst [vmem:[#allocation1] ss:$2 sm:$0xff] %v3564_v43  ;;  %v4943_v38 = vld [vmem:[#allocation6 + $0x94] sm:$0xf0] }
0x1cca   :  { %3580 = vst [vmem:[#allocation1 + $0x1] ss:$2 sm:$0xff] %v3565_v48 }
0x1ccb   :  { %v3544_v18 = vpop.f32.mrf.mxu1 }
0x1ccc   :  { %v3553_v21 = vadd.f32 %v3551_v60, %v3544_v18  ;;  %v4764_v18 = vld [vmem:[#allocation6 + $0x98] sm:$0xf0] }
0x1cce   :  { %v3559_v30 = vrot.slane %v3553_v21, 4  ;;  %v3566_v63 = vadd.f32 %v3553_v21, %v5877_v54 }
0x1cd0   :  { %v3567_v61 = vadd.f32 %v3559_v30, %v5879_v2  ;;  %3582 = vst [vmem:[#allocation1 + $0x10] ss:$2 sm:$0xff] %v3566_v63 }
0x1cd1   :  { %v3589_v45 = vld.sshfl [vmem:[#allocation1] sm:$0xff pattern:$0x75316420] }
0x1cd2   :  { %3584 = vst [vmem:[#allocation1 + $0x11] ss:$2 sm:$0xff] %v3567_v61  ;;  %v3595_v51 = vsel %vm154_vm1, %v3589_v45, 0.0  ;;  %v4940_v45 = vld [vmem:[#allocation6 + $0x84] sm:$0xf] }
0x1cd3   :  { %3596 = vadd.xlane.f32.xlu2 %v3595_v51  ;;  %v3547_v55 = vpop.f32.mrf.mxu1 }
0x1cd4   :  { %v3554_v59 = vadd.f32 %v3551_v60, %v3547_v55  ;;  %v3861_v60 = vsel %vm161_vm0, %v3844_v37, 0 }
0x1cd5   :  { %3885 = vmatpush.bf16.msrb.mxu3 %v3861_v60 }
0x1cd6   :  { %v3560_v10 = vrot.slane %v3554_v59, 4  ;;  %v3568_v58 = vadd.f32 %v3554_v59, %v5887_v6  ;;  %v4756_v59 = vld [vmem:[#allocation6 + $0x88] sm:$0xf0] }
0x1cd8   :  { %v3569_v5 = vadd.f32 %v3560_v10, %v5889_v7  ;;  %3586 = vst [vmem:[#allocation1 + $0x20] ss:$2 sm:$0xff] %v3568_v58  ;;  %v4759_v10 = vor.u32 %v4940_v45, %v4756_v59  ;;  %v4798_v45 = vld [vmem:[#allocation6 + $0x108] sm:$0xf]  ;;  %v4950_v59 = vld [vmem:[#allocation6 + $0x10c] sm:$0xf0] }
0x1cd9   :  { %v3590_v8 = vld.sshfl [vmem:[#allocation1 + $0x10] sm:$0xff pattern:$0x75316420] }
0x1cda   :  { %3588 = vst [vmem:[#allocation1 + $0x21] ss:$2 sm:$0xff] %v3569_v5  ;;  %v3598_v54 = vsel %vm154_vm1, %v3590_v8, 0.0 }
0x1cdb   :  { %3599 = vadd.xlane.f32.xlu1 %v3598_v54  ;;  %v3549_v2 = vpop.f32.mrf.mxu1  ;;  %v4746_v54 = vld [vmem:[#allocation6 + $0x70] sm:$0xf] }
0x1cdc   :  { %v4939_v2 = vld [vmem:[#allocation6 + $0x74] sm:$0xf0] }
0x1ce1   :  { %v3591_v12 = vld.sshfl [vmem:[#allocation1 + $0x20] sm:$0xff pattern:$0x75316420] }
0x1ce2   :  { %v3601_v19 = vsel %vm154_vm1, %v3591_v12, 0.0  ;;  %v4938_v12 = vld [vmem:[#allocation6 + $0x74] sm:$0xf] }
0x1ce3   :  { %3602 = vadd.xlane.f32.xlu0 %v3601_v19  ;;  %v4747_v19 = vor.u32 %v4939_v2, %v4746_v54  ;;  %v4794_v2 = vld [vmem:[#allocation6 + $0xf8] sm:$0xf] }
0x1d46   :  { %v3597_v36 = vpop.xlane.xlu2 %3596 }
0x1d47   :  { %v3604_v39 = vmul.f32 %v3597_v36, %v5692_v49  ;;  %v4748_v36 = vld [vmem:[#allocation6 + $0x78] sm:$0xf0] }
0x1d49   :  { %v3613_v57 = vperm.slane %v3604_v39, %v5694_v23  ;;  %v3617_v6 = vperm.slane %v3604_v39, %v5696_v50 }
0x1d4b   :  { %v6197_v20 = vsub.f32 %v3564_v43, %v3613_v57  ;;  %v6199_v7 = vsub.f32 %v3565_v48, %v3617_v6  ;;  %v4942_v43 = vld [vmem:[#allocation6 + $0x94] sm:$0xf]  ;;  %v4763_v48 = vor.u32 %v4943_v38, %v4762_v40  ;;  %v4751_v57 = vor.u32 %v4938_v12, %v4748_v36  ;;  %v4949_v12 = vld [vmem:[#allocation6 + $0xfc] sm:$0xf0] }
0x1d4c   :  { %v4767_v21 = vor.u32 %v4942_v43, %v4764_v18  ;;  %v4802_v43 = vld [vmem:[#allocation6 + $0x118] sm:$0xf] }
0x1d4d   :  { %v3646_v52 = vmul.f32 %v6197_v20, %v6197_v20  ;;  %v3647_v4 = vmul.f32 %v6199_v7, %v6199_v7  ;;  %3868 = vmatpush.bf16.msrb.mxu2 %v4763_v48  ;;  %v4951_v48 = vld [vmem:[#allocation6 + $0x11c] sm:$0xf0] }
0x1d4e   :  { %v3600_v33 = vpop.xlane.xlu1 %3599  ;;  %3886 = vmatpush.bf16.msrb.mxu3 %v4767_v21 }
0x1d4f   :  { %3658 = vst [vmem:[#allocation1] ss:$2 sm:$0xff] %v3646_v52  ;;  %v3605_v42 = vmul.f32 %v3600_v33, %v5692_v49 }
0x1d50   :  { %3660 = vst [vmem:[#allocation1 + $0x1] ss:$2 sm:$0xff] %v3647_v4 }
0x1d51   :  { %v3621_v62 = vperm.slane %v3605_v42, %v5694_v23  ;;  %v3625_v47 = vperm.slane %v3605_v42, %v5696_v50 }
0x1d52   :  { %3887 = vmatpush.bf16.msrb.mxu3 %v4759_v10  ;;  %v4830_v10 = vld [vmem:[#allocation6 + $0x188] sm:$0xf] }
0x1d53   :  { %v6208_v17 = vsub.f32 %v3566_v63, %v3621_v62  ;;  %v6210_v35 = vsub.f32 %v3567_v61, %v3625_v47  ;;  %v4754_v63 = vld [vmem:[#allocation6 + $0x80] sm:$0xf]  ;;  %v4941_v61 = vld [vmem:[#allocation6 + $0x84] sm:$0xf0]  ;;  %v6238_v47 = vld [vmem:[%s6376_s4 + $0x2] ss:$0 sm:$0xff] }
0x1d54   :  { %v4755_v55 = vor.u32 %v4941_v61, %v4754_v63  ;;  %v4834_v63 = vld [vmem:[#allocation6 + $0x198] sm:$0xf]  ;;  %v4959_v61 = vld [vmem:[#allocation6 + $0x19c] sm:$0xf0] }
0x1d55   :  { %v3648_v25 = vmul.f32 %v6208_v17, %v6208_v17  ;;  %v3649_v46 = vmul.f32 %v6210_v35, %v6210_v35 }
0x1d56   :  { %v3603_v16 = vpop.xlane.xlu0 %3602  ;;  %3869 = vmatpush.bf16.msrb.mxu2 %v4755_v55  ;;  %3888 = vmatpush.bf16.msrb.mxu3 %v4751_v57  ;;  %v4835_v55 = vor.u32 %v4959_v61, %v4834_v63  ;;  %v4957_v57 = vld [vmem:[#allocation6 + $0x17c] sm:$0xf0]  ;;  %v4952_v61 = vld [vmem:[#allocation6 + $0x12c] sm:$0xf0] }
0x1d57   :  { %3662 = vst [vmem:[#allocation1 + $0x10] ss:$2 sm:$0xff] %v3648_v25  ;;  %v3606_v13 = vmul.f32 %v3603_v16, %v5692_v49  ;;  %v3669_v56 = vld.sshfl [vmem:[#allocation1] sm:$0xff pattern:$0x75316420] }
0x1d58   :  { %3664 = vst [vmem:[#allocation1 + $0x11] ss:$2 sm:$0xff] %v3649_v46  ;;  %v3675_v29 = vsel %vm154_vm1, %v3669_v56, 0.0  ;;  %v6243_v16 = vld [vmem:[%s6376_s4 + $0x3] ss:$0 sm:$0xff]  ;;  %4055 = vmatpush.bf16.msra.mxu1 %v4835_v55 }
0x1d59   :  { %v3629_v15 = vperm.slane %v3606_v13, %v5694_v23  ;;  %v3633_v41 = vperm.slane %v3606_v13, %v5696_v50  ;;  %3676 = vadd.xlane.f32.xlu2 %v3675_v29  ;;  %v6246_v29 = vrot.slane %v6238_v47, 4 }
0x1d5a   :  { %3870 = vmatpush.bf16.msrb.mxu2 %v4747_v19 }
0x1d5b   :  { %v6220_v24 = vsub.f32 %v3568_v58, %v3629_v15  ;;  %v6222_v3 = vsub.f32 %v3569_v5, %v3633_v41 }
0x1d5d   :  { %v3650_v28 = vmul.f32 %v6220_v24, %v6220_v24  ;;  %v3651_v27 = vmul.f32 %v6222_v3, %v6222_v3 }
0x1d5f   :  { %3666 = vst [vmem:[#allocation1 + $0x20] ss:$2 sm:$0xff] %v3650_v28  ;;  %v3670_v22 = vld.sshfl [vmem:[#allocation1 + $0x10] sm:$0xff pattern:$0x75316420] }
0x1d60   :  { %3668 = vst [vmem:[#allocation1 + $0x21] ss:$2 sm:$0xff] %v3651_v27  ;;  %v3678_v14 = vsel %vm154_vm1, %v3670_v22, 0.0  ;;  %v6251_v27 = vrot.slane %v6243_v16, 4 }
0x1d61   :  { %3679 = vadd.xlane.f32.xlu1 %v3678_v14 }
0x1d67   :  { %v3671_v34 = vld.sshfl [vmem:[#allocation1 + $0x20] sm:$0xff pattern:$0x75316420] }
0x1d68   :  { %v3681_v53 = vsel %vm154_vm1, %v3671_v34, 0.0 }
0x1d69   :  { %3682 = vadd.xlane.f32.xlu0 %v3681_v53 }
0x1dcc   :  { %v3677_v32 = vpop.xlane.xlu2 %3676 }
0x1dcd   :  { %v3684_v9 = vmul.f32 %v3677_v32, %v5692_v49 }
0x1dcf   :  { %v3687_v26 = vadd.f32 1e-05, %v3684_v9 }
0x1dd1   :  { %5151 = vrsqrt.f32 %v3687_v26  ;;  %vm3696_vm3 = vweird.f32 %v3687_v26 }
0x1dd4   :  { %v3680_v30 = vpop.xlane.xlu1 %3679 }
0x1dd5   :  { %v3685_v51 = vmul.f32 %v3680_v30, %v5692_v49  ;;  %v4803_v30 = vor.u32 %v4951_v48, %v4802_v43  ;;  %v4953_v43 = vld [vmem:[#allocation6 + $0x13c] sm:$0xf0] }
0x1dd7   :  { %v5152_v58 = vpop.eup %5151  ;;  %v3688_v5 = vadd.f32 1e-05, %v3685_v51  ;;  %4037 = vmatpush.bf16.msra.mxu0 %v4803_v30  ;;  %v4806_v30 = vld [vmem:[#allocation6 + $0x128] sm:$0xf] }
0x1dd8   :  { %v3691_v8 = vmul.f32 %v5152_v58, %v3687_v26  ;;  %vm3697_vm2 = vweird.f32 %v5152_v58 }
0x1dd9   :  { %5153 = vrsqrt.f32 %v3688_v5  ;;  %vm3698_vm4 = vmor %vm3696_vm3, %vm3697_vm2  ;;  %vm3706_vm6 = vweird.f32 %v3688_v5  ;;  %vm4266_vm3 = vcmask 1041409  }
0x1dda   :  { %v3692_v39 = vmul.f32 %v5152_v58, %v3691_v8 }
0x1ddc   :  { %v3693_v6 = vmul.f32 0.5, %v3692_v39  ;;  %v3683_v52 = vpop.xlane.xlu0 %3682  ;;  %v4826_v39 = vld [vmem:[#allocation6 + $0x178] sm:$0xf] }
0x1ddd   :  { %v3686_v4 = vmul.f32 %v3683_v52, %v5692_v49 }
0x1dde   :  { %v3694_v33 = vsub.f32 1.5, %v3693_v6 }
0x1ddf   :  { %v5154_v42 = vpop.eup %5153  ;;  %v3689_v62 = vadd.f32 1e-05, %v3686_v4  ;;  %v4795_v4 = vor.u32 %v4949_v12, %v4794_v2 }
0x1de0   :  { %v3695_v25 = vmul.f32 %v5152_v58, %v3694_v33  ;;  %v3701_v46 = vmul.f32 %v5154_v42, %v3688_v5  ;;  %vm3707_vm5 = vweird.f32 %v5154_v42  ;;  %v4799_v5 = vor.u32 %v4950_v59, %v4798_v45 }
0x1de1   :  { %5155 = vrsqrt.f32 %v3689_v62  ;;  %vm3708_vm7 = vmor %vm3706_vm6, %vm3707_vm5  ;;  %vm3716_vm9 = vweird.f32 %v3689_v62  ;;  %v4827_v33 = vor.u32 %v4957_v57, %v4826_v39  ;;  %v4807_v45 = vor.u32 %v4952_v61, %v4806_v30 }
0x1de2   :  { %v3699_v13 = vsel %vm3698_vm4, %v5152_v58, %v3695_v25  ;;  %v3702_v56 = vmul.f32 %v5154_v42, %v3701_v46  ;;  %4038 = vmatpush.bf16.msra.mxu0 %v4799_v5  ;;  %vm4428_vm6 = vcmask 517120  }
0x1de3   :  { %v3726_v15 = vperm.slane %v3699_v13, %v5694_v23  ;;  %v3730_v41 = vperm.slane %v3699_v13, %v5696_v50  ;;  %v4822_v13 = vld [vmem:[#allocation6 + $0x168] sm:$0xf] }
0x1de4   :  { %v3703_v28 = vmul.f32 0.5, %v3702_v56  ;;  %v4956_v56 = vld [vmem:[#allocation6 + $0x16c] sm:$0xf0] }
0x1de5   :  { %v3753_v22 = vmul.f32 %v3726_v15, %v6197_v20  ;;  %v3754_v14 = vmul.f32 %v3730_v41, %v6199_v7 }
0x1de6   :  { %v3704_v34 = vsub.f32 1.5, %v3703_v28  ;;  %4039 = vmatpush.bf16.msra.mxu0 %v4795_v4 }
0x1de7   :  { %v5156_v53 = vpop.eup %5155  ;;  %v3762_v44 = vmul.f32 %v3753_v22, %v6238_v47  ;;  %v3763_v1 = vmul.f32 %v6246_v29, %v3754_v14  ;;  %v4823_v22 = vor.u32 %v4956_v56, %v4822_v13  ;;  %v4947_v14 = vld [vmem:[#allocation6 + $0xdc] sm:$0xf0] }
0x1de8   :  { %v3705_v11 = vmul.f32 %v5154_v42, %v3704_v34  ;;  %v3711_v32 = vmul.f32 %v5156_v53, %v3689_v62  ;;  %vm3717_vm8 = vweird.f32 %v5156_v53  ;;  %v4948_v62 = vld [vmem:[#allocation6 + $0xec] sm:$0xf0]  ;;  %v4818_v34 = vld [vmem:[#allocation6 + $0x158] sm:$0xf] }
0x1de9   :  { %v6258_v31 = vadd.f32 %v3762_v44, %v6243_v16  ;;  %v6261_v37 = vadd.f32 %v6251_v27, %v3763_v1  ;;  %vm3718_vm10 = vmor %vm3716_vm9, %vm3717_vm8  ;;  %v4955_v44 = vld [vmem:[#allocation6 + $0x15c] sm:$0xf0] }
0x1dea   :  { %v3709_v20 = vsel %vm3708_vm7, %v5154_v42, %v3705_v11  ;;  %v3712_v9 = vmul.f32 %v5156_v53, %v3711_v32  ;;  %v4790_v42 = vld [vmem:[#allocation6 + $0xe8] sm:$0xf]  ;;  %v4819_v1 = vor.u32 %v4955_v44, %v4818_v34  ;;  %v4946_v32 = vld [vmem:[#allocation6 + $0xcc] sm:$0xf0] }
0x1deb   :  { %3783 = vst [vmem:[#allocation1] ss:$2 sm:$0xff] %v6258_v31  ;;  %v3734_v7 = vperm.slane %v3709_v20, %v5694_v23  ;;  %v3738_v0 = vperm.slane %v3709_v20, %v5696_v50  ;;  %v4782_v11 = vld [vmem:[#allocation6 + $0xc8] sm:$0xf] }
0x1dec   :  { %3785 = vst [vmem:[#allocation1 + $0x1] ss:$2 sm:$0xff] %v6261_v37  ;;  %v3713_v60 = vmul.f32 0.5, %v3712_v9  ;;  %v4814_v20 = vld [vmem:[#allocation6 + $0x148] sm:$0xf]  ;;  %v4783_v9 = vor.u32 %v4946_v32, %v4782_v11 }
0x1ded   :  { %v3755_v26 = vmul.f32 %v3734_v7, %v6208_v17  ;;  %v3756_v40 = vmul.f32 %v3738_v0, %v6210_v35  ;;  %v4958_v17 = vld [vmem:[#allocation6 + $0x18c] sm:$0xf0] }
0x1dee   :  { %v3714_v38 = vsub.f32 1.5, %v3713_v60  ;;  %v4831_v54 = vor.u32 %v4958_v17, %v4830_v10  ;;  %v4954_v7 = vld [vmem:[#allocation6 + $0x14c] sm:$0xf0]  ;;  %v4778_v60 = vld [vmem:[#allocation6 + $0xb8] sm:$0xf] }
0x1def   :  { %v3764_v18 = vmul.f32 %v3755_v26, %v6238_v47  ;;  %v3765_v21 = vmul.f32 %v6246_v29, %v3756_v40  ;;  %v4815_v0 = vor.u32 %v4954_v7, %v4814_v20  ;;  %v4945_v26 = vld [vmem:[#allocation6 + $0xbc] sm:$0xf0]  ;;  %v4810_v40 = vld [vmem:[#allocation6 + $0x138] sm:$0xf] }
0x1df0   :  { %v3715_v51 = vmul.f32 %v5156_v53, %v3714_v38  ;;  %4056 = vmatpush.bf16.msra.mxu1 %v4831_v54  ;;  %v4779_v38 = vor.u32 %v4945_v26, %v4778_v60  ;;  %v4811_v48 = vor.u32 %v4953_v43, %v4810_v40 }
0x1df1   :  { %v6272_v35 = vadd.f32 %v3764_v18, %v6243_v16  ;;  %v6275_v58 = vadd.f32 %v6251_v27, %v3765_v21  ;;  %v4774_v18 = vld [vmem:[#allocation6 + $0xa8] sm:$0xf]  ;;  %v4944_v21 = vld [vmem:[#allocation6 + $0xac] sm:$0xf0] }
0x1df2   :  { %v3719_v8 = vsel %vm3718_vm10, %v5156_v53, %v3715_v51  ;;  %v4775_v63 = vor.u32 %v4944_v21, %v4774_v18  ;;  %v4743_v51 = vld [vmem:[%s6376_s4 + $0x4] ss:$8 sm:$0x3] }
0x1df3   :  { %3787 = vst [vmem:[#allocation1 + $0x10] ss:$2 sm:$0xff] %v6272_v35  ;;  %v3742_v19 = vperm.slane %v3719_v8, %v5694_v23  ;;  %v3746_v36 = vperm.slane %v3719_v8, %v5696_v50  ;;  %v3812_v10 = vperm.slane %v4743_v51, 0  ;;  %v3813_v17 = vperm.slane %v4743_v51, 1 }
0x1df4   :  { %3789 = vst [vmem:[#allocation1 + $0x11] ss:$2 sm:$0xff] %v6275_v58  ;;  %4057 = vmatpush.bf16.msra.mxu1 %v4827_v33 }
0x1df5   :  { %v3757_v6 = vmul.f32 %v3742_v19, %v6220_v24  ;;  %v3758_v52 = vmul.f32 %v3746_v36, %v6222_v3  ;;  %v4791_v24 = vor.u32 %v4948_v62, %v4790_v42  ;;  %v3794_v3 = vld.sshfl [vmem:[#allocation1] sm:$0xff pattern:$0x75316420] }
0x1df7   :  { %v3766_v25 = vmul.f32 %v3757_v6, %v6238_v47  ;;  %v3767_v46 = vmul.f32 %v6246_v29, %v3758_v52  ;;  %4040 = vmatpush.bf16.msra.mxu0 %v4791_v24 }
0x1df8   :  { %4058 = vmatpush.bf16.msra.mxu1 %v4823_v22 }
0x1df9   :  { %v6287_v15 = vadd.f32 %v3766_v25, %v6243_v16  ;;  %v6290_v41 = vadd.f32 %v6251_v27, %v3767_v46  ;;  %v4786_v27 = vld [vmem:[#allocation6 + $0xd8] sm:$0xf] }
0x1dfa   :  { %v4787_v53 = vor.u32 %v4947_v14, %v4786_v27 }
0x1dfb   :  { %3791 = vst [vmem:[#allocation1 + $0x20] ss:$2 sm:$0xff] %v6287_v15  ;;  %v3795_v28 = vld.sshfl [vmem:[#allocation1 + $0x10] sm:$0xff pattern:$0x75316420] }
0x1dfc   :  { %3793 = vst [vmem:[#allocation1 + $0x21] ss:$2 sm:$0xff] %v6290_v41  ;;  %v3800_v47 = vpack.c.bf16 %v3795_v28, %v3794_v3  ;;  %4041 = vmatpush.bf16.msra.mxu0 %v4787_v53  ;;  %4059 = vmatpush.bf16.msra.mxu1 %v4819_v1 }
0x1dfe   :  { %4768 = vmatmul.msk.bf16.vlgmr.msrb.gmra.mxu2 %vm154_vm1, %v3800_v47  ;;  %4770 = vmatmul.msk.bf16.vlgmr.msrb.gmra.mxu3 %vm154_vm1, %v3800_v47 }
0x1e00   :  { %4042 = vmatpush.bf16.msra.mxu0 %v4783_v9  ;;  %4060 = vmatpush.bf16.msra.mxu1 %v4815_v0 }
0x1e03   :  { %v3796_v16 = vld.sshfl [vmem:[#allocation1 + $0x20] sm:$0xff pattern:$0x75316420] }
0x1e04   :  { %v3801_v29 = vpack.c.bf16 %v3796_v16, %v3796_v16  ;;  %4043 = vmatpush.bf16.msra.mxu0 %v4779_v38  ;;  %4061 = vmatpush.bf16.msra.mxu1 %v4811_v48  ;;  %v4073_v16 = vld [vmem:[%s6376_s4 + $0x5] ss:$0 sm:$0xff] }
0x1e08   :  { %4044 = vmatpush.bf16.msra.mxu0 %v4775_v63  ;;  %4062 = vmatpush.bf16.msra.mxu1 %v4807_v45 }
0x1e0e   :  { %4769 = vmatmul.msk.bf16.gmra.mxu2 %vm154_vm1, %v3801_v29  ;;  %4771 = vmatmul.msk.bf16.gmra.mxu3 %vm154_vm1, %v3801_v29 }
0x1e81   :  { %v3872_v55 = vpop.f32.mrf.mxu2  ;;  %v3890_v59 = vpop.f32.mrf.mxu3 }
0x1e82   :  { %v3873_v5 = vadd.f32 %v3872_v55, %v3812_v10  ;;  %v3891_v8 = vadd.f32 %v3890_v59, %v3813_v17 }
0x1e84   :  { %v3899_v36 = vmax.f32 %v3873_v5, 0.0  ;;  %v3900_v39 = vmax.f32 %v3891_v8, 0.0 }
0x1e89   :  { %v3874_v54 = vpop.f32.mrf.mxu2  ;;  %v3892_v2 = vpop.f32.mrf.mxu3 }
0x1e8a   :  { %v3875_v12 = vadd.f32 %v3874_v54, %v3812_v10  ;;  %v3893_v19 = vadd.f32 %v3892_v2, %v3813_v17 }
0x1e8c   :  { %v3901_v57 = vmax.f32 %v3875_v12, 0.0  ;;  %v3902_v6 = vmax.f32 %v3893_v19, 0.0 }
0x1e8e   :  { %v3905_v52 = vpack.c.bf16 %v3901_v57, %v3899_v36  ;;  %v3906_v4 = vpack.c.bf16 %v3902_v6, %v3900_v39  ;;  %v4257_v6 = vld [vmem:[#allocation8 + $0x18] sm:$0x3] }
0x1e90   :  { %4045 = vmatmul.bf16.vlgmr.msra.gmra.mxu0 %v3905_v52  ;;  %4063 = vmatmul.bf16.vlgmr.msra.gmra.mxu1 %v3906_v4  ;;  %v4282_v52 = vunpack.c.l.b16 %v4257_v6 }
0x1e91   :  { %v3877_v33 = vpop.f32.mrf.mxu2  ;;  %v3895_v42 = vpop.f32.mrf.mxu3 }
0x1e92   :  { %v3878_v62 = vadd.f32 %v3877_v33, %v3812_v10  ;;  %v3896_v25 = vadd.f32 %v3895_v42, %v3813_v17  ;;  %v4286_v4 = vpack.c.b16 %v4282_v52, %v4282_v52 }
0x1e94   :  { %v3903_v56 = vmax.f32 %v3878_v62, 0.0  ;;  %v3904_v24 = vmax.f32 %v3896_v25, 0.0  ;;  %v4294_v42 = vsel %vm161_vm0, %v4286_v4, 0 }
0x1e95   :  { %4300 = vmatpush.bf16.msra.mxu2 %v4294_v42 }
0x1e96   :  { %v3907_v3 = vpack.c.bf16 %v3903_v56, %v3903_v56  ;;  %v3908_v28 = vpack.c.bf16 %v3904_v24, %v3904_v24 }
0x1e99   :  { %v3879_v46 = vpop.f32.mrf.mxu2  ;;  %v3897_v13 = vpop.f32.mrf.mxu3 }
0x1e9a   :  { %v4962_v46 = vld [vmem:[#allocation8 + $0x10] sm:$0xff]  ;;  %v4961_v13 = vld [vmem:[#allocation8 + $0x8] sm:$0xff] }
0x1e9b   :  { %4301 = vmatpush.bf16.msra.mxu2 %v4962_v46  ;;  %v4970_v46 = vld [vmem:[#allocation8 + $0x54] sm:$0xff] }
0x1e9c   :  { %4410 = vmatpush.bf16.msra.mxu3 %v4970_v46 }
0x1e9f   :  { %4302 = vmatpush.bf16.msra.mxu2 %v4961_v13  ;;  %v4969_v13 = vld [vmem:[#allocation8 + $0x4c] sm:$0xff] }
0x1ea0   :  { %4050 = vmatmul.bf16.gmra.mxu0 %v3907_v3  ;;  %4068 = vmatmul.bf16.gmra.mxu1 %v3908_v28 }
0x1ea1   :  { %4411 = vmatpush.bf16.msra.mxu3 %v4969_v13  ;;  %v5007_v13 = vld [vmem:[%s6378_s6 + $0x5] ss:$0 sm:$0xff] }
0x1f0d   :  { %v4046_v22 = vpop.f32.mrf.mxu0  ;;  %v4064_v47 = vpop.f32.mrf.mxu1 }
0x1f0e   :  { %v4065_v29 = vadd.f32 %v4064_v47, %v4046_v22  ;;  %v4960_v22 = vld [vmem:[#allocation8] sm:$0xff] }
0x1f0f   :  { %4303 = vmatpush.bf16.msra.mxu2 %v4960_v22  ;;  %v4964_v22 = vld [vmem:[#allocation8 + $0x24] sm:$0xff] }
0x1f10   :  { %v4074_v27 = vadd.f32 %v4073_v16, %v4065_v29 }
0x1f12   :  { %v4080_v14 = vrot.slane %v4074_v27, 4  ;;  %v6305_v34 = vadd.f32 %v4074_v27, %v6258_v31 }
0x1f14   :  { %v6308_v53 = vadd.f32 %v4080_v14, %v6261_v37  ;;  %4100 = vst [vmem:[#allocation1] ss:$2 sm:$0xff] %v6305_v34 }
0x1f15   :  { %v4048_v44 = vpop.f32.mrf.mxu0  ;;  %v4066_v1 = vpop.f32.mrf.mxu1 }
0x1f16   :  { %4102 = vst [vmem:[#allocation1 + $0x1] ss:$2 sm:$0xff] %v6308_v53  ;;  %v4067_v11 = vadd.f32 %v4066_v1, %v4048_v44 }
0x1f18   :  { %v4075_v32 = vadd.f32 %v4073_v16, %v4067_v11 }
0x1f1a   :  { %v4081_v20 = vrot.slane %v4075_v32, 4  ;;  %v4088_v9 = vadd.f32 %v4075_v32, %v6272_v35 }
0x1f1c   :  { %v4089_v7 = vadd.f32 %v4081_v20, %v6275_v58  ;;  %4104 = vst [vmem:[#allocation1 + $0x10] ss:$2 sm:$0xff] %v4088_v9 }
0x1f1d   :  { %v4051_v0 = vpop.f32.mrf.mxu0  ;;  %v4069_v31 = vpop.f32.mrf.mxu1 }
0x1f1e   :  { %4106 = vst [vmem:[#allocation1 + $0x11] ss:$2 sm:$0xff] %v4089_v7  ;;  %v4070_v60 = vadd.f32 %v4069_v31, %v4051_v0 }
0x1f20   :  { %v4076_v37 = vadd.f32 %v4073_v16, %v4070_v60 }
0x1f22   :  { %v4082_v26 = vrot.slane %v4076_v37, 4  ;;  %v4090_v40 = vadd.f32 %v4076_v37, %v6287_v15  ;;  %v4093_v37 = vld [vmem:[%s6376_s4 + $0x7] ss:$0 sm:$0xff] }
0x1f24   :  { %v4091_v38 = vadd.f32 %v4082_v26, %v6290_v41  ;;  %4108 = vst [vmem:[#allocation1 + $0x20] ss:$2 sm:$0xff] %v4090_v40 }
0x1f25   :  { %v4053_v43 = vpop.f32.mrf.mxu0  ;;  %v4071_v48 = vpop.f32.mrf.mxu1  ;;  %v4112_v18 = vld.sshfl [vmem:[#allocation1 + $0x10] sm:$0xff pattern:$0x75316420] }
0x1f26   :  { %4110 = vst [vmem:[#allocation1 + $0x21] ss:$2 sm:$0xff] %v4091_v38  ;;  %v4120_v35 = vsel %vm154_vm1, %v4112_v18, 0.0  ;;  %v4245_v18 = vrot.slane %v4093_v37, 4 }
0x1f27   :  { %4121 = vadd.xlane.f32.xlu2 %v4120_v35 }
0x1f2d   :  { %v4113_v58 = vld.sshfl [vmem:[#allocation1 + $0x20] sm:$0xff pattern:$0x75316420] }
0x1f2e   :  { %v4123_v21 = vsel %vm154_vm1, %v4113_v58, 0.0 }
0x1f2f   :  { %4124 = vadd.xlane.f32.xlu1 %v4123_v21 }
0x1f9a   :  { %v4122_v30 = vpop.xlane.xlu2 %4121 }
0x1f9b   :  { %v4127_v63 = vmul.f32 %v4122_v30, %v5692_v49 }
0x1f9d   :  { %v4143_v61 = vperm.slane %v4127_v63, %v5694_v23  ;;  %v4147_v15 = vperm.slane %v4127_v63, %v5696_v50 }
0x1f9f   :  { %v4164_v41 = vsub.f32 %v4088_v9, %v4143_v61  ;;  %v4165_v45 = vsub.f32 %v4089_v7, %v4147_v15  ;;  %v4092_v9 = vld [vmem:[%s6376_s4 + $0x6] ss:$0 sm:$0xff] }
0x1fa0   :  { %v4240_v43 = vrot.slane %v4092_v9, 4 }
0x1fa1   :  { %v4170_v51 = vmul.f32 %v4164_v41, %v4164_v41  ;;  %v4171_v55 = vmul.f32 %v4165_v45, %v4165_v45 }
0x1fa2   :  { %v4125_v59 = vpop.xlane.xlu1 %4124 }
0x1fa3   :  { %4184 = vst [vmem:[#allocation1 + $0x10] ss:$2 sm:$0xff] %v4170_v51  ;;  %v4128_v10 = vmul.f32 %v4125_v59, %v5692_v49  ;;  %v5002_v59 = vld [vmem:[%s6378_s6] ss:$0 sm:$0xff] }
0x1fa4   :  { %4186 = vst [vmem:[#allocation1 + $0x11] ss:$2 sm:$0xff] %v4171_v55 }
0x1fa5   :  { %v4151_v17 = vperm.slane %v4128_v10, %v5694_v23  ;;  %v4155_v5 = vperm.slane %v4128_v10, %v5696_v50 }
0x1fa7   :  { %v4166_v8 = vsub.f32 %v4090_v40, %v4151_v17  ;;  %v4167_v54 = vsub.f32 %v4091_v38, %v4155_v5 }
0x1fa9   :  { %v4172_v2 = vmul.f32 %v4166_v8, %v4166_v8  ;;  %v4173_v12 = vmul.f32 %v4167_v54, %v4167_v54 }
0x1fab   :  { %4188 = vst [vmem:[#allocation1 + $0x20] ss:$2 sm:$0xff] %v4172_v2  ;;  %v4191_v19 = vld.sshfl [vmem:[#allocation1 + $0x10] sm:$0xff pattern:$0x75316420] }
0x1fac   :  { %4190 = vst [vmem:[#allocation1 + $0x21] ss:$2 sm:$0xff] %v4173_v12  ;;  %v4195_v36 = vsel %vm154_vm1, %v4191_v19, 0.0 }
0x1fad   :  { %4196 = vadd.xlane.f32.xlu0 %v4195_v36 }
0x1fb3   :  { %v4192_v39 = vld.sshfl [vmem:[#allocation1 + $0x20] sm:$0xff pattern:$0x75316420] }
0x1fb4   :  { %v4198_v57 = vsel %vm154_vm1, %v4192_v39, 0.0 }
0x1fb5   :  { %4199 = vadd.xlane.f32.xlu2 %v4198_v57 }
0x2020   :  { %v4197_v33 = vpop.xlane.xlu0 %4196 }
0x2021   :  { %v4201_v62 = vmul.f32 %v4197_v33, %v5692_v49 }
0x2023   :  { %v4203_v25 = vadd.f32 1e-05, %v4201_v62  ;;  %v4111_v62 = vld.sshfl [vmem:[#allocation1] sm:$0xff pattern:$0x75316420] }
0x2025   :  { %5157 = vrsqrt.f32 %v4203_v25  ;;  %vm4211_vm11 = vweird.f32 %v4203_v25 }
0x2028   :  { %v4200_v56 = vpop.xlane.xlu2 %4199 }
0x2029   :  { %v4202_v24 = vmul.f32 %v4200_v56, %v5692_v49  ;;  %v4968_v56 = vld [vmem:[#allocation8 + $0x44] sm:$0xff] }
0x202a   :  { %4412 = vmatpush.bf16.msra.mxu3 %v4968_v56 }
0x202b   :  { %v5158_v3 = vpop.eup %5157  ;;  %v4204_v28 = vadd.f32 1e-05, %v4202_v24  ;;  %v4967_v24 = vld [vmem:[#allocation8 + $0x3c] sm:$0xff] }
0x202c   :  { %v4206_v47 = vmul.f32 %v5158_v3, %v4203_v25  ;;  %vm4212_vm15 = vweird.f32 %v5158_v3  ;;  %v4117_v25 = vsel %vm154_vm1, %v4111_v62, 0.0 }
0x202d   :  { %5159 = vrsqrt.f32 %v4204_v28  ;;  %vm4213_vm12 = vmor %vm4211_vm11, %vm4212_vm15  ;;  %vm4221_vm14 = vweird.f32 %v4204_v28  ;;  %vm4498_vm15 = vcmask 523264  }
0x202e   :  { %v4207_v16 = vmul.f32 %v5158_v3, %v4206_v47  ;;  %4413 = vmatpush.bf16.msra.mxu3 %v4967_v24  ;;  %v4963_v47 = vld [vmem:[#allocation8 + $0x1c] sm:$0xff] }
0x2030   :  { %v4208_v29 = vmul.f32 0.5, %v4207_v16 }
0x2032   :  { %v4209_v27 = vsub.f32 1.5, %v4208_v29 }
0x2033   :  { %v5160_v14 = vpop.eup %5159 }
0x2034   :  { %v4210_v44 = vmul.f32 %v5158_v3, %v4209_v27  ;;  %v4216_v1 = vmul.f32 %v5160_v14, %v4204_v28  ;;  %vm4222_vm13 = vweird.f32 %v5160_v14  ;;  %v4965_v28 = vld [vmem:[#allocation8 + $0x2c] sm:$0xff] }
0x2035   :  { %vm4223_vm2 = vmor %vm4221_vm14, %vm4222_vm13 }
0x2036   :  { %v4214_v11 = vsel %vm4213_vm12, %v5158_v3, %v4210_v44  ;;  %v4217_v32 = vmul.f32 %v5160_v14, %v4216_v1  ;;  %v4966_v3 = vld [vmem:[#allocation8 + $0x34] sm:$0xff] }
0x2037   :  { %v4230_v20 = vperm.slane %v4214_v11, %v5694_v23  ;;  %4414 = vmatpush.bf16.msra.mxu3 %v4966_v3 }
0x2038   :  { %v4218_v7 = vmul.f32 0.5, %v4217_v32 }
0x2039   :  { %v4237_v0 = vmul.f32 %v4230_v20, %v4164_v41 }
0x203a   :  { %v4219_v31 = vsub.f32 1.5, %v4218_v7 }
0x203b   :  { %v4242_v60 = vmul.f32 %v4237_v0, %v4092_v9  ;;  %4415 = vmatpush.bf16.msra.mxu3 %v4965_v28 }
0x203c   :  { %v4220_v26 = vmul.f32 %v5160_v14, %v4219_v31 }
0x203d   :  { %v4247_v38 = vadd.f32 %v4242_v60, %v4093_v37 }
0x203e   :  { %v4224_v40 = vsel %vm4223_vm2, %v5160_v14, %v4220_v26 }
0x203f   :  { %v4234_v48 = vperm.slane %v4224_v40, %v5696_v50  ;;  %v4249_v58 = vpack.c.bf16 %v4247_v38, %v4247_v38  ;;  %4416 = vmatpush.bf16.msra.mxu3 %v4964_v22 }
0x2041   :  { %v4238_v35 = vmul.f32 %v4234_v48, %v4167_v54  ;;  %v4262_v63 = vunpack.c.l.b16 %v4249_v58  ;;  %v5295_v54 = vmov 128.0  }
0x2042   :  { %5161 = vrcp.f32 %v5295_v54  ;;  %v4974_v54 = vld [vmem:[#allocation8 + $0x74] sm:$0xff] }
0x2043   :  { %v4243_v21 = vmul.f32 %v4240_v43, %v4238_v35  ;;  %v4264_v41 = vrot.slane %v4262_v63, 3  ;;  %4417 = vmatpush.bf16.msra.mxu3 %v4963_v47  ;;  %v5296_v63 = vmov 64.0   ;;  %4506 = vmatpush.bf16.msrb.mxu2 %v4974_v54  ;;  %v5008_v47 = vld [vmem:[%s6378_s6 + $0x6] ss:$0 sm:$0xff] }
0x2045   :  { %v4248_v30 = vadd.f32 %v4245_v18, %v4243_v21  ;;  %v5005_v18 = vld [vmem:[%s6378_s6 + $0x3] ss:$0 sm:$0xff] }
0x2047   :  { %v4250_v61 = vpack.c.bf16 %v4248_v30, %v4248_v30 }
0x2048   :  { %v5162_v2 = vpop.eup %5161 }
0x2049   :  { %v4263_v15 = vunpack.c.l.b16 %v4250_v61  ;;  %v4315_v12 = vmul.f32 128.0, %v5162_v2  ;;  %vm4319_vm4 = vweird.f32 %v5162_v2 }
0x204b   :  { %v4265_v45 = vrot.slane %v4263_v15, 2  ;;  %v4316_v19 = vsub.f32 1.0, %v4315_v12  ;;  %v4972_v12 = vld [vmem:[#allocation8 + $0x64] sm:$0xff] }
0x204d   :  { %v4267_v51 = vsel %vm4266_vm3, %v4265_v45, %v4264_v41  ;;  %v4317_v36 = vmul.f32 %v5162_v2, %v4316_v19  ;;  %v4971_v19 = vld [vmem:[#allocation8 + $0x5c] sm:$0xff] }
0x204e   :  { %v4268_v55 = vpack.c.b16 %v4267_v51, %v4267_v51 }
0x204f   :  { %v4318_v39 = vadd.f32 %v5162_v2, %v4317_v36 }
0x2050   :  { %4848 = vmatmul.msk.bf16.vlgmr.msra.gmra.mxu2 %vm154_vm1, %v4268_v55 }
0x2051   :  { %v4320_v57 = vsel %vm4319_vm4, %v5162_v2, %v4318_v39  ;;  %v4973_v2 = vld [vmem:[#allocation8 + $0x6c] sm:$0xff] }
0x2052   :  { %4507 = vmatpush.bf16.msrb.mxu2 %v4973_v2 }
0x2056   :  { %4508 = vmatpush.bf16.msrb.mxu2 %v4972_v12 }
0x205a   :  { %4509 = vmatpush.bf16.msrb.mxu2 %v4971_v19 }
0x20d3   :  { %v4305_v10 = vpop.f32.mrf.mxu2 }
0x20d4   :  { %v4306_v17 = vadd.f32 %v5002_v59, %v4305_v10 }
0x20d6   :  { %v4311_v5 = vsel %vm161_vm0, %v4306_v17, 0.0 }
0x20d7   :  { %4312 = vadd.xlane.f32.xlu1 %v4311_v5 }
0x20db   :  { %v4307_v8 = vpop.f32.mrf.mxu2 }
0x214a   :  { %v4313_v6 = vpop.xlane.xlu1 %4312 }
0x214b   :  { %v4321_v52 = vmul.f32 %v4320_v57, %v4313_v6 }
0x214d   :  { %v4322_v4 = vsub.f32 %v4306_v17, %v4321_v52 }
0x214f   :  { %v4323_v33 = vmul.f32 %v4322_v4, %v4322_v4 }
0x2151   :  { %v4324_v42 = vsel %vm161_vm0, %v4323_v33, 0.0 }
0x2152   :  { %4325 = vadd.xlane.f32.xlu0 %v4324_v42 }
0x215a   :  { %4118 = vadd.xlane.f32.xlu0 %v4117_v25  ;;  %v5006_v25 = vld [vmem:[%s6378_s6 + $0x4] ss:$0 sm:$0xff] }
0x21c5   :  { %v4326_v16 = vpop.xlane.xlu0 %4325 }
0x21c6   :  { %v4327_v29 = vmul.f32 %v4326_v16, %v4320_v57 }
0x21c8   :  { %v4328_v27 = vadd.f32 1e-05, %v4327_v29 }
0x21ca   :  { %5163 = vrsqrt.f32 %v4328_v27  ;;  %vm4335_vm1 = vweird.f32 %v4328_v27 }
0x21cb   :  { %5165 = vrcp.f32 %v5296_v63 }
0x21cd   :  { %v4119_v14 = vpop.xlane.xlu0 %4118 }
0x21ce   :  { %v4126_v44 = vmul.f32 %v4119_v14, %v5692_v49  ;;  %v5003_v49 = vld [vmem:[%s6378_s6 + $0x1] ss:$0 sm:$0xff] }
0x21d0   :  { %v5164_v1 = vpop.eup %5163  ;;  %v4135_v11 = vperm.slane %v4126_v44, %v5694_v23  ;;  %v4139_v32 = vperm.slane %v4126_v44, %v5696_v50 }
0x21d1   :  { %v4330_v20 = vmul.f32 %v5164_v1, %v4328_v27  ;;  %vm4336_vm0 = vweird.f32 %v5164_v1  ;;  %v5166_v61 = vpop.eup %5165 }
0x21d2   :  { %v4162_v9 = vsub.f32 %v6305_v34, %v4135_v11  ;;  %v4163_v7 = vsub.f32 %v6308_v53, %v4139_v32  ;;  %vm4337_vm5 = vmor %vm4335_vm1, %vm4336_vm0  ;;  %v5004_v34 = vld [vmem:[%s6378_s6 + $0x2] ss:$0 sm:$0xff]  ;;  %v4433_v15 = vmul.f32 64.0, %v5166_v61  ;;  %vm4437_vm7 = vweird.f32 %v5166_v61 }
0x21d3   :  { %v4331_v0 = vmul.f32 %v5164_v1, %v4330_v20 }
0x21d4   :  { %v4168_v31 = vmul.f32 %v4162_v9, %v4162_v9  ;;  %v4169_v60 = vmul.f32 %v4163_v7, %v4163_v7  ;;  %v4434_v41 = vsub.f32 1.0, %v4433_v15 }
0x21d5   :  { %v4332_v37 = vmul.f32 0.5, %v4331_v0 }
0x21d6   :  { %4180 = vst [vmem:[#allocation1] ss:$2 sm:$0xff] %v4168_v31  ;;  %v4435_v45 = vmul.f32 %v5166_v61, %v4434_v41 }
0x21d7   :  { %v4333_v26 = vsub.f32 1.5, %v4332_v37  ;;  %4182 = vst [vmem:[#allocation1 + $0x1] ss:$2 sm:$0xff] %v4169_v60 }
0x21d8   :  { %v4436_v51 = vadd.f32 %v5166_v61, %v4435_v45 }
0x21d9   :  { %v4334_v40 = vmul.f32 %v5164_v1, %v4333_v26 }
0x21da   :  { %v4438_v55 = vsel %vm4437_vm7, %v5166_v61, %v4436_v51 }
0x21db   :  { %v4338_v23 = vsel %vm4337_vm5, %v5164_v1, %v4334_v40 }
0x21dc   :  { %v4339_v50 = vmul.f32 %v4338_v23, %v4322_v4 }
0x21de   :  { %v4341_v53 = vmul.f32 %v5003_v49, %v4339_v50 }
0x21e0   :  { %v4343_v38 = vadd.f32 %v5004_v34, %v4341_v53 }
0x21e2   :  { %v4344_v43 = vmax.f32 %v4343_v38, 0.0 }
0x21e4   :  { %v4345_v48 = vpack.c.bf16 %v4344_v43, %v4344_v43 }
0x21e6   :  { %4418 = vmatmul.bf16.vlgmr.msra.gmra.mxu3 %v4345_v48 }
0x2269   :  { %v4419_v35 = vpop.f32.mrf.mxu3 }
0x226a   :  { %v4425_v58 = vadd.f32 %v5005_v18, %v4419_v35 }
0x226c   :  { %v4429_v21 = vsel %vm4428_vm6, %v4425_v58, 0.0 }
0x226d   :  { %4430 = vadd.xlane.f32.xlu2 %v4429_v21 }
0x2271   :  { %v4421_v30 = vpop.f32.mrf.mxu3 }
0x22e0   :  { %v4431_v59 = vpop.xlane.xlu2 %4430 }
0x22e1   :  { %v4439_v10 = vmul.f32 %v4438_v55, %v4431_v59 }
0x22e3   :  { %v4440_v17 = vsub.f32 %v4425_v58, %v4439_v10 }
0x22e5   :  { %v4441_v5 = vmul.f32 %v4440_v17, %v4440_v17 }
0x22e7   :  { %v4442_v8 = vsel %vm4428_vm6, %v4441_v5, 0.0 }
0x22e8   :  { %4443 = vadd.xlane.f32.xlu1 %v4442_v8 }
0x235b   :  { %v4444_v36 = vpop.xlane.xlu1 %4443 }
0x235c   :  { %v4445_v39 = vmul.f32 %v4444_v36, %v4438_v55 }
0x235e   :  { %v4446_v57 = vadd.f32 1e-05, %v4445_v39 }
0x2360   :  { %5167 = vrsqrt.f32 %v4446_v57  ;;  %vm4453_vm9 = vweird.f32 %v4446_v57 }
0x2366   :  { %v5168_v6 = vpop.eup %5167 }
0x2367   :  { %v4448_v52 = vmul.f32 %v5168_v6, %v4446_v57  ;;  %vm4454_vm8 = vweird.f32 %v5168_v6 }
0x2368   :  { %vm4455_vm10 = vmor %vm4453_vm9, %vm4454_vm8 }
0x2369   :  { %v4449_v4 = vmul.f32 %v5168_v6, %v4448_v52 }
0x236b   :  { %v4450_v33 = vmul.f32 0.5, %v4449_v4 }
0x236d   :  { %v4451_v42 = vsub.f32 1.5, %v4450_v33 }
0x236f   :  { %v4452_v62 = vmul.f32 %v5168_v6, %v4451_v42 }
0x2371   :  { %v4456_v46 = vsel %vm4455_vm10, %v5168_v6, %v4452_v62 }
0x2372   :  { %v4457_v56 = vmul.f32 %v4456_v46, %v4440_v17 }
0x2374   :  { %v4459_v24 = vmul.f32 %v5006_v25, %v4457_v56 }
0x2376   :  { %v4461_v3 = vadd.f32 %v5007_v13, %v4459_v24 }
0x2378   :  { %v4462_v28 = vmax.f32 %v4461_v3, 0.0 }
0x237a   :  { %v4463_v22 = vpack.c.bf16 %v4462_v28, %v4462_v28 }
0x237c   :  { %4897 = vmatmul.msk.bf16.vlgmr.msrb.gmra.mxu2 %vm4498_vm15, %v4463_v22 }
0x23ff   :  { %v4511_v16 = vpop.f32.mrf.mxu2 }
0x2400   :  { %v4512_v29 = vadd.f32 %v5008_v47, %v4511_v16 }
0x2402   :  { %4515 = vst [vmem:[#allocation9] sm:$0x3] %v4512_v29 }
0x2403   :  { %4526 = dma.vmem_to_hbm [thread:$0]  %s4522_s26, 32, %s4524_s29, [#allocation5]  }
0x2407   :  { %v4513_v27 = vpop.f32.mrf.mxu2 }
0x2408   :  { %5269 = dma.done.wait [#allocation5], 32  }
0x2409   :  { %5270 = vsyncadd [#allocation5], 4294967264 }
0x240a   :  { %4531 = vsyncpa [#allocation4], 1 }
0x240b   :  { %4532 = vsyncpa [#allocation7], 1 }
0x240c   :  { %4533 = vsyncpa [#allocation5], 1 }

</bundles_post_ra>
